<compile_context>
chip_gen: v7x
topology: tpu7x:2x2x1
jax: 0.10.0
libtpu: 0.0.40
codegen_flags: <defaults>
</compile_context>

<pallas_src>
import functools

import jax
import jax.numpy as jnp
from jax.experimental import pallas as pl
from jax.experimental.pallas import tpu as pltpu


def _round_up(x, m):
    return ((x + m - 1) // m) * m


def _pow2_floor(x):
    return 1 << (max(int(x), 1).bit_length() - 1)


def _prop_tiles(n_nodes, tile_m, tile_k):
    """Tile sizes + padded node count for the propagation matmul.

    Tiles are snapped to powers of two (>=128) and clamped to the problem
    size, so lcm(tm, tk) == max(tm, tk) and the node padding never blows up
    quadratically: at most one extra tile per axis.
    """
    n_align = _round_up(n_nodes, 128)
    cap = max(128, _pow2_floor(n_align))
    tm = max(128, min(_pow2_floor(tile_m), cap))
    tk = max(128, min(_pow2_floor(tile_k), cap))
    n_pad = _round_up(n_align, max(tm, tk))
    return tm, tk, n_pad


def prepare_graph(graph, *, tile_m=2048, tile_k=2048):
    """Pad the normalized adjacency to the tile grid and cast to bf16.

    Call ONCE outside the jitted training step and reuse the result across
    forwards/layers (doing it inside jit roughly doubles G HBM traffic).
    """
    n_nodes = graph.shape[0]
    _, _, n_pad = _prop_tiles(n_nodes, tile_m, tile_k)
    g = graph.astype(jnp.bfloat16)
    if n_pad != n_nodes:
        g = jnp.pad(g, ((0, n_pad - n_nodes), (0, n_pad - n_nodes)))
    return g


# ----------------------------------------------------------------------------
# Kernel 1: one fused LightGCN propagation layer
#   next  = G @ cur                (bf16 output, next layer's input)
#   acc   = prev_acc + G @ cur     (f32 running layer sum, aliased in/out)
# Grid = (row_tiles, k_tiles); reduction axis last; row axis "parallel".
# ----------------------------------------------------------------------------
def _propagate_layer_kernel(g_ref, cur_ref, prev_ref, next_ref, acc_ref):
    k = pl.program_id(1)

    @pl.when(k == 0)
    def _init():
        # f32 output block (i, 0) is resident across the k loop: accumulate
        # straight into it (no scratch, no final copy).
        acc_ref[...] = prev_ref[...]

    # bf16 x bf16 -> f32 accumulation on the MXU.
    acc_ref[...] += jnp.dot(g_ref[...], cur_ref[...],
                            preferred_element_type=jnp.float32)

    @pl.when(k == pl.num_programs(1) - 1)
    def _finalize():
        # Layer product = new running sum - previous running sum (both f32,
        # error well below the bf16 rounding of the store).
        next_ref[...] = (acc_ref[...] - prev_ref[...]).astype(next_ref.dtype)


def lightgcn_propagate(g_pad, all_emb, n_layers, *, tile_m=2048, tile_k=2048,
                       vmem_limit_bytes=48 * 1024 * 1024):
    """light_out = mean_{l=0..L} G^l @ E, returned with D zero-padded to 128."""
    n_nodes, dims = all_emb.shape
    d_pad = _round_up(dims, 128)                       # lane-dense embedding dim
    tm, tk, n_pad = _prop_tiles(n_nodes, tile_m, tile_k)
    assert g_pad.shape == (n_pad, n_pad), (
        f"g_pad shape {g_pad.shape} does not match expected padded size "
        f"({n_pad}, {n_pad}); build it with prepare_graph using the same tiles.")
    g_pad = g_pad.astype(jnp.bfloat16)                 # no-op if prepared outside

    # Zero-padded rows/cols/dims contribute exactly zero to every layer.
    e0 = jnp.zeros((n_pad, d_pad), jnp.float32)
    e0 = e0.at[:n_nodes, :dims].set(all_emb.astype(jnp.float32))

    layer = pl.pallas_call(
        _propagate_layer_kernel,
        out_shape=(
            jax.ShapeDtypeStruct((n_pad, d_pad), jnp.bfloat16),   # next cur
            jax.ShapeDtypeStruct((n_pad, d_pad), jnp.float32),    # running sum
        ),
        grid_spec=pltpu.PrefetchScalarGridSpec(
            num_scalar_prefetch=0,
            grid=(n_pad // tm, n_pad // tk),                      # reduction last
            in_specs=[
                pl.BlockSpec((tm, tk), lambda i, k: (i, k)),      # G tile (bf16)
                pl.BlockSpec((tk, d_pad), lambda i, k: (k, 0)),   # cur slab (bf16)
                pl.BlockSpec((tm, d_pad), lambda i, k: (i, 0)),   # prev sum (f32)
            ],
            out_specs=[
                pl.BlockSpec((tm, d_pad), lambda i, k: (i, 0)),   # next (bf16)
                pl.BlockSpec((tm, d_pad), lambda i, k: (i, 0)),   # new sum (f32)
            ],
        ),
        compiler_params=pltpu.CompilerParams(
            dimension_semantics=("parallel", "arbitrary"),
            vmem_limit_bytes=vmem_limit_bytes,
        ),
        input_output_aliases={2: 1},      # previous running sum -> new running sum
    )

    cur = e0.astype(jnp.bfloat16)         # cast layer-0 input once
    acc = e0
    # n_layers is a static Python int -> one pipelined pallas_call per layer.
    for _ in range(n_layers):
        cur, acc = layer(g_pad, cur, acc)
    light_out = acc * (1.0 / float(n_layers + 1))
    return light_out[:n_nodes]            # (n_nodes, d_pad)


# ----------------------------------------------------------------------------
# Kernel 2: pos / neg scoring, batch-tiled, lane-dense (C, tb) output
# ----------------------------------------------------------------------------
def _score_kernel(u_ref, cand_ref, o_ref):
    # u: (tb, D), cand: (C, tb, D), out: (C, tb).
    # tb is a multiple of 128 -> the output store is lane-dense (unmasked vst),
    # instead of a 95%-masked store with C (=1+N_neg) on the lane axis.
    o_ref[...] = jnp.sum(cand_ref[...] * u_ref[...][None, :, :], axis=-1)


def lightgcn_score(user_emb, cand, *, tile_b=512):
    """user_emb: (B, D); cand: (C, B, D) with candidate 0 = positive item."""
    B, D = user_emb.shape
    C = cand.shape[0]
    tb = max(128, min(_round_up(tile_b, 128), _round_up(B, 128)))
    b_pad = _round_up(B, tb)
    if b_pad != B:
        user_emb = jnp.pad(user_emb, ((0, b_pad - B), (0, 0)))
        cand = jnp.pad(cand, ((0, 0), (0, b_pad - B), (0, 0)))

    scores = pl.pallas_call(
        _score_kernel,
        out_shape=jax.ShapeDtypeStruct((C, b_pad), jnp.float32),
        grid_spec=pltpu.PrefetchScalarGridSpec(
            num_scalar_prefetch=0,
            grid=(b_pad // tb,),
            in_specs=[
                pl.BlockSpec((tb, D), lambda i: (i, 0)),
                pl.BlockSpec((C, tb, D), lambda i: (0, i, 0)),
            ],
            out_specs=pl.BlockSpec((C, tb), lambda i: (0, i)),
        ),
        compiler_params=pltpu.CompilerParams(
            dimension_semantics=("parallel",),
        ),
    )(user_emb, cand)
    return scores[0, :B], scores[1:, :B].T


# ----------------------------------------------------------------------------
# LightGCN forward (glue: embedding concat, gathers)
# ----------------------------------------------------------------------------
def lightgcn_forward(g_pad, user_w, item_w, user_id, pos_id, neg_id, *,
                     n_layers, tile_m=2048, tile_k=2048, tile_b=512,
                     vmem_limit_bytes=48 * 1024 * 1024):
    num_user = user_w.shape[0]
    all_emb = jnp.concatenate([user_w, item_w], axis=0)
    light_out = lightgcn_propagate(g_pad, all_emb, n_layers,
                                   tile_m=tile_m, tile_k=tile_k,
                                   vmem_limit_bytes=vmem_limit_bytes)
    all_users = light_out[:num_user]
    all_items = light_out[num_user:]

    # TODO(synk): fuse these gathers + the concat into the scoring kernel via
    # scalar-prefetched ids / per-row DMA to skip the HBM round-trip.
    user_emb = jnp.take(all_users, user_id, axis=0)              # (B, D_pad)
    pos_emb = jnp.take(all_items, pos_id, axis=0)                # (B, D_pad)
    neg_emb_t = jnp.take(all_items, neg_id.T, axis=0)            # (N, B, D_pad)
    cand = jnp.concatenate([pos_emb[None], neg_emb_t], axis=0)   # (C, B, D_pad)

    return lightgcn_score(user_emb, cand, tile_b=tile_b)


# ----------------------------------------------------------------------------
# Reference (pure JAX, f32) for sanity check
# ----------------------------------------------------------------------------
def lightgcn_forward_ref(graph, user_w, item_w, n_layers, user_id, pos_id, neg_id):
    num_user = user_w.shape[0]
    all_emb = jnp.concatenate([user_w, item_w], axis=0)
    embs = [all_emb]
    cur = all_emb
    for _ in range(n_layers):
        cur = graph @ cur
        embs.append(cur)
    light_out = jnp.mean(jnp.stack(embs, axis=1), axis=1)
    all_users = light_out[:num_user]
    all_items = light_out[num_user:]
    u = all_users[user_id]
    p = all_items[pos_id]
    n = all_items[neg_id]
    pos_rat = jnp.sum(u * p, axis=-1)
    neg_rat = jnp.sum(u[:, None, :] * n, axis=-1)
    return pos_rat, neg_rat


if __name__ == "__main__":
    # Small, deterministic problem (sized so the propagation grid is (2, 2)
    # and the scoring grid is (2,), exercising the pipelined accumulators).
    num_user, num_item, dims = 200, 312, 32
    n_layers = 3
    B, N_neg = 200, 4
    n_nodes = num_user + num_item  # 512

    key = jax.random.PRNGKey(0)
    k_u, k_i, k_adj, k_uid, k_pid, k_nid = jax.random.split(key, 6)

    # Xavier-normal embedding init (matches nn.init.xavier_normal_)
    def xavier_normal(k, shape):
        std = (2.0 / (shape[0] + shape[1])) ** 0.5
        return std * jax.random.normal(k, shape, dtype=jnp.float32)

    user_w = xavier_normal(k_u, (num_user, dims))
    item_w = xavier_normal(k_i, (num_item, dims))

    # Synthetic symmetric-normalized bipartite adjacency (dense stand-in for
    # the sparse torch graph).
    R = (jax.random.uniform(k_adj, (num_user, num_item)) < 0.05).astype(jnp.float32)
    A = jnp.zeros((n_nodes, n_nodes), dtype=jnp.float32)
    A = A.at[:num_user, num_user:].set(R)
    A = A.at[num_user:, :num_user].set(R.T)
    deg = jnp.sum(A, axis=1)
    d_inv_sqrt = jnp.where(deg > 0, 1.0 / jnp.sqrt(jnp.maximum(deg, 1e-12)), 0.0)
    graph = A * d_inv_sqrt[:, None] * d_inv_sqrt[None, :]

    user_id = jax.random.randint(k_uid, (B,), 0, num_user)
    pos_id = jax.random.randint(k_pid, (B,), 0, num_item)
    neg_id = jax.random.randint(k_nid, (B, N_neg), 0, num_item)

    # Small tiles here just to exercise multi-tile grids at toy size; the
    # 2048/2048/512 defaults are the real-scale choice (tm=tk capped at 2048
    # and vmem_limit <= 48 MiB so the config is also valid on v7x's 64 MiB
    # VMEM; v5e/v6e have further headroom).
    tile_m = tile_k = 256
    tile_b = 128

    # Graph pad + bf16 cast hoisted OUT of the jitted forward (done once,
    # reused across calls/layers).
    g_pad = jax.block_until_ready(prepare_graph(graph, tile_m=tile_m, tile_k=tile_k))

    fwd = jax.jit(functools.partial(lightgcn_forward, n_layers=n_layers,
                                    tile_m=tile_m, tile_k=tile_k, tile_b=tile_b))
    pos_rat, neg_rat = fwd(g_pad, user_w, item_w, user_id, pos_id, neg_id)
    jax.block_until_ready((pos_rat, neg_rat))

    # Verify against pure-JAX f32 reference (bf16 graph/activations in the
    # kernel -> loosened tolerance).
    pos_ref, neg_ref = lightgcn_forward_ref(
        graph, user_w, item_w, n_layers, user_id, pos_id, neg_id
    )
    assert pos_rat.shape == (B,) and neg_rat.shape == (B, N_neg)
    assert jnp.allclose(pos_rat, pos_ref, atol=1e-2, rtol=1e-2)
    assert jnp.allclose(neg_rat, neg_ref, atol=1e-2, rtol=1e-2)

    print("KERNEL_OK")
</pallas_src>

<mosaic_0001>
module attributes {stable_mosaic.version = 11 : i64} {
  func.func @_propagate_layer_kernel(%arg0: i32, %arg1: i32, %arg2: memref<256x256xbf16, #tpu.memory_space<vmem>>, %arg3: memref<256x128xbf16, #tpu.memory_space<vmem>>, %arg4: memref<256x128xf32, #tpu.memory_space<vmem>>, %arg5: memref<256x128xbf16, #tpu.memory_space<vmem>>, %arg6: memref<256x128xf32, #tpu.memory_space<vmem>>) attributes {dimension_semantics = [#tpu.dimension_semantics<parallel>, #tpu.dimension_semantics<arbitrary>], iteration_bounds = array<i64: 2, 2>, scalar_prefetch = 0 : i64, scratch_operands = 0 : i64, tpu.core_type = #tpu.core_type<tc>, window_params = [{transform_indices = @transform_0, window_bounds = array<i64: 256, 256>}, {transform_indices = @transform_1, window_bounds = array<i64: 256, 128>}, {transform_indices = @transform_2, window_bounds = array<i64: 256, 128>}, {transform_indices = @transform_3, window_bounds = array<i64: 256, 128>}, {transform_indices = @transform_4, window_bounds = array<i64: 256, 128>}]} {
    %c0_i32 = arith.constant 0 : i32
    %0 = arith.cmpi eq, %arg1, %c0_i32 : i32
    %1 = arith.extui %0 : i1 to i32
    %c0_i32_0 = arith.constant 0 : i32
    %2 = arith.cmpi ne, %1, %c0_i32_0 : i32
    scf.if %2 {
      %c0_9 = arith.constant 0 : index
      %c0_10 = arith.constant 0 : index
      %12 = vector.load %arg4[%c0_9, %c0_10] : memref<256x128xf32, #tpu.memory_space<vmem>>, vector<256x128xf32>
      %c0_11 = arith.constant 0 : index
      %c0_12 = arith.constant 0 : index
      %13 = vector.load %arg6[%c0_11, %c0_12] : memref<256x128xf32, #tpu.memory_space<vmem>>, vector<256x128xf32>
      tpu.vector_store %arg6[%c0_11, %c0_12], %12 {strides = array<i32>} : memref<256x128xf32, #tpu.memory_space<vmem>>, vector<256x128xf32>,
    } else {
    }
    %c0 = arith.constant 0 : index
    %c0_1 = arith.constant 0 : index
    %3 = vector.load %arg6[%c0, %c0_1] : memref<256x128xf32, #tpu.memory_space<vmem>>, vector<256x128xf32>
    %c0_2 = arith.constant 0 : index
    %c0_3 = arith.constant 0 : index
    %4 = vector.load %arg2[%c0_2, %c0_3] : memref<256x256xbf16, #tpu.memory_space<vmem>>, vector<256x256xbf16>
    %c0_4 = arith.constant 0 : index
    %c0_5 = arith.constant 0 : index
    %5 = vector.load %arg3[%c0_4, %c0_5] : memref<256x128xbf16, #tpu.memory_space<vmem>>, vector<256x128xbf16>
    %cst = arith.constant dense<0.000000e+00> : vector<256x128xf32>
    %6 = tpu.matmul %4, %5, %cst {dimension_numbers = #tpu.dot_dimension_numbers<[1], [0], [0], [1], [0, 0, 1, 1], [], []>} : vector<256x256xbf16>, vector<256x128xbf16>, vector<256x128xf32> -> vector<256x128xf32>
    %7 = arith.addf %3, %6 : vector<256x128xf32>
    %c0_6 = arith.constant 0 : index
    %c0_7 = arith.constant 0 : index
    %8 = vector.load %arg6[%c0_6, %c0_7] : memref<256x128xf32, #tpu.memory_space<vmem>>, vector<256x128xf32>
    tpu.vector_store %arg6[%c0_6, %c0_7], %7 {strides = array<i32>} : memref<256x128xf32, #tpu.memory_space<vmem>>, vector<256x128xf32>,
    %c1_i32 = arith.constant 1 : i32
    %9 = arith.cmpi eq, %arg1, %c1_i32 : i32
    %10 = arith.extui %9 : i1 to i32
    %c0_i32_8 = arith.constant 0 : i32
    %11 = arith.cmpi ne, %10, %c0_i32_8 : i32
    scf.if %11 {
      %c0_9 = arith.constant 0 : index
      %c0_10 = arith.constant 0 : index
      %12 = vector.load %arg6[%c0_9, %c0_10] : memref<256x128xf32, #tpu.memory_space<vmem>>, vector<256x128xf32>
      %c0_11 = arith.constant 0 : index
      %c0_12 = arith.constant 0 : index
      %13 = vector.load %arg4[%c0_11, %c0_12] : memref<256x128xf32, #tpu.memory_space<vmem>>, vector<256x128xf32>
      %14 = arith.subf %12, %13 : vector<256x128xf32>
      %15 = arith.truncf %14 : vector<256x128xf32> to vector<256x128xbf16>
      %c0_13 = arith.constant 0 : index
      %c0_14 = arith.constant 0 : index
      %16 = vector.load %arg5[%c0_13, %c0_14] : memref<256x128xbf16, #tpu.memory_space<vmem>>, vector<256x128xbf16>
      tpu.vector_store %arg5[%c0_13, %c0_14], %15 {strides = array<i32>} : memref<256x128xbf16, #tpu.memory_space<vmem>>, vector<256x128xbf16>,
    } else {
    }
    return
  }
  func.func @transform_0(%arg0: i32, %arg1: i32) -> (i32, i32) {
    %c0_i32 = arith.constant 0 : i32
    return %arg0, %arg1 : i32, i32
  }
  func.func @transform_1(%arg0: i32, %arg1: i32) -> (i32, i32) {
    %c0_i32 = arith.constant 0 : i32
    %c0_i32_0 = arith.constant 0 : i32
    return %arg1, %c0_i32 : i32, i32
  }
  func.func @transform_2(%arg0: i32, %arg1: i32) -> (i32, i32) {
    %c0_i32 = arith.constant 0 : i32
    %c0_i32_0 = arith.constant 0 : i32
    return %arg0, %c0_i32 : i32, i32
  }
  func.func @transform_3(%arg0: i32, %arg1: i32) -> (i32, i32) {
    %c0_i32 = arith.constant 0 : i32
    %c0_i32_0 = arith.constant 0 : i32
    return %arg0, %c0_i32 : i32, i32
  }
  func.func @transform_4(%arg0: i32, %arg1: i32) -> (i32, i32) {
    %c0_i32 = arith.constant 0 : i32
    %c0_i32_0 = arith.constant 0 : i32
    return %arg0, %c0_i32 : i32, i32
  }
}

module attributes {stable_mosaic.version = 11 : i64} {
  func.func @_propagate_layer_kernel(%arg0: i32, %arg1: i32, %arg2: memref<256x256xbf16, #tpu.memory_space<vmem>>, %arg3: memref<256x128xbf16, #tpu.memory_space<vmem>>, %arg4: memref<256x128xf32, #tpu.memory_space<vmem>>, %arg5: memref<256x128xbf16, #tpu.memory_space<vmem>>, %arg6: memref<256x128xf32, #tpu.memory_space<vmem>>) attributes {dimension_semantics = [#tpu.dimension_semantics<parallel>, #tpu.dimension_semantics<arbitrary>], iteration_bounds = array<i64: 2, 2>, scalar_prefetch = 0 : i64, scratch_operands = 0 : i64, tpu.core_type = #tpu.core_type<tc>, window_params = [{transform_indices = @transform_0, window_bounds = array<i64: 256, 256>}, {transform_indices = @transform_1, window_bounds = array<i64: 256, 128>}, {transform_indices = @transform_2, window_bounds = array<i64: 256, 128>}, {transform_indices = @transform_3, window_bounds = array<i64: 256, 128>}, {transform_indices = @transform_4, window_bounds = array<i64: 256, 128>}]} {
    %c0_i32 = arith.constant 0 : i32
    %0 = arith.cmpi eq, %arg1, %c0_i32 : i32
    %1 = arith.extui %0 : i1 to i32
    %c0_i32_0 = arith.constant 0 : i32
    %2 = arith.cmpi ne, %1, %c0_i32_0 : i32
    scf.if %2 {
      %c0_9 = arith.constant 0 : index
      %c0_10 = arith.constant 0 : index
      %12 = vector.load %arg4[%c0_9, %c0_10] : memref<256x128xf32, #tpu.memory_space<vmem>>, vector<256x128xf32>
      %c0_11 = arith.constant 0 : index
      %c0_12 = arith.constant 0 : index
      %13 = vector.load %arg6[%c0_11, %c0_12] : memref<256x128xf32, #tpu.memory_space<vmem>>, vector<256x128xf32>
      tpu.vector_store %arg6[%c0_11, %c0_12], %12 {strides = array<i32>} : memref<256x128xf32, #tpu.memory_space<vmem>>, vector<256x128xf32>,
    } else {
    }
    %c0 = arith.constant 0 : index
    %c0_1 = arith.constant 0 : index
    %3 = vector.load %arg6[%c0, %c0_1] : memref<256x128xf32, #tpu.memory_space<vmem>>, vector<256x128xf32>
    %c0_2 = arith.constant 0 : index
    %c0_3 = arith.constant 0 : index
    %4 = vector.load %arg2[%c0_2, %c0_3] : memref<256x256xbf16, #tpu.memory_space<vmem>>, vector<256x256xbf16>
    %c0_4 = arith.constant 0 : index
    %c0_5 = arith.constant 0 : index
    %5 = vector.load %arg3[%c0_4, %c0_5] : memref<256x128xbf16, #tpu.memory_space<vmem>>, vector<256x128xbf16>
    %cst = arith.constant dense<0.000000e+00> : vector<256x128xf32>
    %6 = tpu.matmul %4, %5, %cst {dimension_numbers = #tpu.dot_dimension_numbers<[1], [0], [0], [1], [0, 0, 1, 1], [], []>} : vector<256x256xbf16>, vector<256x128xbf16>, vector<256x128xf32> -> vector<256x128xf32>
    %7 = arith.addf %3, %6 : vector<256x128xf32>
    %c0_6 = arith.constant 0 : index
    %c0_7 = arith.constant 0 : index
    %8 = vector.load %arg6[%c0_6, %c0_7] : memref<256x128xf32, #tpu.memory_space<vmem>>, vector<256x128xf32>
    tpu.vector_store %arg6[%c0_6, %c0_7], %7 {strides = array<i32>} : memref<256x128xf32, #tpu.memory_space<vmem>>, vector<256x128xf32>,
    %c1_i32 = arith.constant 1 : i32
    %9 = arith.cmpi eq, %arg1, %c1_i32 : i32
    %10 = arith.extui %9 : i1 to i32
    %c0_i32_8 = arith.constant 0 : i32
    %11 = arith.cmpi ne, %10, %c0_i32_8 : i32
    scf.if %11 {
      %c0_9 = arith.constant 0 : index
      %c0_10 = arith.constant 0 : index
      %12 = vector.load %arg6[%c0_9, %c0_10] : memref<256x128xf32, #tpu.memory_space<vmem>>, vector<256x128xf32>
      %c0_11 = arith.constant 0 : index
      %c0_12 = arith.constant 0 : index
      %13 = vector.load %arg4[%c0_11, %c0_12] : memref<256x128xf32, #tpu.memory_space<vmem>>, vector<256x128xf32>
      %14 = arith.subf %12, %13 : vector<256x128xf32>
      %15 = arith.truncf %14 : vector<256x128xf32> to vector<256x128xbf16>
      %c0_13 = arith.constant 0 : index
      %c0_14 = arith.constant 0 : index
      %16 = vector.load %arg5[%c0_13, %c0_14] : memref<256x128xbf16, #tpu.memory_space<vmem>>, vector<256x128xbf16>
      tpu.vector_store %arg5[%c0_13, %c0_14], %15 {strides = array<i32>} : memref<256x128xbf16, #tpu.memory_space<vmem>>, vector<256x128xbf16>,
    } else {
    }
    return
  }
  func.func @transform_0(%arg0: i32, %arg1: i32) -> (i32, i32) {
    %c0_i32 = arith.constant 0 : i32
    return %arg0, %arg1 : i32, i32
  }
  func.func @transform_1(%arg0: i32, %arg1: i32) -> (i32, i32) {
    %c0_i32 = arith.constant 0 : i32
    %c0_i32_0 = arith.constant 0 : i32
    return %arg1, %c0_i32 : i32, i32
  }
  func.func @transform_2(%arg0: i32, %arg1: i32) -> (i32, i32) {
    %c0_i32 = arith.constant 0 : i32
    %c0_i32_0 = arith.constant 0 : i32
    return %arg0, %c0_i32 : i32, i32
  }
  func.func @transform_3(%arg0: i32, %arg1: i32) -> (i32, i32) {
    %c0_i32 = arith.constant 0 : i32
    %c0_i32_0 = arith.constant 0 : i32
    return %arg0, %c0_i32 : i32, i32
  }
  func.func @transform_4(%arg0: i32, %arg1: i32) -> (i32, i32) {
    %c0_i32 = arith.constant 0 : i32
    %c0_i32_0 = arith.constant 0 : i32
    return %arg0, %c0_i32 : i32, i32
  }
}

module attributes {stable_mosaic.version = 11 : i64} {
  func.func @_score_kernel(%arg0: i32, %arg1: memref<128x128xf32, #tpu.memory_space<vmem>>, %arg2: memref<5x128x128xf32, #tpu.memory_space<vmem>>, %arg3: memref<5x128xf32, #tpu.memory_space<vmem>>) attributes {dimension_semantics = [#tpu.dimension_semantics<parallel>], iteration_bounds = array<i64: 2>, scalar_prefetch = 0 : i64, scratch_operands = 0 : i64, tpu.core_type = #tpu.core_type<tc>, window_params = [{transform_indices = @transform_0, window_bounds = array<i64: 128, 128>}, {transform_indices = @transform_1, window_bounds = array<i64: 5, 128, 128>}, {transform_indices = @transform_2, window_bounds = array<i64: 5, 128>}]} {
    %c0 = arith.constant 0 : index
    %c0_0 = arith.constant 0 : index
    %c0_1 = arith.constant 0 : index
    %0 = vector.load %arg2[%c0, %c0_0, %c0_1] : memref<5x128x128xf32, #tpu.memory_space<vmem>>, vector<5x128x128xf32>
    %c0_2 = arith.constant 0 : index
    %c0_3 = arith.constant 0 : index
    %1 = vector.load %arg1[%c0_2, %c0_3] : memref<128x128xf32, #tpu.memory_space<vmem>>, vector<128x128xf32>
    %2 = vector.shape_cast %1 : vector<128x128xf32> to vector<1x128x128xf32>
    %3 = vector.broadcast %2 : vector<1x128x128xf32> to vector<5x128x128xf32>
    %4 = arith.mulf %0, %3 : vector<5x128x128xf32>
    %cst = arith.constant dense<0.000000e+00> : vector<5x128xf32>
    %5 = vector.multi_reduction <add>, %4, %cst [2] : vector<5x128x128xf32> to vector<5x128xf32>
    %c0_4 = arith.constant 0 : index
    %c0_5 = arith.constant 0 : index
    %6 = vector.load %arg3[%c0_4, %c0_5] : memref<5x128xf32, #tpu.memory_space<vmem>>, vector<5x128xf32>
    tpu.vector_store %arg3[%c0_4, %c0_5], %5 {strides = array<i32>} : memref<5x128xf32, #tpu.memory_space<vmem>>, vector<5x128xf32>,
    return
  }
  func.func @transform_0(%arg0: i32) -> (i32, i32) {
    %c0_i32 = arith.constant 0 : i32
    %c0_i32_0 = arith.constant 0 : i32
    return %arg0, %c0_i32 : i32, i32
  }
  func.func @transform_1(%arg0: i32) -> (i32, i32, i32) {
    %c0_i32 = arith.constant 0 : i32
    %c0_i32_0 = arith.constant 0 : i32
    %c0_i32_1 = arith.constant 0 : i32
    return %c0_i32, %arg0, %c0_i32_0 : i32, i32, i32
  }
  func.func @transform_2(%arg0: i32) -> (i32, i32) {
    %c0_i32 = arith.constant 0 : i32
    %c0_i32_0 = arith.constant 0 : i32
    return %c0_i32, %arg0 : i32, i32
  }
}

</mosaic_0001>

<bundles_post_ra>
// kernel: lightgcn_forward.4
= control target key start
LH: loop header
LB: loop body
LE: loop exit
PB: predicated region body
PF: predicated region fallthrough
CT: control target
= control target key end

     0   :  { %s2036_s15 = smov 0   ;;  %s2038_s16 = smov 0   ;;  %s2470_s0 = inlined_call_operand.vmem [shape: bf16[512,512], index: 0, kind: input, shape index: {}]   ;;  %s2471_s1 = inlined_call_operand.vmem [shape: bf16[512,128], index: 1, kind: input, shape index: {}]   ;;  %s2472_s2 = inlined_call_operand.vmem [shape: f32[512,128], index: 2, kind: input, shape index: {}, may-alias: {2,4}]   ;;  %s2473_s3 = inlined_call_operand.vmem [shape: bf16[512,128], index: 3, kind: output, shape index: {0}]   ;;  %s2474_s4 = inlined_call_operand.vmem [shape: f32[512,128], index: 4, kind: output, shape index: {1}, may-alias: {2,4}]  }
   0x1   :  { %s2040_s17 = smov 0   ;;  %s2042_s18 = smov 0  }
   0x2   :  { %s2044_s19 = smov 0   ;;  %s2046_s20 = smov 0  }
   0x3   :  { %s2048_s21 = smov 0  }
   0x4 LB: > { %s24_s22 = sadd.s32 1, %s2001_s19  ;;  %s27_s23 = sadd.s32 1, %s2005_s20  ;;  %s2009_s21 = sphi %s2048_s21, %s15_s21   ;;  %s2005_s20 = sphi %s2046_s20, %s2480_s20   ;;  %s2001_s19 = sphi %s2044_s19, %s2479_s19   ;;  %s1997_s18 = sphi %s2042_s18, %s2478_s18   ;;  %s1993_s17 = sphi %s2040_s17, %s2477_s17   ;;  %s1989_s16 = sphi %s2038_s16, %s2476_s16   ;;  %s1985_s15 = sphi %s2036_s15, %s2475_s15  }
   0x5   : > { %p25_p0 = scmp.ge.s32.totalorder %s24_s22, 2  ;;  %p43_p1 = scmp.ne.s32.totalorder %s1989_s16, %s1985_s15 }
   0x6   : > { %p44_p2 = scmp.eq.s32.totalorder %s2009_s21, 0  ;;  %s36_s27 = sadd.s32 1, %s1989_s16 }
   0x7   : > { %s2482_s22 = smov (%p25_p0, %s24_s22), 0  ;;  %s2484_s23 = smov (!%p25_p0, %s27_s23), %s2005_s20 }
   0x8   : > { %p45_p3 = por %p44_p2, %p43_p1  ;;  %p29_p4 = scmp.ge.s32.totalorder %s2484_s23, 2 }
   0x9   : > { %s32_s24 = ssub.s32 %s2001_s19, %s2482_s22  ;;  %p1479_p6 = scmp.ge.s32.totalorder %s2009_s21, 4 }
   0xa   : > { %s2486_s23 = smov (%p29_p4, %s2484_s23), 0 }
   0xb   : > { %s31_s25 = ssub.s32 %s2005_s20, %s2486_s23  ;;  %173 = sbr.rel (%p1479_p6) target bundleno = 41 (0x29), region = 16 }
   0xc   : > { %s33_s26 = sor.u32 %s32_s24, %s31_s25 }
   0xd   : > { %p34_p5 = scmp.eq.s32.totalorder %s33_s26, 0 }
   0xf   : > { %s2087_s28 = scalar_select %p34_p5, %s1989_s16, %s36_s27  }
  0x12   : > { %176 = sbr.rel (!%p45_p3) target bundleno = 41 (0x29), region = 20  ;;  %s178_s29 = sand.u32 (%p45_p3), 1, %s1989_s16  }
  0x13   : > { %s1482_s30 = sshll.u32 (%p45_p3), %s2001_s19, 1  ;;  %s1480_s5 = sshll.u32 (%p45_p3), %s178_s29, 8 }
  0x14   : > { %s1579_s6 = sshll.u32 (%p45_p3), %s2005_s20, 7  ;;  %s2101_s12 = scalar_lea.vmem (%p45_p3), [#allocation2], %s1480_s5 }
  0x15   : > { %s184_s7 = sadd.s32 (%p45_p3), %s1579_s6, %s1482_s30 }
  0x16   : > { %s1484_s8 = sshll.u32 (%p45_p3), %s184_s7, 2 }
  0x17   : > { %s2096_s11 = scalar_lea.vmem (%p45_p3), %s2470_s0, %s1484_s8 }
  0x18   : > { %v276_v0 = vld [vmem:[%s2096_s11] sm:$0xff] (%p45_p3)  ;;  %v278_v1 = vld [vmem:[%s2096_s11 + $0x10] sm:$0xff] (%p45_p3) }
  0x19   : > { %v280_v2 = vld [vmem:[%s2096_s11 + $0x20] sm:$0xff]  ;;  %277 = vst [vmem:[%s2101_s12] sm:$0xff] %v276_v0  ;;  %279 = vst [vmem:[%s2101_s12 + $0x8] sm:$0xff] %v278_v1  ;;  %v282_v3 = vld [vmem:[%s2096_s11 + $0x30] sm:$0xff] }
  0x1a   : > { %281 = vst [vmem:[%s2101_s12 + $0x10] sm:$0xff] %v280_v2  ;;  %v284_v4 = vld [vmem:[%s2096_s11 + $0x40] sm:$0xff]  ;;  %v286_v5 = vld [vmem:[%s2096_s11 + $0x50] sm:$0xff]  ;;  %283 = vst [vmem:[%s2101_s12 + $0x18] sm:$0xff] %v282_v3 }
  0x1b   : > { %285 = vst [vmem:[%s2101_s12 + $0x20] sm:$0xff] %v284_v4  ;;  %287 = vst [vmem:[%s2101_s12 + $0x28] sm:$0xff] %v286_v5  ;;  %v288_v6 = vld [vmem:[%s2096_s11 + $0x60] sm:$0xff]  ;;  %v290_v7 = vld [vmem:[%s2096_s11 + $0x70] sm:$0xff] }
  0x1c   : > { %v292_v8 = vld [vmem:[%s2096_s11 + $0x80] sm:$0xff]  ;;  %289 = vst [vmem:[%s2101_s12 + $0x30] sm:$0xff] %v288_v6  ;;  %291 = vst [vmem:[%s2101_s12 + $0x38] sm:$0xff] %v290_v7  ;;  %v294_v9 = vld [vmem:[%s2096_s11 + $0x90] sm:$0xff] }
  0x1d   : > { %293 = vst [vmem:[%s2101_s12 + $0x40] sm:$0xff] %v292_v8  ;;  %v296_v10 = vld [vmem:[%s2096_s11 + $0xa0] sm:$0xff]  ;;  %v298_v11 = vld [vmem:[%s2096_s11 + $0xb0] sm:$0xff]  ;;  %295 = vst [vmem:[%s2101_s12 + $0x48] sm:$0xff] %v294_v9 }
  0x1e   : > { %297 = vst [vmem:[%s2101_s12 + $0x50] sm:$0xff] %v296_v10  ;;  %299 = vst [vmem:[%s2101_s12 + $0x58] sm:$0xff] %v298_v11  ;;  %v300_v12 = vld [vmem:[%s2096_s11 + $0xc0] sm:$0xff]  ;;  %v302_v13 = vld [vmem:[%s2096_s11 + $0xd0] sm:$0xff] }
  0x1f   : > { %v304_v14 = vld [vmem:[%s2096_s11 + $0xe0] sm:$0xff]  ;;  %301 = vst [vmem:[%s2101_s12 + $0x60] sm:$0xff] %v300_v12  ;;  %303 = vst [vmem:[%s2101_s12 + $0x68] sm:$0xff] %v302_v13  ;;  %v306_v15 = vld [vmem:[%s2096_s11 + $0xf0] sm:$0xff] }
  0x20   : > { %305 = vst [vmem:[%s2101_s12 + $0x70] sm:$0xff] %v304_v14  ;;  %v308_v16 = vld [vmem:[%s2096_s11 + $0x100] sm:$0xff]  ;;  %v310_v17 = vld [vmem:[%s2096_s11 + $0x110] sm:$0xff]  ;;  %307 = vst [vmem:[%s2101_s12 + $0x78] sm:$0xff] %v306_v15 }
  0x21   : > { %309 = vst [vmem:[%s2101_s12 + $0x80] sm:$0xff] %v308_v16  ;;  %311 = vst [vmem:[%s2101_s12 + $0x88] sm:$0xff] %v310_v17  ;;  %v312_v18 = vld [vmem:[%s2096_s11 + $0x120] sm:$0xff]  ;;  %v314_v19 = vld [vmem:[%s2096_s11 + $0x130] sm:$0xff] }
  0x22   : > { %v316_v20 = vld [vmem:[%s2096_s11 + $0x140] sm:$0xff]  ;;  %313 = vst [vmem:[%s2101_s12 + $0x90] sm:$0xff] %v312_v18  ;;  %315 = vst [vmem:[%s2101_s12 + $0x98] sm:$0xff] %v314_v19  ;;  %v318_v21 = vld [vmem:[%s2096_s11 + $0x150] sm:$0xff] }
  0x23   : > { %317 = vst [vmem:[%s2101_s12 + $0xa0] sm:$0xff] %v316_v20  ;;  %v320_v22 = vld [vmem:[%s2096_s11 + $0x160] sm:$0xff]  ;;  %v322_v23 = vld [vmem:[%s2096_s11 + $0x170] sm:$0xff]  ;;  %319 = vst [vmem:[%s2101_s12 + $0xa8] sm:$0xff] %v318_v21 }
  0x24   : > { %321 = vst [vmem:[%s2101_s12 + $0xb0] sm:$0xff] %v320_v22  ;;  %323 = vst [vmem:[%s2101_s12 + $0xb8] sm:$0xff] %v322_v23  ;;  %v324_v24 = vld [vmem:[%s2096_s11 + $0x180] sm:$0xff]  ;;  %v326_v25 = vld [vmem:[%s2096_s11 + $0x190] sm:$0xff] }
  0x25   : > { %v328_v26 = vld [vmem:[%s2096_s11 + $0x1a0] sm:$0xff]  ;;  %325 = vst [vmem:[%s2101_s12 + $0xc0] sm:$0xff] %v324_v24  ;;  %327 = vst [vmem:[%s2101_s12 + $0xc8] sm:$0xff] %v326_v25  ;;  %v330_v27 = vld [vmem:[%s2096_s11 + $0x1b0] sm:$0xff] }
  0x26   : > { %329 = vst [vmem:[%s2101_s12 + $0xd0] sm:$0xff] %v328_v26  ;;  %v332_v28 = vld [vmem:[%s2096_s11 + $0x1c0] sm:$0xff]  ;;  %v334_v29 = vld [vmem:[%s2096_s11 + $0x1d0] sm:$0xff]  ;;  %331 = vst [vmem:[%s2101_s12 + $0xd8] sm:$0xff] %v330_v27 }
  0x27   : > { %333 = vst [vmem:[%s2101_s12 + $0xe0] sm:$0xff] %v332_v28  ;;  %335 = vst [vmem:[%s2101_s12 + $0xe8] sm:$0xff] %v334_v29  ;;  %v336_v30 = vld [vmem:[%s2096_s11 + $0x1e0] sm:$0xff]  ;;  %v338_v31 = vld [vmem:[%s2096_s11 + $0x1f0] sm:$0xff] }
  0x28   : > { %337 = vst [vmem:[%s2101_s12 + $0xf0] sm:$0xff] %v336_v30  ;;  %339 = vst [vmem:[%s2101_s12 + $0xf8] sm:$0xff] %v338_v31 }
  0x29 PF: > { %p1485_p7 = scmp.ge.s32.totalorder %s2009_s21, 1  ;;  %p362_p8 = scmp.lt.s32.totalorder %s2009_s21, 5 }
  0x2b   : > { %p363_p9 = pnand %p1485_p7, %p362_p8 }
  0x2c   : > { %s369_s13 = sand.u32 (!%p363_p9), 1, %s1985_s15   ;;  %s1487_s14 = sshll.u32 (!%p363_p9), %s1993_s17, 5 }
  0x2d   : > { %366 = sbr.rel (%p363_p9) target bundleno = 419 (0x1a3), region = 66  ;;  %s1486_s24 = sshll.u32 (!%p363_p9), %s369_s13, 8 }
  0x2e   : > { %p412_p10 = scmp.lt.s32.totalorder (!%p363_p9), %s1487_s14, 63  ;;  %s1489_s25 = sshll.u32 (!%p363_p9), %s1997_s18, 5 }
  0x2f   : > { %p418_p11 = scmp.lt.s32.totalorder (!%p363_p9), %s1489_s25, 63  ;;  %p1495_p12 = scmp.ne.s32.totalorder (!%p363_p9), %s1993_s17, 0 }
  0x34   : > { %s2488_s14 = smov (!%p412_p10, %s1487_s14), 63  ;;  %s2490_s25 = smov (!%p418_p11, %s1489_s25), 63 }
  0x35   : > { %s1488_s26 = sshll.u32 %s2488_s14, 2  ;;  %s1490_s5 = sshll.u32 %s2490_s25, 3 }
  0x36   : > { %s2172_s30 = scalar_lea.vmem %s2471_s1, %s1488_s26  ;;  %s1492_s6 = sshll.u32 %s2490_s25, 2 }
  0x37   : > { %s2177_s9 = scalar_lea.vmem %s2472_s2, %s1490_s5  ;;  %s2182_s18 = scalar_lea.vmem %s2473_s3, %s1492_s6 }
  0x38   : > { %s2187_s13 = scalar_lea.vmem %s2474_s4, %s1490_s5  ;;  %s2189_s14 = scalar_lea.vmem [#allocation2], %s1486_s24  ;;  %v440_v32 = vld [vmem:[%s2177_s9] sm:$0xff] (!%p1495_p12)  ;;  %v441_v33 = vld [vmem:[%s2177_s9 + $0x8] sm:$0xff] (!%p1495_p12)  ;;  %v442_v34 = vld [vmem:[%s2177_s9 + $0x10] sm:$0xff] (!%p1495_p12) }
  0x39   : > { %439 = sbr.rel (%p1495_p12) target bundleno = 83 (0x53), region = 74  ;;  %v443_v35 = vld [vmem:[%s2177_s9 + $0x18] sm:$0xff] (!%p1495_p12)  ;;  %v444_v36 = vld [vmem:[%s2177_s9 + $0x20] sm:$0xff] (!%p1495_p12)  ;;  %v445_v37 = vld [vmem:[%s2177_s9 + $0x28] sm:$0xff] (!%p1495_p12) }
  0x3a   : > { %v446_v38 = vld [vmem:[%s2177_s9 + $0x30] sm:$0xff] (!%p1495_p12)  ;;  %v447_v39 = vld [vmem:[%s2177_s9 + $0x38] sm:$0xff] (!%p1495_p12)  ;;  %v448_v40 = vld [vmem:[%s2177_s9 + $0x40] sm:$0xff] (!%p1495_p12) }
  0x3b   : > { %v449_v41 = vld [vmem:[%s2177_s9 + $0x48] sm:$0xff] (!%p1495_p12)  ;;  %v450_v42 = vld [vmem:[%s2177_s9 + $0x50] sm:$0xff] (!%p1495_p12)  ;;  %v451_v43 = vld [vmem:[%s2177_s9 + $0x58] sm:$0xff] (!%p1495_p12) }
  0x3c   : > { %v452_v44 = vld [vmem:[%s2177_s9 + $0x60] sm:$0xff] (!%p1495_p12)  ;;  %v453_v45 = vld [vmem:[%s2177_s9 + $0x68] sm:$0xff] (!%p1495_p12)  ;;  %v454_v46 = vld [vmem:[%s2177_s9 + $0x70] sm:$0xff] (!%p1495_p12) }
  0x3d   : > { %v455_v47 = vld [vmem:[%s2177_s9 + $0x78] sm:$0xff] (!%p1495_p12)  ;;  %v456_v48 = vld [vmem:[%s2177_s9 + $0x80] sm:$0xff] (!%p1495_p12)  ;;  %v457_v49 = vld [vmem:[%s2177_s9 + $0x88] sm:$0xff] (!%p1495_p12) }
  0x3e   : > { %v458_v50 = vld [vmem:[%s2177_s9 + $0x90] sm:$0xff] (!%p1495_p12)  ;;  %v459_v51 = vld [vmem:[%s2177_s9 + $0x98] sm:$0xff] (!%p1495_p12)  ;;  %v460_v52 = vld [vmem:[%s2177_s9 + $0xa0] sm:$0xff] (!%p1495_p12) }
  0x3f   : > { %v461_v53 = vld [vmem:[%s2177_s9 + $0xa8] sm:$0xff] (!%p1495_p12)  ;;  %v462_v54 = vld [vmem:[%s2177_s9 + $0xb0] sm:$0xff] (!%p1495_p12)  ;;  %v463_v55 = vld [vmem:[%s2177_s9 + $0xb8] sm:$0xff] (!%p1495_p12) }
  0x40   : > { %v464_v56 = vld [vmem:[%s2177_s9 + $0xc0] sm:$0xff]  ;;  %v465_v57 = vld [vmem:[%s2177_s9 + $0xc8] sm:$0xff]  ;;  %v466_v58 = vld [vmem:[%s2177_s9 + $0xd0] sm:$0xff] }
  0x41   : > { %v467_v59 = vld [vmem:[%s2177_s9 + $0xd8] sm:$0xff]  ;;  %v468_v60 = vld [vmem:[%s2177_s9 + $0xe0] sm:$0xff]  ;;  %v469_v61 = vld [vmem:[%s2177_s9 + $0xe8] sm:$0xff] }
  0x42   : > { %v470_v62 = vld [vmem:[%s2177_s9 + $0xf0] sm:$0xff]  ;;  %v471_v63 = vld [vmem:[%s2177_s9 + $0xf8] sm:$0xff] }
  0x43   : > { %472 = vst [vmem:[%s2187_s13] sm:$0xff] %v440_v32  ;;  %473 = vst [vmem:[%s2187_s13 + $0x8] sm:$0xff] %v441_v33 }
  0x44   : > { %474 = vst [vmem:[%s2187_s13 + $0x10] sm:$0xff] %v442_v34  ;;  %475 = vst [vmem:[%s2187_s13 + $0x18] sm:$0xff] %v443_v35 }
  0x45   : > { %476 = vst [vmem:[%s2187_s13 + $0x20] sm:$0xff] %v444_v36  ;;  %477 = vst [vmem:[%s2187_s13 + $0x28] sm:$0xff] %v445_v37 }
  0x46   : > { %478 = vst [vmem:[%s2187_s13 + $0x30] sm:$0xff] %v446_v38  ;;  %479 = vst [vmem:[%s2187_s13 + $0x38] sm:$0xff] %v447_v39 }
  0x47   : > { %480 = vst [vmem:[%s2187_s13 + $0x40] sm:$0xff] %v448_v40  ;;  %481 = vst [vmem:[%s2187_s13 + $0x48] sm:$0xff] %v449_v41 }
  0x48   : > { %482 = vst [vmem:[%s2187_s13 + $0x50] sm:$0xff] %v450_v42  ;;  %483 = vst [vmem:[%s2187_s13 + $0x58] sm:$0xff] %v451_v43 }
  0x49   : > { %484 = vst [vmem:[%s2187_s13 + $0x60] sm:$0xff] %v452_v44  ;;  %485 = vst [vmem:[%s2187_s13 + $0x68] sm:$0xff] %v453_v45 }
  0x4a   : > { %486 = vst [vmem:[%s2187_s13 + $0x70] sm:$0xff] %v454_v46  ;;  %487 = vst [vmem:[%s2187_s13 + $0x78] sm:$0xff] %v455_v47 }
  0x4b   : > { %488 = vst [vmem:[%s2187_s13 + $0x80] sm:$0xff] %v456_v48  ;;  %489 = vst [vmem:[%s2187_s13 + $0x88] sm:$0xff] %v457_v49 }
  0x4c   : > { %490 = vst [vmem:[%s2187_s13 + $0x90] sm:$0xff] %v458_v50  ;;  %491 = vst [vmem:[%s2187_s13 + $0x98] sm:$0xff] %v459_v51 }
  0x4d   : > { %492 = vst [vmem:[%s2187_s13 + $0xa0] sm:$0xff] %v460_v52  ;;  %493 = vst [vmem:[%s2187_s13 + $0xa8] sm:$0xff] %v461_v53 }
  0x4e   : > { %494 = vst [vmem:[%s2187_s13 + $0xb0] sm:$0xff] %v462_v54  ;;  %495 = vst [vmem:[%s2187_s13 + $0xb8] sm:$0xff] %v463_v55 }
  0x4f   : > { %496 = vst [vmem:[%s2187_s13 + $0xc0] sm:$0xff] %v464_v56  ;;  %497 = vst [vmem:[%s2187_s13 + $0xc8] sm:$0xff] %v465_v57 }
  0x50   : > { %498 = vst [vmem:[%s2187_s13 + $0xd0] sm:$0xff] %v466_v58  ;;  %499 = vst [vmem:[%s2187_s13 + $0xd8] sm:$0xff] %v467_v59 }
  0x51   : > { %500 = vst [vmem:[%s2187_s13 + $0xe0] sm:$0xff] %v468_v60  ;;  %501 = vst [vmem:[%s2187_s13 + $0xe8] sm:$0xff] %v469_v61 }
  0x52   : > { %502 = vst [vmem:[%s2187_s13 + $0xf0] sm:$0xff] %v470_v62  ;;  %503 = vst [vmem:[%s2187_s13 + $0xf8] sm:$0xff] %v471_v63 }
  0x53 PF: > { %v1891_v0 = vld [vmem:[%s2172_s30 + $0x40] sm:$0xff]   ;;  %v1893_v2 = vld [vmem:[%s2172_s30 + $0x48] sm:$0xff]   ;;  %v1895_v4 = vld [vmem:[%s2172_s30 + $0x50] sm:$0xff]   ;;  %p1544_p13 = scmp.ne.s32.totalorder %s1993_s17, 1 }
  0x54   : > { %v1892_v1 = vld [vmem:[%s2172_s30] sm:$0xff]   ;;  %1707 = vmatprep.subr.bf16.mxu0 %v1891_v0  ;;  %1819 = vmatprep.subr.bf16.mxu1 %v1891_v0  ;;  %v1894_v3 = vld [vmem:[%s2172_s30 + $0x8] sm:$0xff]   ;;  %v1896_v5 = vld [vmem:[%s2172_s30 + $0x10] sm:$0xff]  }
  0x55   : > { %1708 = vmatpush3.bf16.msra.mxu0 %v1892_v1  ;;  %1827 = vmatpush3.bf16.msra.mxu1 %v1892_v1  ;;  %v1897_v6 = vld [vmem:[%s2172_s30 + $0x58] sm:$0xff]   ;;  %v1899_v8 = vld [vmem:[%s2172_s30 + $0x60] sm:$0xff]   ;;  %v1901_v10 = vld [vmem:[%s2172_s30 + $0x68] sm:$0xff]  }
  0x56   : > { %1709 = vmatprep.subr.bf16.mxu0 %v1893_v2  ;;  %1820 = vmatprep.subr.bf16.mxu1 %v1893_v2  ;;  %v1898_v7 = vld [vmem:[%s2172_s30 + $0x18] sm:$0xff]   ;;  %v1900_v9 = vld [vmem:[%s2172_s30 + $0x20] sm:$0xff]   ;;  %v1902_v13 = vld [vmem:[%s2172_s30 + $0x28] sm:$0xff]  }
  0x57   : > { %v1909_v11 = vld [vmem:[%s2189_s14 + $0x4] ss:$8 sps:$4 sm:$0xff]   ;;  %v1903_v14 = vld [vmem:[%s2172_s30 + $0x70] sm:$0xff]   ;;  %v1905_v16 = vld [vmem:[%s2172_s30 + $0x78] sm:$0xff]  }
  0x58   : > { %v1912_v12 = vld [vmem:[%s2189_s14 + $0x84] ss:$8 sps:$4 sm:$0xff]   ;;  %888 = vmatprep.mubr.bf16.mxu0 %v1909_v11  ;;  %v1904_v15 = vld [vmem:[%s2172_s30 + $0x30] sm:$0xff]   ;;  %v1906_v17 = vld [vmem:[%s2172_s30 + $0x38] sm:$0xff]  }
  0x59   : > { %1710 = vmatpush3.bf16.msra.mxu0 %v1894_v3  ;;  %1828 = vmatpush3.bf16.msra.mxu1 %v1894_v3  ;;  %v1907_v18 = vld [vmem:[%s2189_s14] ss:$8 sps:$4 sm:$0xff]   ;;  %v1913_v20 = vld [vmem:[%s2189_s14 + $0x14] ss:$8 sps:$4 sm:$0xff]   ;;  %v1917_v22 = vld [vmem:[%s2189_s14 + $0x10] ss:$8 sps:$4 sm:$0xff]  }
  0x5a   : > { %1711 = vmatprep.subr.bf16.mxu0 %v1895_v4  ;;  %1821 = vmatprep.subr.bf16.mxu1 %v1895_v4  ;;  %v1910_v19 = vld [vmem:[%s2189_s14 + $0x80] ss:$8 sps:$4 sm:$0xff]   ;;  %v1915_v21 = vld [vmem:[%s2189_s14 + $0x94] ss:$8 sps:$4 sm:$0xff]   ;;  %v1918_v23 = vld [vmem:[%s2189_s14 + $0x90] ss:$8 sps:$4 sm:$0xff]  }
  0x5b   : > { %952 = vmatprep.mubr.bf16.mxu1 %v1912_v12  ;;  %v1919_v24 = vld [vmem:[%s2189_s14 + $0x24] ss:$8 sps:$4 sm:$0xff]   ;;  %v1923_v26 = vld [vmem:[%s2189_s14 + $0x20] ss:$8 sps:$4 sm:$0xff]   ;;  %v1925_v28 = vld [vmem:[%s2189_s14 + $0x34] ss:$8 sps:$4 sm:$0xff]  }
  0x5c   : > { %v1921_v25 = vld [vmem:[%s2189_s14 + $0xa4] ss:$8 sps:$4 sm:$0xff]   ;;  %v1924_v27 = vld [vmem:[%s2189_s14 + $0xa0] ss:$8 sps:$4 sm:$0xff]   ;;  %v1927_v29 = vld [vmem:[%s2189_s14 + $0xb4] ss:$8 sps:$4 sm:$0xff]  }
  0x5d   : > { %1712 = vmatpush3.bf16.msra.mxu0 %v1896_v5  ;;  %1829 = vmatpush3.bf16.msra.mxu1 %v1896_v5  ;;  %v1929_v30 = vld [vmem:[%s2189_s14 + $0x30] ss:$8 sps:$4 sm:$0xff]   ;;  %v1931_v32 = vld [vmem:[%s2189_s14 + $0x44] ss:$8 sps:$4 sm:$0xff]   ;;  %v1935_v34 = vld [vmem:[%s2189_s14 + $0x40] ss:$8 sps:$4 sm:$0xff]  }
  0x5e   : > { %1713 = vmatprep.subr.bf16.mxu0 %v1897_v6  ;;  %1822 = vmatprep.subr.bf16.mxu1 %v1897_v6  ;;  %v1930_v31 = vld [vmem:[%s2189_s14 + $0xb0] ss:$8 sps:$4 sm:$0xff]   ;;  %v1933_v33 = vld [vmem:[%s2189_s14 + $0xc4] ss:$8 sps:$4 sm:$0xff]   ;;  %v1936_v35 = vld [vmem:[%s2189_s14 + $0xc0] ss:$8 sps:$4 sm:$0xff]  }
  0x5f   : > { %v1937_v36 = vld [vmem:[%s2189_s14 + $0x54] ss:$8 sps:$4 sm:$0xff]   ;;  %v1941_v38 = vld [vmem:[%s2189_s14 + $0x50] ss:$8 sps:$4 sm:$0xff]   ;;  %v1943_v40 = vld [vmem:[%s2189_s14 + $0x64] ss:$8 sps:$4 sm:$0xff]  }
  0x60   : > { %v1939_v37 = vld [vmem:[%s2189_s14 + $0xd4] ss:$8 sps:$4 sm:$0xff]   ;;  %v1942_v39 = vld [vmem:[%s2189_s14 + $0xd0] ss:$8 sps:$4 sm:$0xff]   ;;  %v1945_v41 = vld [vmem:[%s2189_s14 + $0xe4] ss:$8 sps:$4 sm:$0xff]  }
  0x61   : > { %1714 = vmatpush3.bf16.msra.mxu0 %v1898_v7  ;;  %1830 = vmatpush3.bf16.msra.mxu1 %v1898_v7  ;;  %v1947_v42 = vld [vmem:[%s2189_s14 + $0x60] ss:$8 sps:$4 sm:$0xff]   ;;  %v1949_v44 = vld [vmem:[%s2189_s14 + $0x74] ss:$8 sps:$4 sm:$0xff]   ;;  %v1953_v46 = vld [vmem:[%s2189_s14 + $0x70] ss:$8 sps:$4 sm:$0xff]  }
  0x62   : > { %1715 = vmatprep.subr.bf16.mxu0 %v1899_v8  ;;  %1823 = vmatprep.subr.bf16.mxu1 %v1899_v8  ;;  %v1948_v43 = vld [vmem:[%s2189_s14 + $0xe0] ss:$8 sps:$4 sm:$0xff]   ;;  %v1951_v45 = vld [vmem:[%s2189_s14 + $0xf4] ss:$8 sps:$4 sm:$0xff]   ;;  %v1954_v47 = vld [vmem:[%s2189_s14 + $0xf0] ss:$8 sps:$4 sm:$0xff]  }
  0x63   : > { %v504_v50 = vld [vmem:[%s2187_s13] sm:$0xff]  ;;  %v505_v58 = vld [vmem:[%s2187_s13 + $0x8] sm:$0xff]  ;;  %v506_v6 = vld [vmem:[%s2187_s13 + $0x10] sm:$0xff] }
  0x64   : > { %v520_v52 = vld [vmem:[%s2187_s13 + $0x80] sm:$0xff]  ;;  %v521_v60 = vld [vmem:[%s2187_s13 + $0x88] sm:$0xff]  ;;  %v522_v8 = vld [vmem:[%s2187_s13 + $0x90] sm:$0xff] }
  0x65   : > { %1716 = vmatpush3.bf16.msra.mxu0 %v1900_v9  ;;  %1831 = vmatpush3.bf16.msra.mxu1 %v1900_v9 }
  0x66   : > { %1717 = vmatprep.subr.bf16.mxu0 %v1901_v10  ;;  %1824 = vmatprep.subr.bf16.mxu1 %v1901_v10 }
  0x69   : > { %1718 = vmatpush3.bf16.msra.mxu0 %v1902_v13  ;;  %1832 = vmatpush3.bf16.msra.mxu1 %v1902_v13 }
  0x6a   : > { %1719 = vmatprep.subr.bf16.mxu0 %v1903_v14  ;;  %1825 = vmatprep.subr.bf16.mxu1 %v1903_v14  ;;  %v507_v14 = vld [vmem:[%s2187_s13 + $0x18] sm:$0xff] }
  0x6d   : > { %1720 = vmatpush3.bf16.msra.mxu0 %v1904_v15  ;;  %1833 = vmatpush3.bf16.msra.mxu1 %v1904_v15 }
  0x6e   : > { %1721 = vmatprep.subr.bf16.mxu0 %v1905_v16  ;;  %1826 = vmatprep.subr.bf16.mxu1 %v1905_v16  ;;  %v523_v16 = vld [vmem:[%s2187_s13 + $0x98] sm:$0xff] }
  0x71   : > { %1722 = vmatpush3.bf16.msra.mxu0 %v1906_v17  ;;  %1834 = vmatpush3.bf16.msra.mxu1 %v1906_v17 }
  0x74   : > { %889 = vmatmul.mubr.bf16.vlgmr.msra.gmra.mrb[0].mxu0 %v1907_v18  ;;  %953 = vmatmul.mubr.bf16.vlgmr.msra.gmra.mrb[0].mxu1 %v1910_v19 }
  0x75   : > { %896 = vmatprep.mubr.bf16.mxu0 %v1913_v20  ;;  %960 = vmatprep.mubr.bf16.mxu1 %v1915_v21 }
  0x7c   : > { %897 = vmatmul.mubr.bf16.gmra.mrb[4].mxu0 %v1917_v22  ;;  %961 = vmatmul.mubr.bf16.gmra.mrb[4].mxu1 %v1918_v23 }
  0x7d   : > { %904 = vmatprep.mubr.bf16.mxu0 %v1919_v24  ;;  %968 = vmatprep.mubr.bf16.mxu1 %v1921_v25 }
  0x84   : > { %905 = vmatmul.mubr.bf16.gmra.mrb[8].mxu0 %v1923_v26  ;;  %969 = vmatmul.mubr.bf16.gmra.mrb[8].mxu1 %v1924_v27  ;;  %v508_v26 = vld [vmem:[%s2187_s13 + $0x20] sm:$0xff] }
  0x85   : > { %912 = vmatprep.mubr.bf16.mxu0 %v1925_v28  ;;  %976 = vmatprep.mubr.bf16.mxu1 %v1927_v29  ;;  %v524_v28 = vld [vmem:[%s2187_s13 + $0xa0] sm:$0xff] }
  0x8c   : > { %913 = vmatmul.mubr.bf16.gmra.mrb[12].mxu0 %v1929_v30  ;;  %977 = vmatmul.mubr.bf16.gmra.mrb[12].mxu1 %v1930_v31 }
  0x8d   : > { %920 = vmatprep.mubr.bf16.mxu0 %v1931_v32  ;;  %984 = vmatprep.mubr.bf16.mxu1 %v1933_v33 }
  0x94   : > { %921 = vmatmul.mubr.bf16.gmra.mrb[16].mxu0 %v1935_v34  ;;  %985 = vmatmul.mubr.bf16.gmra.mrb[16].mxu1 %v1936_v35  ;;  %v509_v34 = vld [vmem:[%s2187_s13 + $0x28] sm:$0xff] }
  0x95   : > { %928 = vmatprep.mubr.bf16.mxu0 %v1937_v36  ;;  %992 = vmatprep.mubr.bf16.mxu1 %v1939_v37  ;;  %v525_v36 = vld [vmem:[%s2187_s13 + $0xa8] sm:$0xff] }
  0x9c   : > { %929 = vmatmul.mubr.bf16.gmra.mrb[20].mxu0 %v1941_v38  ;;  %993 = vmatmul.mubr.bf16.gmra.mrb[20].mxu1 %v1942_v39 }
  0x9d   : > { %936 = vmatprep.mubr.bf16.mxu0 %v1943_v40  ;;  %1000 = vmatprep.mubr.bf16.mxu1 %v1945_v41 }
  0xa4   : > { %937 = vmatmul.mubr.bf16.gmra.mrb[24].mxu0 %v1947_v42  ;;  %1001 = vmatmul.mubr.bf16.gmra.mrb[24].mxu1 %v1948_v43 }
  0xa5   : > { %944 = vmatprep.mubr.bf16.mxu0 %v1949_v44  ;;  %1008 = vmatprep.mubr.bf16.mxu1 %v1951_v45 }
  0xac   : > { %945 = vmatmul.mubr.bf16.gmra.mrb[28].mxu0 %v1953_v46  ;;  %1009 = vmatmul.mubr.bf16.gmra.mrb[28].mxu1 %v1954_v47  ;;  %v510_v46 = vld [vmem:[%s2187_s13 + $0x30] sm:$0xff] }
 0x147   : > { %v1723_v48 = vpop.f32.mrb[0].mxu0  ;;  %v1771_v49 = vpop.f32.mrb[0].mxu1 }
 0x148   : > { %v1724_v51 = vpop.f32.mrb[1].mxu0  ;;  %v1772_v53 = vpop.f32.mrb[1].mxu1 }
 0x149   : > { %v1725_v54 = vadd.f32 %v1724_v51, %v1723_v48  ;;  %v1773_v55 = vadd.f32 %v1772_v53, %v1771_v49  ;;  %v1726_v56 = vpop.f32.mrb[2].mxu0  ;;  %v1774_v57 = vpop.f32.mrb[2].mxu1  ;;  %v526_v48 = vld [vmem:[%s2187_s13 + $0xb0] sm:$0xff] }
 0x14a   : > { %v1727_v59 = vpop.f32.mrb[3].mxu0  ;;  %v1775_v61 = vpop.f32.mrb[3].mxu1 }
 0x14b   : > { %v1017_v62 = vadd.f32 %v1725_v54, %v504_v50  ;;  %v1033_v63 = vadd.f32 %v1773_v55, %v520_v52  ;;  %v1728_v0 = vadd.f32 %v1727_v59, %v1726_v56  ;;  %v1776_v1 = vadd.f32 %v1775_v61, %v1774_v57  ;;  %v511_v54 = vld [vmem:[%s2187_s13 + $0x38] sm:$0xff] }
 0x14c   : > { %v527_v56 = vld [vmem:[%s2187_s13 + $0xb8] sm:$0xff] }
 0x14d   : > { %1049 = vst [vmem:[%s2187_s13] sm:$0xff] %v1017_v62  ;;  %1065 = vst [vmem:[%s2187_s13 + $0x80] sm:$0xff] %v1033_v63  ;;  %v1018_v2 = vadd.f32 %v1728_v0, %v505_v58  ;;  %v1034_v3 = vadd.f32 %v1776_v1, %v521_v60 }
 0x14f   : > { %1050 = vst [vmem:[%s2187_s13 + $0x8] sm:$0xff] %v1018_v2  ;;  %1066 = vst [vmem:[%s2187_s13 + $0x88] sm:$0xff] %v1034_v3  ;;  %v1729_v4 = vpop.f32.mrb[4].mxu0  ;;  %v1777_v5 = vpop.f32.mrb[4].mxu1  ;;  %v512_v2 = vld [vmem:[%s2187_s13 + $0x40] sm:$0xff] }
 0x150   : > { %v1730_v7 = vpop.f32.mrb[5].mxu0  ;;  %v1778_v9 = vpop.f32.mrb[5].mxu1 }
 0x151   : > { %v1731_v10 = vadd.f32 %v1730_v7, %v1729_v4  ;;  %v1779_v11 = vadd.f32 %v1778_v9, %v1777_v5  ;;  %v1732_v12 = vpop.f32.mrb[6].mxu0  ;;  %v1780_v13 = vpop.f32.mrb[6].mxu1  ;;  %v528_v4 = vld [vmem:[%s2187_s13 + $0xc0] sm:$0xff] }
 0x152   : > { %v1733_v15 = vpop.f32.mrb[7].mxu0  ;;  %v1781_v17 = vpop.f32.mrb[7].mxu1 }
 0x153   : > { %v1019_v18 = vadd.f32 %v1731_v10, %v506_v6  ;;  %v1035_v19 = vadd.f32 %v1779_v11, %v522_v8  ;;  %v1734_v20 = vadd.f32 %v1733_v15, %v1732_v12  ;;  %v1782_v21 = vadd.f32 %v1781_v17, %v1780_v13  ;;  %v513_v10 = vld [vmem:[%s2187_s13 + $0x48] sm:$0xff] }
 0x154   : > { %v529_v12 = vld [vmem:[%s2187_s13 + $0xc8] sm:$0xff] }
 0x155   : > { %1051 = vst [vmem:[%s2187_s13 + $0x10] sm:$0xff] %v1019_v18  ;;  %1067 = vst [vmem:[%s2187_s13 + $0x90] sm:$0xff] %v1035_v19  ;;  %v1020_v22 = vadd.f32 %v1734_v20, %v507_v14  ;;  %v1036_v23 = vadd.f32 %v1782_v21, %v523_v16 }
 0x157   : > { %1052 = vst [vmem:[%s2187_s13 + $0x18] sm:$0xff] %v1020_v22  ;;  %1068 = vst [vmem:[%s2187_s13 + $0x98] sm:$0xff] %v1036_v23  ;;  %v1735_v24 = vpop.f32.mrb[8].mxu0  ;;  %v1783_v25 = vpop.f32.mrb[8].mxu1  ;;  %v514_v22 = vld [vmem:[%s2187_s13 + $0x50] sm:$0xff] }
 0x158   : > { %v1736_v27 = vpop.f32.mrb[9].mxu0  ;;  %v1784_v29 = vpop.f32.mrb[9].mxu1 }
 0x159   : > { %v1737_v30 = vadd.f32 %v1736_v27, %v1735_v24  ;;  %v1785_v31 = vadd.f32 %v1784_v29, %v1783_v25  ;;  %v1738_v32 = vpop.f32.mrb[10].mxu0  ;;  %v1786_v33 = vpop.f32.mrb[10].mxu1  ;;  %v530_v24 = vld [vmem:[%s2187_s13 + $0xd0] sm:$0xff] }
 0x15a   : > { %v1739_v35 = vpop.f32.mrb[11].mxu0  ;;  %v1787_v37 = vpop.f32.mrb[11].mxu1 }
 0x15b   : > { %v1021_v38 = vadd.f32 %v1737_v30, %v508_v26  ;;  %v1037_v39 = vadd.f32 %v1785_v31, %v524_v28  ;;  %v1740_v40 = vadd.f32 %v1739_v35, %v1738_v32  ;;  %v1788_v41 = vadd.f32 %v1787_v37, %v1786_v33  ;;  %v515_v30 = vld [vmem:[%s2187_s13 + $0x58] sm:$0xff] }
 0x15c   : > { %v531_v32 = vld [vmem:[%s2187_s13 + $0xd8] sm:$0xff] }
 0x15d   : > { %1053 = vst [vmem:[%s2187_s13 + $0x20] sm:$0xff] %v1021_v38  ;;  %1069 = vst [vmem:[%s2187_s13 + $0xa0] sm:$0xff] %v1037_v39  ;;  %v1022_v42 = vadd.f32 %v1740_v40, %v509_v34  ;;  %v1038_v43 = vadd.f32 %v1788_v41, %v525_v36 }
 0x15f   : > { %1054 = vst [vmem:[%s2187_s13 + $0x28] sm:$0xff] %v1022_v42  ;;  %1070 = vst [vmem:[%s2187_s13 + $0xa8] sm:$0xff] %v1038_v43  ;;  %v1741_v44 = vpop.f32.mrb[12].mxu0  ;;  %v1789_v45 = vpop.f32.mrb[12].mxu1  ;;  %v516_v42 = vld [vmem:[%s2187_s13 + $0x60] sm:$0xff] }
 0x160   : > { %v1742_v47 = vpop.f32.mrb[13].mxu0  ;;  %v1790_v49 = vpop.f32.mrb[13].mxu1 }
 0x161   : > { %v1743_v50 = vadd.f32 %v1742_v47, %v1741_v44  ;;  %v1791_v51 = vadd.f32 %v1790_v49, %v1789_v45  ;;  %v1744_v52 = vpop.f32.mrb[14].mxu0  ;;  %v1792_v53 = vpop.f32.mrb[14].mxu1  ;;  %v532_v44 = vld [vmem:[%s2187_s13 + $0xe0] sm:$0xff] }
 0x162   : > { %v1745_v55 = vpop.f32.mrb[15].mxu0  ;;  %v1793_v57 = vpop.f32.mrb[15].mxu1 }
 0x163   : > { %v1023_v58 = vadd.f32 %v1743_v50, %v510_v46  ;;  %v1039_v59 = vadd.f32 %v1791_v51, %v526_v48  ;;  %v1746_v60 = vadd.f32 %v1745_v55, %v1744_v52  ;;  %v1794_v61 = vadd.f32 %v1793_v57, %v1792_v53  ;;  %v517_v50 = vld [vmem:[%s2187_s13 + $0x68] sm:$0xff] }
 0x164   : > { %v533_v52 = vld [vmem:[%s2187_s13 + $0xe8] sm:$0xff] }
 0x165   : > { %1055 = vst [vmem:[%s2187_s13 + $0x30] sm:$0xff] %v1023_v58  ;;  %1071 = vst [vmem:[%s2187_s13 + $0xb0] sm:$0xff] %v1039_v59  ;;  %v1024_v62 = vadd.f32 %v1746_v60, %v511_v54  ;;  %v1040_v63 = vadd.f32 %v1794_v61, %v527_v56 }
 0x167   : > { %1056 = vst [vmem:[%s2187_s13 + $0x38] sm:$0xff] %v1024_v62  ;;  %1072 = vst [vmem:[%s2187_s13 + $0xb8] sm:$0xff] %v1040_v63  ;;  %v1747_v0 = vpop.f32.mrb[16].mxu0  ;;  %v1795_v1 = vpop.f32.mrb[16].mxu1  ;;  %v518_v62 = vld [vmem:[%s2187_s13 + $0x70] sm:$0xff] }
 0x168   : > { %v1748_v3 = vpop.f32.mrb[17].mxu0  ;;  %v1796_v5 = vpop.f32.mrb[17].mxu1 }
 0x169   : > { %v1749_v6 = vadd.f32 %v1748_v3, %v1747_v0  ;;  %v1797_v7 = vadd.f32 %v1796_v5, %v1795_v1  ;;  %v1750_v8 = vpop.f32.mrb[18].mxu0  ;;  %v1798_v9 = vpop.f32.mrb[18].mxu1  ;;  %v534_v0 = vld [vmem:[%s2187_s13 + $0xf0] sm:$0xff] }
 0x16a   : > { %v1751_v11 = vpop.f32.mrb[19].mxu0  ;;  %v1799_v13 = vpop.f32.mrb[19].mxu1 }
 0x16b   : > { %v1025_v14 = vadd.f32 %v1749_v6, %v512_v2  ;;  %v1041_v15 = vadd.f32 %v1797_v7, %v528_v4  ;;  %v1752_v16 = vadd.f32 %v1751_v11, %v1750_v8  ;;  %v1800_v17 = vadd.f32 %v1799_v13, %v1798_v9  ;;  %v519_v6 = vld [vmem:[%s2187_s13 + $0x78] sm:$0xff] }
 0x16c   : > { %v535_v8 = vld [vmem:[%s2187_s13 + $0xf8] sm:$0xff] }
 0x16d   : > { %1057 = vst [vmem:[%s2187_s13 + $0x40] sm:$0xff] %v1025_v14  ;;  %1073 = vst [vmem:[%s2187_s13 + $0xc0] sm:$0xff] %v1041_v15  ;;  %v1026_v18 = vadd.f32 %v1752_v16, %v513_v10  ;;  %v1042_v19 = vadd.f32 %v1800_v17, %v529_v12  ;;  %v1085_v16 = vld [vmem:[%s2187_s13] sm:$0xff] (!%p1544_p13)  ;;  %v1086_v17 = vld [vmem:[%s2187_s13 + $0x8] sm:$0xff] (!%p1544_p13) }
 0x16f   : > { %1058 = vst [vmem:[%s2187_s13 + $0x48] sm:$0xff] %v1026_v18  ;;  %1074 = vst [vmem:[%s2187_s13 + $0xc8] sm:$0xff] %v1042_v19  ;;  %v1753_v20 = vpop.f32.mrb[20].mxu0  ;;  %v1801_v21 = vpop.f32.mrb[20].mxu1 }
 0x170   : > { %v1754_v23 = vpop.f32.mrb[21].mxu0  ;;  %v1802_v25 = vpop.f32.mrb[21].mxu1 }
 0x171   : > { %v1755_v26 = vadd.f32 %v1754_v23, %v1753_v20  ;;  %v1803_v27 = vadd.f32 %v1802_v25, %v1801_v21  ;;  %v1756_v28 = vpop.f32.mrb[22].mxu0  ;;  %v1804_v29 = vpop.f32.mrb[22].mxu1  ;;  %v1087_v21 = vld [vmem:[%s2187_s13 + $0x10] sm:$0xff] (!%p1544_p13) }
 0x172   : > { %v1757_v31 = vpop.f32.mrb[23].mxu0  ;;  %v1805_v33 = vpop.f32.mrb[23].mxu1 }
 0x173   : > { %v1027_v34 = vadd.f32 %v1755_v26, %v514_v22  ;;  %v1043_v35 = vadd.f32 %v1803_v27, %v530_v24  ;;  %v1758_v36 = vadd.f32 %v1757_v31, %v1756_v28  ;;  %v1806_v37 = vadd.f32 %v1805_v33, %v1804_v29  ;;  %v1088_v22 = vld [vmem:[%s2187_s13 + $0x18] sm:$0xff] (!%p1544_p13)  ;;  %v1089_v26 = vld [vmem:[%s2187_s13 + $0x20] sm:$0xff] (!%p1544_p13)  ;;  %v1090_v29 = vld [vmem:[%s2187_s13 + $0x28] sm:$0xff] (!%p1544_p13) }
 0x175   : > { %1059 = vst [vmem:[%s2187_s13 + $0x50] sm:$0xff] %v1027_v34  ;;  %1075 = vst [vmem:[%s2187_s13 + $0xd0] sm:$0xff] %v1043_v35  ;;  %v1028_v38 = vadd.f32 %v1758_v36, %v515_v30  ;;  %v1044_v39 = vadd.f32 %v1806_v37, %v531_v32  ;;  %v1091_v35 = vld [vmem:[%s2187_s13 + $0x30] sm:$0xff] (!%p1544_p13)  ;;  %v1092_v36 = vld [vmem:[%s2187_s13 + $0x38] sm:$0xff] (!%p1544_p13) }
 0x177   : > { %1060 = vst [vmem:[%s2187_s13 + $0x58] sm:$0xff] %v1028_v38  ;;  %1076 = vst [vmem:[%s2187_s13 + $0xd8] sm:$0xff] %v1044_v39  ;;  %v1759_v40 = vpop.f32.mrb[24].mxu0  ;;  %v1807_v41 = vpop.f32.mrb[24].mxu1 }
 0x178   : > { %v1760_v43 = vpop.f32.mrb[25].mxu0  ;;  %v1808_v45 = vpop.f32.mrb[25].mxu1 }
 0x179   : > { %v1761_v46 = vadd.f32 %v1760_v43, %v1759_v40  ;;  %v1809_v47 = vadd.f32 %v1808_v45, %v1807_v41  ;;  %v1762_v48 = vpop.f32.mrb[26].mxu0  ;;  %v1810_v49 = vpop.f32.mrb[26].mxu1  ;;  %v1093_v41 = vld [vmem:[%s2187_s13 + $0x40] sm:$0xff] (!%p1544_p13) }
 0x17a   : > { %v1763_v51 = vpop.f32.mrb[27].mxu0  ;;  %v1811_v53 = vpop.f32.mrb[27].mxu1 }
 0x17b   : > { %v1029_v54 = vadd.f32 %v1761_v46, %v516_v42  ;;  %v1045_v55 = vadd.f32 %v1809_v47, %v532_v44  ;;  %v1764_v56 = vadd.f32 %v1763_v51, %v1762_v48  ;;  %v1812_v57 = vadd.f32 %v1811_v53, %v1810_v49  ;;  %v1094_v42 = vld [vmem:[%s2187_s13 + $0x48] sm:$0xff] (!%p1544_p13) }
 0x17c   : > { %v1095_v47 = vld [vmem:[%s2187_s13 + $0x50] sm:$0xff] (!%p1544_p13) }
 0x17d   : > { %1061 = vst [vmem:[%s2187_s13 + $0x60] sm:$0xff] %v1029_v54  ;;  %1077 = vst [vmem:[%s2187_s13 + $0xe0] sm:$0xff] %v1045_v55  ;;  %v1030_v58 = vadd.f32 %v1764_v56, %v517_v50  ;;  %v1046_v59 = vadd.f32 %v1812_v57, %v533_v52 }
 0x17e   : > { %v1096_v50 = vld [vmem:[%s2187_s13 + $0x58] sm:$0xff] (!%p1544_p13) }
 0x17f   : > { %1062 = vst [vmem:[%s2187_s13 + $0x68] sm:$0xff] %v1030_v58  ;;  %1078 = vst [vmem:[%s2187_s13 + $0xe8] sm:$0xff] %v1046_v59  ;;  %v1765_v60 = vpop.f32.mrb[28].mxu0  ;;  %v1813_v61 = vpop.f32.mrb[28].mxu1 }
 0x180   : > { %v1766_v63 = vpop.f32.mrb[29].mxu0  ;;  %v1814_v1 = vpop.f32.mrb[29].mxu1 }
 0x181   : > { %v1767_v2 = vadd.f32 %v1766_v63, %v1765_v60  ;;  %v1815_v3 = vadd.f32 %v1814_v1, %v1813_v61  ;;  %v1768_v4 = vpop.f32.mrb[30].mxu0  ;;  %v1816_v5 = vpop.f32.mrb[30].mxu1  ;;  %1084 = sbr.rel (%p1544_p13) target bundleno = 419 (0x1a3), region = 78 }
 0x182   : > { %v1769_v7 = vpop.f32.mrb[31].mxu0  ;;  %v1817_v9 = vpop.f32.mrb[31].mxu1 }
 0x183   : > { %v1031_v10 = vadd.f32 %v1767_v2, %v518_v62  ;;  %v1047_v11 = vadd.f32 %v1815_v3, %v534_v0  ;;  %v1770_v12 = vadd.f32 %v1769_v7, %v1768_v4  ;;  %v1818_v13 = vadd.f32 %v1817_v9, %v1816_v5  ;;  %v1101_v4 = vld [vmem:[%s2187_s13 + $0x80] sm:$0xff] (!%p1544_p13)  ;;  %v1102_v7 = vld [vmem:[%s2187_s13 + $0x88] sm:$0xff] (!%p1544_p13) }
 0x184   : > { %v1097_v56 = vld [vmem:[%s2187_s13 + $0x60] sm:$0xff] (!%p1544_p13) }
 0x185   : > { %1063 = vst [vmem:[%s2187_s13 + $0x70] sm:$0xff] %v1031_v10  ;;  %1079 = vst [vmem:[%s2187_s13 + $0xf0] sm:$0xff] %v1047_v11  ;;  %v1032_v14 = vadd.f32 %v1770_v12, %v519_v6  ;;  %v1048_v15 = vadd.f32 %v1818_v13, %v535_v8  ;;  %v1103_v13 = vld [vmem:[%s2187_s13 + $0x90] sm:$0xff] (!%p1544_p13) }
 0x186   : > { %v1098_v57 = vld [vmem:[%s2187_s13 + $0x68] sm:$0xff] (!%p1544_p13) }
 0x187   : > { %1064 = vst [vmem:[%s2187_s13 + $0x78] sm:$0xff] %v1032_v14  ;;  %1080 = vst [vmem:[%s2187_s13 + $0xf8] sm:$0xff] %v1048_v15  ;;  %v1104_v14 = vld [vmem:[%s2187_s13 + $0x98] sm:$0xff] (!%p1544_p13) }
 0x18c   : > { %v1099_v62 = vld [vmem:[%s2187_s13 + $0x70] sm:$0xff] }
 0x18e   : > { %v1117_v18 = vld [vmem:[%s2177_s9] sm:$0xff]  ;;  %v1118_v19 = vld [vmem:[%s2177_s9 + $0x8] sm:$0xff]  ;;  %v1119_v24 = vld [vmem:[%s2177_s9 + $0x10] sm:$0xff] }
 0x18f   : > { %v1149_v20 = vsub.f32 %v1085_v16, %v1117_v18  ;;  %v1150_v23 = vsub.f32 %v1086_v17, %v1118_v19  ;;  %v1120_v25 = vld [vmem:[%s2177_s9 + $0x18] sm:$0xff]  ;;  %v1151_v27 = vsub.f32 %v1087_v21, %v1119_v24  ;;  %v1121_v30 = vld [vmem:[%s2177_s9 + $0x20] sm:$0xff]  ;;  %v1122_v31 = vld [vmem:[%s2177_s9 + $0x28] sm:$0xff] }
 0x190   : > { %v1152_v28 = vsub.f32 %v1088_v22, %v1120_v25  ;;  %v1153_v33 = vsub.f32 %v1089_v26, %v1121_v30  ;;  %v1154_v34 = vsub.f32 %v1090_v29, %v1122_v31  ;;  %v1123_v37 = vld [vmem:[%s2177_s9 + $0x30] sm:$0xff]  ;;  %v1124_v39 = vld [vmem:[%s2177_s9 + $0x38] sm:$0xff]  ;;  %v1125_v45 = vld [vmem:[%s2177_s9 + $0x40] sm:$0xff] }
 0x191   : > { %v1615_v32 = vpack.c.bf16 %v1150_v23, %v1149_v20  ;;  %v1155_v40 = vsub.f32 %v1091_v35, %v1123_v37  ;;  %v1156_v44 = vsub.f32 %v1092_v36, %v1124_v39  ;;  %v1126_v46 = vld [vmem:[%s2177_s9 + $0x48] sm:$0xff]  ;;  %v1157_v48 = vsub.f32 %v1093_v41, %v1125_v45  ;;  %v1127_v51 = vld [vmem:[%s2177_s9 + $0x50] sm:$0xff]  ;;  %v1128_v52 = vld [vmem:[%s2177_s9 + $0x58] sm:$0xff] }
 0x192   : > { %v1620_v38 = vpack.c.bf16 %v1152_v28, %v1151_v27  ;;  %v1625_v43 = vpack.c.bf16 %v1154_v34, %v1153_v33  ;;  %v1158_v49 = vsub.f32 %v1094_v42, %v1126_v46  ;;  %v1159_v54 = vsub.f32 %v1095_v47, %v1127_v51  ;;  %v1129_v58 = vld [vmem:[%s2177_s9 + $0x60] sm:$0xff]  ;;  %v1130_v60 = vld [vmem:[%s2177_s9 + $0x68] sm:$0xff]  ;;  %v1100_v63 = vld [vmem:[%s2187_s13 + $0x78] sm:$0xff] }
 0x193   : > { %1616 = vst [vmem:[%s2182_s18] sm:$0xff] %v1615_v32   ;;  %v1630_v53 = vpack.c.bf16 %v1156_v44, %v1155_v40  ;;  %v1160_v55 = vsub.f32 %v1096_v50, %v1128_v52  ;;  %v1161_v61 = vsub.f32 %v1097_v56, %v1129_v58  ;;  %v1162_v1 = vsub.f32 %v1098_v57, %v1130_v60  ;;  %v1131_v2 = vld [vmem:[%s2177_s9 + $0x70] sm:$0xff]  ;;  %v1132_v3 = vld [vmem:[%s2177_s9 + $0x78] sm:$0xff]  ;;  %v1133_v8 = vld [vmem:[%s2177_s9 + $0x80] sm:$0xff] }
 0x194   : > { %1692 = vst [vmem:[%s2182_s18 + $0x8] sm:$0xff] %v1620_v38   ;;  %1693 = vst [vmem:[%s2182_s18 + $0x10] sm:$0xff] %v1625_v43   ;;  %v1635_v59 = vpack.c.bf16 %v1158_v49, %v1157_v48  ;;  %v1163_v5 = vsub.f32 %v1099_v62, %v1131_v2  ;;  %v1164_v6 = vsub.f32 %v1100_v63, %v1132_v3  ;;  %v1134_v9 = vld [vmem:[%s2177_s9 + $0x88] sm:$0xff]  ;;  %v1135_v15 = vld [vmem:[%s2177_s9 + $0x90] sm:$0xff] }
 0x195   : > { %1694 = vst [vmem:[%s2182_s18 + $0x18] sm:$0xff] %v1630_v53   ;;  %v1640_v0 = vpack.c.bf16 %v1160_v55, %v1159_v54  ;;  %v1645_v10 = vpack.c.bf16 %v1162_v1, %v1161_v61  ;;  %v1165_v11 = vsub.f32 %v1101_v4, %v1133_v8  ;;  %v1166_v12 = vsub.f32 %v1102_v7, %v1134_v9  ;;  %v1136_v17 = vld [vmem:[%s2177_s9 + $0x98] sm:$0xff]  ;;  %v1105_v19 = vld [vmem:[%s2187_s13 + $0xa0] sm:$0xff]  ;;  %v1106_v20 = vld [vmem:[%s2187_s13 + $0xa8] sm:$0xff] }
 0x196   : > { %1695 = vst [vmem:[%s2182_s18 + $0x20] sm:$0xff] %v1635_v59   ;;  %v1650_v16 = vpack.c.bf16 %v1164_v6, %v1163_v5  ;;  %v1167_v18 = vsub.f32 %v1103_v13, %v1135_v15  ;;  %v1168_v22 = vsub.f32 %v1104_v14, %v1136_v17  ;;  %v1137_v23 = vld [vmem:[%s2177_s9 + $0xa0] sm:$0xff]  ;;  %v1138_v24 = vld [vmem:[%s2177_s9 + $0xa8] sm:$0xff]  ;;  %v1107_v25 = vld [vmem:[%s2187_s13 + $0xb0] sm:$0xff] }
 0x197   : > { %1696 = vst [vmem:[%s2182_s18 + $0x28] sm:$0xff] %v1640_v0   ;;  %1697 = vst [vmem:[%s2182_s18 + $0x30] sm:$0xff] %v1645_v10   ;;  %v1655_v21 = vpack.c.bf16 %v1166_v12, %v1165_v11  ;;  %v1169_v26 = vsub.f32 %v1105_v19, %v1137_v23  ;;  %v1170_v27 = vsub.f32 %v1106_v20, %v1138_v24  ;;  %v1108_v28 = vld [vmem:[%s2187_s13 + $0xb8] sm:$0xff]  ;;  %v1139_v29 = vld [vmem:[%s2177_s9 + $0xb0] sm:$0xff] }
 0x198   : > { %1698 = vst [vmem:[%s2182_s18 + $0x38] sm:$0xff] %v1650_v16   ;;  %v1140_v30 = vld [vmem:[%s2177_s9 + $0xb8] sm:$0xff]  ;;  %v1660_v31 = vpack.c.bf16 %v1168_v22, %v1167_v18  ;;  %v1171_v32 = vsub.f32 %v1107_v25, %v1139_v29  ;;  %v1109_v34 = vld [vmem:[%s2187_s13 + $0xc0] sm:$0xff]  ;;  %v1110_v35 = vld [vmem:[%s2187_s13 + $0xc8] sm:$0xff] }
 0x199   : > { %1699 = vst [vmem:[%s2182_s18 + $0x40] sm:$0xff] %v1655_v21   ;;  %v1172_v33 = vsub.f32 %v1108_v28, %v1140_v30  ;;  %v1141_v36 = vld [vmem:[%s2177_s9 + $0xc0] sm:$0xff]  ;;  %v1665_v37 = vpack.c.bf16 %v1170_v27, %v1169_v26  ;;  %v1142_v38 = vld [vmem:[%s2177_s9 + $0xc8] sm:$0xff]  ;;  %v1111_v40 = vld [vmem:[%s2187_s13 + $0xd0] sm:$0xff] }
 0x19a   : > { %v1173_v39 = vsub.f32 %v1109_v34, %v1141_v36  ;;  %v1112_v41 = vld [vmem:[%s2187_s13 + $0xd8] sm:$0xff]  ;;  %1700 = vst [vmem:[%s2182_s18 + $0x48] sm:$0xff] %v1660_v31   ;;  %v1174_v43 = vsub.f32 %v1110_v35, %v1142_v38  ;;  %v1143_v44 = vld [vmem:[%s2177_s9 + $0xd0] sm:$0xff]  ;;  %v1113_v46 = vld [vmem:[%s2187_s13 + $0xe0] sm:$0xff] }
 0x19b   : > { %v1670_v42 = vpack.c.bf16 %v1172_v33, %v1171_v32  ;;  %v1144_v45 = vld [vmem:[%s2177_s9 + $0xd8] sm:$0xff]  ;;  %1701 = vst [vmem:[%s2182_s18 + $0x50] sm:$0xff] %v1665_v37   ;;  %v1175_v47 = vsub.f32 %v1111_v40, %v1143_v44  ;;  %v1114_v49 = vld [vmem:[%s2187_s13 + $0xe8] sm:$0xff]  ;;  %v1145_v50 = vld [vmem:[%s2177_s9 + $0xe0] sm:$0xff] }
 0x19c   : > { %v1176_v48 = vsub.f32 %v1112_v41, %v1144_v45  ;;  %v1146_v51 = vld [vmem:[%s2177_s9 + $0xe8] sm:$0xff]  ;;  %v1675_v52 = vpack.c.bf16 %v1174_v43, %v1173_v39  ;;  %v1177_v53 = vsub.f32 %v1113_v46, %v1145_v50  ;;  %v1115_v55 = vld [vmem:[%s2187_s13 + $0xf0] sm:$0xff]  ;;  %v1116_v56 = vld [vmem:[%s2187_s13 + $0xf8] sm:$0xff] }
 0x19d   : > { %1702 = vst [vmem:[%s2182_s18 + $0x58] sm:$0xff] %v1670_v42   ;;  %v1178_v54 = vsub.f32 %v1114_v49, %v1146_v51  ;;  %v1147_v57 = vld [vmem:[%s2177_s9 + $0xf0] sm:$0xff]  ;;  %v1148_v59 = vld [vmem:[%s2177_s9 + $0xf8] sm:$0xff] }
 0x19e   : > { %v1680_v58 = vpack.c.bf16 %v1176_v48, %v1175_v47  ;;  %v1179_v60 = vsub.f32 %v1115_v55, %v1147_v57  ;;  %1703 = vst [vmem:[%s2182_s18 + $0x60] sm:$0xff] %v1675_v52   ;;  %v1180_v62 = vsub.f32 %v1116_v56, %v1148_v59 }
 0x19f   : > { %v1685_v61 = vpack.c.bf16 %v1178_v54, %v1177_v53 }
 0x1a0   : > { %1704 = vst [vmem:[%s2182_s18 + $0x68] sm:$0xff] %v1680_v58   ;;  %v1690_v63 = vpack.c.bf16 %v1180_v62, %v1179_v60 }
 0x1a1   : > { %1705 = vst [vmem:[%s2182_s18 + $0x70] sm:$0xff] %v1685_v61  }
 0x1a2   : > { %1706 = vst [vmem:[%s2182_s18 + $0x78] sm:$0xff] %v1690_v63  }
 0x1a3 PF: > { %s15_s21 = sadd.s32 1, %s2009_s21   ;;  %s2475_s15 = smov %s1989_s16 }
 0x1a4   : > { %p12_p0 = scmp.ge.s32.totalorder %s15_s21, 6   ;;  %s2476_s16 = smov %s2087_s28 }
 0x1a5   : > { %s2477_s17 = smov %s2001_s19  ;;  %s2478_s18 = smov %s2005_s20 }
 0x1a6   : > { %s2479_s19 = smov %s2482_s22  ;;  %s2480_s20 = smov %s2486_s23 }
 0x1a7   :  { %14 = sbr.rel (!%p12_p0) target bundleno = 4 (0x4), region = 131 }

// kernel: lightgcn_forward.6
= control target key start
LH: loop header
LB: loop body
LE: loop exit
PB: predicated region body
PF: predicated region fallthrough
CT: control target
= control target key end

     0   :  { %s2669_s0 = inlined_call_operand.vmem [shape: bf16[512,512], index: 0, kind: input, shape index: {}]   ;;  %s2670_s1 = inlined_call_operand.vmem [shape: bf16[512,128], index: 1, kind: input, shape index: {}]   ;;  %s2671_s2 = inlined_call_operand.vmem [shape: f32[512,128], index: 2, kind: input, shape index: {}, may-alias: {2,4}]   ;;  %s2672_s3 = inlined_call_operand.hbm [shape: bf16[512,128], index: 3, kind: output, shape index: {0}]   ;;  %s2673_s4 = inlined_call_operand.vmem [shape: f32[512,128], index: 4, kind: output, shape index: {1}, may-alias: {2,4}]  }
   0x1   :  { %2679 = sst [smem:[#allocation11_spill]] %s2669_s0 }
   0x2   :  { %10 = vsyncpa [#allocation4], 0 }
   0x3   :  { %12 = vsyncpa [#allocation4 + $0x1], 0  ;;  %s2148_s15 = smov 0   ;;  %s2150_s16 = smov 0  }
   0x4   :  { %s2152_s17 = smov 0   ;;  %s2154_s18 = smov 0  }
   0x5   :  { %s2156_s19 = smov 0   ;;  %s2158_s20 = smov 0  }
   0x6   :  { %s2160_s21 = smov 0   ;;  %s2162_s22 = smov 0  }
   0x7   :  { %s2164_s23 = smov 0   ;;  %s2166_s24 = smov 0  }
   0x8 LB: > { %2680 = sst [smem:[#allocation6_spill]] %s2110_s22  ;;  %s1493_s25 = sadd.s32 4294967295, %s2118_s24   ;;  %s2118_s24 = sphi %s2166_s24, %s18_s24   ;;  %s2114_s23 = sphi %s2164_s23, %s2694_s23   ;;  %s2110_s22 = sphi %s2162_s22, %s2693_s22   ;;  %s2106_s21 = sphi %s2160_s21, %s2692_s21   ;;  %s2102_s20 = sphi %s2158_s20, %s2691_s20   ;;  %s2098_s19 = sphi %s2156_s19, %s2699_s19   ;;  %s2094_s18 = sphi %s2154_s18, %s2698_s18   ;;  %s2090_s17 = sphi %s2152_s17, %s2697_s17   ;;  %s2086_s16 = sphi %s2150_s16, %s2696_s16   ;;  %s2082_s15 = sphi %s2148_s15, %s2695_s15  }
   0x9   : > { %2681 = sst [smem:[#allocation7_spill]] %s2114_s23  ;;  %s1494_s26 = sadd.s32 4294967294, %s2118_s24  }
   0xa   : > { %s27_s27 = sadd.s32 1, %s2110_s22  ;;  %s30_s28 = sadd.s32 1, %s2114_s23 }
   0xb   : > { %p28_p0 = scmp.ge.s32.totalorder %s27_s27, 2  ;;  %s39_s29 = sadd.s32 1, %s2098_s19 }
   0xc   : > { %p46_p1 = scmp.ne.s32.totalorder %s2098_s19, %s2094_s18  ;;  %p47_p2 = scmp.eq.s32.totalorder %s2118_s24, 0 }
   0xd   : > { %s2701_s27 = smov (%p28_p0, %s27_s27), 0  ;;  %s2703_s28 = smov (!%p28_p0, %s30_s28), %s2114_s23 }
   0xe   : > { %2682 = sst [smem:[#allocation8_spill]] %s2701_s27  ;;  %s35_s30 = ssub.s32 %s2110_s22, %s2701_s27 }
   0xf   : > { %p2211_p3 = por %p47_p2, %p46_p1  ;;  %p32_p4 = scmp.ge.s32.totalorder %s2703_s28, 2 }
  0x10   : > { %s117_s6 = sadd.s32 1, %s2090_s17  ;;  %p127_p5 = scmp.ne.s32.totalorder %s2090_s17, %s2086_s16 }
  0x11   : > { %p128_p6 = scmp.eq.s32.totalorder %s1493_s25, 3  ;;  %s2705_s28 = smov (%p32_p4, %s2703_s28), 0 }
  0x12   : > { %2684 = sst [smem:[#allocation9_spill]] %s2705_s28  ;;  %p133_p8 = scmp.ne.s32.totalorder %s2086_s16, %s2082_s15 }
  0x13   : > { %p2220_p7 = por %p128_p6, %p127_p5  ;;  %s34_s8 = ssub.s32 %s2114_s23, %s2705_s28 }
  0x14   : > { %p134_p9 = scmp.eq.s32.totalorder %s1494_s26, 3  ;;  %s36_s9 = sor.u32 %s35_s30, %s34_s8 }
  0x15   : > { %p115_p10 = scmp.eq.s32.totalorder %s34_s8, 0  ;;  %p37_p11 = scmp.eq.s32.totalorder %s36_s9, 0 }
  0x16   : > { %p2228_p12 = por %p134_p9, %p133_p8  ;;  %p1496_p13 = scmp.ge.s32.totalorder %s2118_s24, 4 }
  0x17   : > { %s2233_s11 = scalar_select %p115_p10, %s2090_s17, %s117_s6  }
  0x18   : > { %s2236_s12 = scalar_select %p37_p11, %s2098_s19, %s39_s29  }
  0x19   : > { %176 = sbr.rel (%p1496_p13) target bundleno = 58 (0x3a), region = 16 }
  0x1a   : > { %2687 = sst [smem:[#allocation10_spill]] %s2236_s12 }
  0x20   : > { %179 = sbr.rel (!%p2211_p3) target bundleno = 58 (0x3a), region = 20  ;;  %s181_s13 = sand.u32 (%p2211_p3), 1, %s2098_s19  }
  0x21   : > { %s1499_s14 = sshll.u32 (%p2211_p3), %s2110_s22, 1  ;;  %s1497_s25 = sshll.u32 (%p2211_p3), %s181_s13, 8 }
  0x22   : > { %s1598_s26 = sshll.u32 (%p2211_p3), %s2114_s23, 7  ;;  %s2688_s0 = sld [smem:[#allocation11_spill]] (%p2211_p3) }
  0x23   : > { %s187_s30 = sadd.s32 (%p2211_p3), %s1598_s26, %s1499_s14  ;;  %s2252_s5 = scalar_lea.vmem (%p2211_p3), [#allocation2], %s1497_s25 }
  0x24   : > { %s1501_s8 = sshll.u32 (%p2211_p3), %s187_s30, 2 }
  0x28   : > { %s2247_s29 = scalar_lea.vmem %s2688_s0, %s1501_s8 }
  0x29   : > { %v279_v0 = vld [vmem:[%s2247_s29] sm:$0xff]  ;;  %v281_v1 = vld [vmem:[%s2247_s29 + $0x10] sm:$0xff] }
  0x2a   : > { %v283_v2 = vld [vmem:[%s2247_s29 + $0x20] sm:$0xff]  ;;  %280 = vst [vmem:[%s2252_s5] sm:$0xff] %v279_v0  ;;  %282 = vst [vmem:[%s2252_s5 + $0x8] sm:$0xff] %v281_v1  ;;  %v285_v3 = vld [vmem:[%s2247_s29 + $0x30] sm:$0xff] }
  0x2b   : > { %284 = vst [vmem:[%s2252_s5 + $0x10] sm:$0xff] %v283_v2  ;;  %v287_v4 = vld [vmem:[%s2247_s29 + $0x40] sm:$0xff]  ;;  %v289_v5 = vld [vmem:[%s2247_s29 + $0x50] sm:$0xff]  ;;  %286 = vst [vmem:[%s2252_s5 + $0x18] sm:$0xff] %v285_v3 }
  0x2c   : > { %288 = vst [vmem:[%s2252_s5 + $0x20] sm:$0xff] %v287_v4  ;;  %290 = vst [vmem:[%s2252_s5 + $0x28] sm:$0xff] %v289_v5  ;;  %v291_v6 = vld [vmem:[%s2247_s29 + $0x60] sm:$0xff]  ;;  %v293_v7 = vld [vmem:[%s2247_s29 + $0x70] sm:$0xff] }
  0x2d   : > { %v295_v8 = vld [vmem:[%s2247_s29 + $0x80] sm:$0xff]  ;;  %292 = vst [vmem:[%s2252_s5 + $0x30] sm:$0xff] %v291_v6  ;;  %294 = vst [vmem:[%s2252_s5 + $0x38] sm:$0xff] %v293_v7  ;;  %v297_v9 = vld [vmem:[%s2247_s29 + $0x90] sm:$0xff] }
  0x2e   : > { %296 = vst [vmem:[%s2252_s5 + $0x40] sm:$0xff] %v295_v8  ;;  %v299_v10 = vld [vmem:[%s2247_s29 + $0xa0] sm:$0xff]  ;;  %v301_v11 = vld [vmem:[%s2247_s29 + $0xb0] sm:$0xff]  ;;  %298 = vst [vmem:[%s2252_s5 + $0x48] sm:$0xff] %v297_v9 }
  0x2f   : > { %300 = vst [vmem:[%s2252_s5 + $0x50] sm:$0xff] %v299_v10  ;;  %302 = vst [vmem:[%s2252_s5 + $0x58] sm:$0xff] %v301_v11  ;;  %v303_v12 = vld [vmem:[%s2247_s29 + $0xc0] sm:$0xff]  ;;  %v305_v13 = vld [vmem:[%s2247_s29 + $0xd0] sm:$0xff] }
  0x30   : > { %v307_v14 = vld [vmem:[%s2247_s29 + $0xe0] sm:$0xff]  ;;  %304 = vst [vmem:[%s2252_s5 + $0x60] sm:$0xff] %v303_v12  ;;  %306 = vst [vmem:[%s2252_s5 + $0x68] sm:$0xff] %v305_v13  ;;  %v309_v15 = vld [vmem:[%s2247_s29 + $0xf0] sm:$0xff] }
  0x31   : > { %308 = vst [vmem:[%s2252_s5 + $0x70] sm:$0xff] %v307_v14  ;;  %v311_v16 = vld [vmem:[%s2247_s29 + $0x100] sm:$0xff]  ;;  %v313_v17 = vld [vmem:[%s2247_s29 + $0x110] sm:$0xff]  ;;  %310 = vst [vmem:[%s2252_s5 + $0x78] sm:$0xff] %v309_v15 }
  0x32   : > { %312 = vst [vmem:[%s2252_s5 + $0x80] sm:$0xff] %v311_v16  ;;  %314 = vst [vmem:[%s2252_s5 + $0x88] sm:$0xff] %v313_v17  ;;  %v315_v18 = vld [vmem:[%s2247_s29 + $0x120] sm:$0xff]  ;;  %v317_v19 = vld [vmem:[%s2247_s29 + $0x130] sm:$0xff] }
  0x33   : > { %v319_v20 = vld [vmem:[%s2247_s29 + $0x140] sm:$0xff]  ;;  %316 = vst [vmem:[%s2252_s5 + $0x90] sm:$0xff] %v315_v18  ;;  %318 = vst [vmem:[%s2252_s5 + $0x98] sm:$0xff] %v317_v19  ;;  %v321_v21 = vld [vmem:[%s2247_s29 + $0x150] sm:$0xff] }
  0x34   : > { %320 = vst [vmem:[%s2252_s5 + $0xa0] sm:$0xff] %v319_v20  ;;  %v323_v22 = vld [vmem:[%s2247_s29 + $0x160] sm:$0xff]  ;;  %v325_v23 = vld [vmem:[%s2247_s29 + $0x170] sm:$0xff]  ;;  %322 = vst [vmem:[%s2252_s5 + $0xa8] sm:$0xff] %v321_v21 }
  0x35   : > { %324 = vst [vmem:[%s2252_s5 + $0xb0] sm:$0xff] %v323_v22  ;;  %326 = vst [vmem:[%s2252_s5 + $0xb8] sm:$0xff] %v325_v23  ;;  %v327_v24 = vld [vmem:[%s2247_s29 + $0x180] sm:$0xff]  ;;  %v329_v25 = vld [vmem:[%s2247_s29 + $0x190] sm:$0xff] }
  0x36   : > { %v331_v26 = vld [vmem:[%s2247_s29 + $0x1a0] sm:$0xff]  ;;  %328 = vst [vmem:[%s2252_s5 + $0xc0] sm:$0xff] %v327_v24  ;;  %330 = vst [vmem:[%s2252_s5 + $0xc8] sm:$0xff] %v329_v25  ;;  %v333_v27 = vld [vmem:[%s2247_s29 + $0x1b0] sm:$0xff] }
  0x37   : > { %332 = vst [vmem:[%s2252_s5 + $0xd0] sm:$0xff] %v331_v26  ;;  %v335_v28 = vld [vmem:[%s2247_s29 + $0x1c0] sm:$0xff]  ;;  %v337_v29 = vld [vmem:[%s2247_s29 + $0x1d0] sm:$0xff]  ;;  %334 = vst [vmem:[%s2252_s5 + $0xd8] sm:$0xff] %v333_v27 }
  0x38   : > { %336 = vst [vmem:[%s2252_s5 + $0xe0] sm:$0xff] %v335_v28  ;;  %338 = vst [vmem:[%s2252_s5 + $0xe8] sm:$0xff] %v337_v29  ;;  %v339_v30 = vld [vmem:[%s2247_s29 + $0x1e0] sm:$0xff]  ;;  %v341_v31 = vld [vmem:[%s2247_s29 + $0x1f0] sm:$0xff] }
  0x39   : > { %340 = vst [vmem:[%s2252_s5 + $0xf0] sm:$0xff] %v339_v30  ;;  %342 = vst [vmem:[%s2252_s5 + $0xf8] sm:$0xff] %v341_v31 }
  0x3a PF: > { %p1502_p0 = scmp.ge.s32.totalorder %s2118_s24, 1  ;;  %p365_p1 = scmp.lt.s32.totalorder %s2118_s24, 5 }
  0x3c   : > { %p366_p2 = pnand %p1502_p0, %p365_p1 }
  0x3d   : > { %s372_s13 = sand.u32 (!%p366_p2), 1, %s2094_s18   ;;  %s2676_s14 = sand.u32 (!%p366_p2), 1, %s2086_s16  }
  0x3e   : > { %369 = sbr.rel (%p366_p2) target bundleno = 461 (0x1cd), region = 66  ;;  %s1503_s25 = sshll.u32 (!%p366_p2), %s372_s13, 8 }
  0x3f   : > { %s1504_s26 = sshll.u32 (!%p366_p2), %s2676_s14, 7  ;;  %s1505_s30 = sshll.u32 (!%p366_p2), %s2102_s20, 5 }
  0x40   : > { %s1507_s8 = sshll.u32 (!%p366_p2), %s2106_s21, 5  ;;  %p415_p3 = scmp.lt.s32.totalorder (!%p366_p2), %s1505_s30, 63 }
  0x41   : > { %p421_p4 = scmp.lt.s32.totalorder (!%p366_p2), %s1507_s8, 63  ;;  %s2338_s22 = scalar_lea.vmem (!%p366_p2), [#allocation2], %s1503_s25 }
  0x42   : > { %s2340_s12 = scalar_lea.vmem (!%p366_p2), [#allocation3], %s1504_s26  ;;  %p1511_p5 = scmp.ne.s32.totalorder (!%p366_p2), %s2102_s20, 0 }
  0x45   : > { %s2707_s30 = smov (!%p415_p3, %s1505_s30), 63  ;;  %s2709_s8 = smov (!%p421_p4, %s1507_s8), 63 }
  0x46   : > { %s1506_s9 = sshll.u32 %s2707_s30, 2  ;;  %s1508_s0 = sshll.u32 %s2709_s8, 3 }
  0x47   : > { %s2326_s5 = scalar_lea.vmem %s2670_s1, %s1506_s9  ;;  %s2331_s18 = scalar_lea.vmem %s2671_s2, %s1508_s0 }
  0x48   : > { %s2336_s23 = scalar_lea.vmem %s2673_s4, %s1508_s0  ;;  %437 = sbr.rel (%p1511_p5) target bundleno = 99 (0x63), region = 74  ;;  %v438_v32 = vld [vmem:[%s2331_s18] sm:$0xff] (!%p1511_p5)  ;;  %v439_v33 = vld [vmem:[%s2331_s18 + $0x8] sm:$0xff] (!%p1511_p5)  ;;  %v440_v34 = vld [vmem:[%s2331_s18 + $0x10] sm:$0xff] (!%p1511_p5) }
  0x49   : > { %v441_v35 = vld [vmem:[%s2331_s18 + $0x18] sm:$0xff] (!%p1511_p5)  ;;  %v442_v36 = vld [vmem:[%s2331_s18 + $0x20] sm:$0xff] (!%p1511_p5)  ;;  %v443_v37 = vld [vmem:[%s2331_s18 + $0x28] sm:$0xff] (!%p1511_p5) }
  0x4a   : > { %v444_v38 = vld [vmem:[%s2331_s18 + $0x30] sm:$0xff] (!%p1511_p5)  ;;  %v445_v39 = vld [vmem:[%s2331_s18 + $0x38] sm:$0xff] (!%p1511_p5)  ;;  %v446_v40 = vld [vmem:[%s2331_s18 + $0x40] sm:$0xff] (!%p1511_p5) }
  0x4b   : > { %v447_v41 = vld [vmem:[%s2331_s18 + $0x48] sm:$0xff] (!%p1511_p5)  ;;  %v448_v42 = vld [vmem:[%s2331_s18 + $0x50] sm:$0xff] (!%p1511_p5)  ;;  %v449_v43 = vld [vmem:[%s2331_s18 + $0x58] sm:$0xff] (!%p1511_p5) }
  0x4c   : > { %v450_v44 = vld [vmem:[%s2331_s18 + $0x60] sm:$0xff] (!%p1511_p5)  ;;  %v451_v45 = vld [vmem:[%s2331_s18 + $0x68] sm:$0xff] (!%p1511_p5)  ;;  %v452_v46 = vld [vmem:[%s2331_s18 + $0x70] sm:$0xff] (!%p1511_p5) }
  0x4d   : > { %v453_v47 = vld [vmem:[%s2331_s18 + $0x78] sm:$0xff] (!%p1511_p5)  ;;  %v454_v48 = vld [vmem:[%s2331_s18 + $0x80] sm:$0xff] (!%p1511_p5)  ;;  %v455_v49 = vld [vmem:[%s2331_s18 + $0x88] sm:$0xff] (!%p1511_p5) }
  0x4e   : > { %v456_v50 = vld [vmem:[%s2331_s18 + $0x90] sm:$0xff] (!%p1511_p5)  ;;  %v457_v51 = vld [vmem:[%s2331_s18 + $0x98] sm:$0xff] (!%p1511_p5)  ;;  %v458_v52 = vld [vmem:[%s2331_s18 + $0xa0] sm:$0xff] (!%p1511_p5) }
  0x4f   : > { %v459_v53 = vld [vmem:[%s2331_s18 + $0xa8] sm:$0xff]  ;;  %v460_v54 = vld [vmem:[%s2331_s18 + $0xb0] sm:$0xff]  ;;  %v461_v55 = vld [vmem:[%s2331_s18 + $0xb8] sm:$0xff] }
  0x50   : > { %v462_v56 = vld [vmem:[%s2331_s18 + $0xc0] sm:$0xff]  ;;  %v463_v57 = vld [vmem:[%s2331_s18 + $0xc8] sm:$0xff]  ;;  %v464_v58 = vld [vmem:[%s2331_s18 + $0xd0] sm:$0xff] }
  0x51   : > { %v465_v59 = vld [vmem:[%s2331_s18 + $0xd8] sm:$0xff]  ;;  %v466_v60 = vld [vmem:[%s2331_s18 + $0xe0] sm:$0xff]  ;;  %v467_v61 = vld [vmem:[%s2331_s18 + $0xe8] sm:$0xff] }
  0x52   : > { %v468_v62 = vld [vmem:[%s2331_s18 + $0xf0] sm:$0xff]  ;;  %v469_v63 = vld [vmem:[%s2331_s18 + $0xf8] sm:$0xff] }
  0x53   : > { %470 = vst [vmem:[%s2336_s23] sm:$0xff] %v438_v32  ;;  %471 = vst [vmem:[%s2336_s23 + $0x8] sm:$0xff] %v439_v33 }
  0x54   : > { %472 = vst [vmem:[%s2336_s23 + $0x10] sm:$0xff] %v440_v34  ;;  %473 = vst [vmem:[%s2336_s23 + $0x18] sm:$0xff] %v441_v35 }
  0x55   : > { %474 = vst [vmem:[%s2336_s23 + $0x20] sm:$0xff] %v442_v36  ;;  %475 = vst [vmem:[%s2336_s23 + $0x28] sm:$0xff] %v443_v37 }
  0x56   : > { %476 = vst [vmem:[%s2336_s23 + $0x30] sm:$0xff] %v444_v38  ;;  %477 = vst [vmem:[%s2336_s23 + $0x38] sm:$0xff] %v445_v39 }
  0x57   : > { %478 = vst [vmem:[%s2336_s23 + $0x40] sm:$0xff] %v446_v40  ;;  %479 = vst [vmem:[%s2336_s23 + $0x48] sm:$0xff] %v447_v41 }
  0x58   : > { %480 = vst [vmem:[%s2336_s23 + $0x50] sm:$0xff] %v448_v42  ;;  %481 = vst [vmem:[%s2336_s23 + $0x58] sm:$0xff] %v449_v43 }
  0x59   : > { %482 = vst [vmem:[%s2336_s23 + $0x60] sm:$0xff] %v450_v44  ;;  %483 = vst [vmem:[%s2336_s23 + $0x68] sm:$0xff] %v451_v45 }
  0x5a   : > { %484 = vst [vmem:[%s2336_s23 + $0x70] sm:$0xff] %v452_v46  ;;  %485 = vst [vmem:[%s2336_s23 + $0x78] sm:$0xff] %v453_v47 }
  0x5b   : > { %486 = vst [vmem:[%s2336_s23 + $0x80] sm:$0xff] %v454_v48  ;;  %487 = vst [vmem:[%s2336_s23 + $0x88] sm:$0xff] %v455_v49 }
  0x5c   : > { %488 = vst [vmem:[%s2336_s23 + $0x90] sm:$0xff] %v456_v50  ;;  %489 = vst [vmem:[%s2336_s23 + $0x98] sm:$0xff] %v457_v51 }
  0x5d   : > { %490 = vst [vmem:[%s2336_s23 + $0xa0] sm:$0xff] %v458_v52  ;;  %491 = vst [vmem:[%s2336_s23 + $0xa8] sm:$0xff] %v459_v53 }
  0x5e   : > { %492 = vst [vmem:[%s2336_s23 + $0xb0] sm:$0xff] %v460_v54  ;;  %493 = vst [vmem:[%s2336_s23 + $0xb8] sm:$0xff] %v461_v55 }
  0x5f   : > { %494 = vst [vmem:[%s2336_s23 + $0xc0] sm:$0xff] %v462_v56  ;;  %495 = vst [vmem:[%s2336_s23 + $0xc8] sm:$0xff] %v463_v57 }
  0x60   : > { %496 = vst [vmem:[%s2336_s23 + $0xd0] sm:$0xff] %v464_v58  ;;  %497 = vst [vmem:[%s2336_s23 + $0xd8] sm:$0xff] %v465_v59 }
  0x61   : > { %498 = vst [vmem:[%s2336_s23 + $0xe0] sm:$0xff] %v466_v60  ;;  %499 = vst [vmem:[%s2336_s23 + $0xe8] sm:$0xff] %v467_v61 }
  0x62   : > { %500 = vst [vmem:[%s2336_s23 + $0xf0] sm:$0xff] %v468_v62  ;;  %501 = vst [vmem:[%s2336_s23 + $0xf8] sm:$0xff] %v469_v63 }
  0x63 PF: > { %v1944_v0 = vld [vmem:[%s2326_s5 + $0x40] sm:$0xff]   ;;  %v1946_v2 = vld [vmem:[%s2326_s5 + $0x48] sm:$0xff]   ;;  %v1948_v4 = vld [vmem:[%s2326_s5 + $0x50] sm:$0xff]   ;;  %p1560_p6 = scmp.ne.s32.totalorder %s2102_s20, 1 }
  0x64   : > { %v1945_v1 = vld [vmem:[%s2326_s5] sm:$0xff]   ;;  %1727 = vmatprep.subr.bf16.mxu0 %v1944_v0  ;;  %1839 = vmatprep.subr.bf16.mxu1 %v1944_v0  ;;  %v1947_v3 = vld [vmem:[%s2326_s5 + $0x8] sm:$0xff]   ;;  %v1949_v5 = vld [vmem:[%s2326_s5 + $0x10] sm:$0xff]  }
  0x65   : > { %1728 = vmatpush3.bf16.msra.mxu0 %v1945_v1  ;;  %1847 = vmatpush3.bf16.msra.mxu1 %v1945_v1  ;;  %v1950_v6 = vld [vmem:[%s2326_s5 + $0x58] sm:$0xff]   ;;  %v1952_v8 = vld [vmem:[%s2326_s5 + $0x60] sm:$0xff]   ;;  %v1954_v10 = vld [vmem:[%s2326_s5 + $0x68] sm:$0xff]  }
  0x66   : > { %1729 = vmatprep.subr.bf16.mxu0 %v1946_v2  ;;  %1840 = vmatprep.subr.bf16.mxu1 %v1946_v2  ;;  %v1951_v7 = vld [vmem:[%s2326_s5 + $0x18] sm:$0xff]   ;;  %v1953_v9 = vld [vmem:[%s2326_s5 + $0x20] sm:$0xff]   ;;  %v1955_v13 = vld [vmem:[%s2326_s5 + $0x28] sm:$0xff]  }
  0x67   : > { %v1962_v11 = vld [vmem:[%s2338_s22 + $0x4] ss:$8 sps:$4 sm:$0xff]   ;;  %v1956_v14 = vld [vmem:[%s2326_s5 + $0x70] sm:$0xff]   ;;  %v1958_v16 = vld [vmem:[%s2326_s5 + $0x78] sm:$0xff]  }
  0x68   : > { %v1965_v12 = vld [vmem:[%s2338_s22 + $0x84] ss:$8 sps:$4 sm:$0xff]   ;;  %886 = vmatprep.mubr.bf16.mxu0 %v1962_v11  ;;  %v1957_v15 = vld [vmem:[%s2326_s5 + $0x30] sm:$0xff]   ;;  %v1959_v17 = vld [vmem:[%s2326_s5 + $0x38] sm:$0xff]  }
  0x69   : > { %1730 = vmatpush3.bf16.msra.mxu0 %v1947_v3  ;;  %1848 = vmatpush3.bf16.msra.mxu1 %v1947_v3  ;;  %v1960_v18 = vld [vmem:[%s2338_s22] ss:$8 sps:$4 sm:$0xff]   ;;  %v1966_v20 = vld [vmem:[%s2338_s22 + $0x14] ss:$8 sps:$4 sm:$0xff]   ;;  %v1970_v22 = vld [vmem:[%s2338_s22 + $0x10] ss:$8 sps:$4 sm:$0xff]  }
  0x6a   : > { %1731 = vmatprep.subr.bf16.mxu0 %v1948_v4  ;;  %1841 = vmatprep.subr.bf16.mxu1 %v1948_v4  ;;  %v1963_v19 = vld [vmem:[%s2338_s22 + $0x80] ss:$8 sps:$4 sm:$0xff]   ;;  %v1968_v21 = vld [vmem:[%s2338_s22 + $0x94] ss:$8 sps:$4 sm:$0xff]   ;;  %v1971_v23 = vld [vmem:[%s2338_s22 + $0x90] ss:$8 sps:$4 sm:$0xff]  }
  0x6b   : > { %950 = vmatprep.mubr.bf16.mxu1 %v1965_v12  ;;  %v1972_v24 = vld [vmem:[%s2338_s22 + $0x24] ss:$8 sps:$4 sm:$0xff]   ;;  %v1976_v26 = vld [vmem:[%s2338_s22 + $0x20] ss:$8 sps:$4 sm:$0xff]   ;;  %v1978_v28 = vld [vmem:[%s2338_s22 + $0x34] ss:$8 sps:$4 sm:$0xff]  }
  0x6c   : > { %v1974_v25 = vld [vmem:[%s2338_s22 + $0xa4] ss:$8 sps:$4 sm:$0xff]   ;;  %v1977_v27 = vld [vmem:[%s2338_s22 + $0xa0] ss:$8 sps:$4 sm:$0xff]   ;;  %v1980_v29 = vld [vmem:[%s2338_s22 + $0xb4] ss:$8 sps:$4 sm:$0xff]  }
  0x6d   : > { %1732 = vmatpush3.bf16.msra.mxu0 %v1949_v5  ;;  %1849 = vmatpush3.bf16.msra.mxu1 %v1949_v5  ;;  %v1982_v30 = vld [vmem:[%s2338_s22 + $0x30] ss:$8 sps:$4 sm:$0xff]   ;;  %v1984_v32 = vld [vmem:[%s2338_s22 + $0x44] ss:$8 sps:$4 sm:$0xff]   ;;  %v1988_v34 = vld [vmem:[%s2338_s22 + $0x40] ss:$8 sps:$4 sm:$0xff]  }
  0x6e   : > { %1733 = vmatprep.subr.bf16.mxu0 %v1950_v6  ;;  %1842 = vmatprep.subr.bf16.mxu1 %v1950_v6  ;;  %v1983_v31 = vld [vmem:[%s2338_s22 + $0xb0] ss:$8 sps:$4 sm:$0xff]   ;;  %v1986_v33 = vld [vmem:[%s2338_s22 + $0xc4] ss:$8 sps:$4 sm:$0xff]   ;;  %v1989_v35 = vld [vmem:[%s2338_s22 + $0xc0] ss:$8 sps:$4 sm:$0xff]  }
  0x6f   : > { %v1990_v36 = vld [vmem:[%s2338_s22 + $0x54] ss:$8 sps:$4 sm:$0xff]   ;;  %v1994_v38 = vld [vmem:[%s2338_s22 + $0x50] ss:$8 sps:$4 sm:$0xff]   ;;  %v1996_v40 = vld [vmem:[%s2338_s22 + $0x64] ss:$8 sps:$4 sm:$0xff]  }
  0x70   : > { %v1992_v37 = vld [vmem:[%s2338_s22 + $0xd4] ss:$8 sps:$4 sm:$0xff]   ;;  %v1995_v39 = vld [vmem:[%s2338_s22 + $0xd0] ss:$8 sps:$4 sm:$0xff]   ;;  %v1998_v41 = vld [vmem:[%s2338_s22 + $0xe4] ss:$8 sps:$4 sm:$0xff]  }
  0x71   : > { %1734 = vmatpush3.bf16.msra.mxu0 %v1951_v7  ;;  %1850 = vmatpush3.bf16.msra.mxu1 %v1951_v7  ;;  %v2000_v42 = vld [vmem:[%s2338_s22 + $0x60] ss:$8 sps:$4 sm:$0xff]   ;;  %v2002_v44 = vld [vmem:[%s2338_s22 + $0x74] ss:$8 sps:$4 sm:$0xff]   ;;  %v2006_v46 = vld [vmem:[%s2338_s22 + $0x70] ss:$8 sps:$4 sm:$0xff]  }
  0x72   : > { %1735 = vmatprep.subr.bf16.mxu0 %v1952_v8  ;;  %1843 = vmatprep.subr.bf16.mxu1 %v1952_v8  ;;  %v2001_v43 = vld [vmem:[%s2338_s22 + $0xe0] ss:$8 sps:$4 sm:$0xff]   ;;  %v2004_v45 = vld [vmem:[%s2338_s22 + $0xf4] ss:$8 sps:$4 sm:$0xff]   ;;  %v2007_v47 = vld [vmem:[%s2338_s22 + $0xf0] ss:$8 sps:$4 sm:$0xff]  }
  0x73   : > { %v502_v50 = vld [vmem:[%s2336_s23] sm:$0xff]  ;;  %v503_v58 = vld [vmem:[%s2336_s23 + $0x8] sm:$0xff]  ;;  %v504_v6 = vld [vmem:[%s2336_s23 + $0x10] sm:$0xff] }
  0x74   : > { %v518_v52 = vld [vmem:[%s2336_s23 + $0x80] sm:$0xff]  ;;  %v519_v60 = vld [vmem:[%s2336_s23 + $0x88] sm:$0xff]  ;;  %v520_v8 = vld [vmem:[%s2336_s23 + $0x90] sm:$0xff] }
  0x75   : > { %1736 = vmatpush3.bf16.msra.mxu0 %v1953_v9  ;;  %1851 = vmatpush3.bf16.msra.mxu1 %v1953_v9 }
  0x76   : > { %1737 = vmatprep.subr.bf16.mxu0 %v1954_v10  ;;  %1844 = vmatprep.subr.bf16.mxu1 %v1954_v10 }
  0x79   : > { %1738 = vmatpush3.bf16.msra.mxu0 %v1955_v13  ;;  %1852 = vmatpush3.bf16.msra.mxu1 %v1955_v13 }
  0x7a   : > { %1739 = vmatprep.subr.bf16.mxu0 %v1956_v14  ;;  %1845 = vmatprep.subr.bf16.mxu1 %v1956_v14  ;;  %v505_v14 = vld [vmem:[%s2336_s23 + $0x18] sm:$0xff] }
  0x7d   : > { %1740 = vmatpush3.bf16.msra.mxu0 %v1957_v15  ;;  %1853 = vmatpush3.bf16.msra.mxu1 %v1957_v15 }
  0x7e   : > { %1741 = vmatprep.subr.bf16.mxu0 %v1958_v16  ;;  %1846 = vmatprep.subr.bf16.mxu1 %v1958_v16  ;;  %v521_v16 = vld [vmem:[%s2336_s23 + $0x98] sm:$0xff] }
  0x81   : > { %1742 = vmatpush3.bf16.msra.mxu0 %v1959_v17  ;;  %1854 = vmatpush3.bf16.msra.mxu1 %v1959_v17 }
  0x84   : > { %887 = vmatmul.mubr.bf16.vlgmr.msra.gmra.mrb[0].mxu0 %v1960_v18  ;;  %951 = vmatmul.mubr.bf16.vlgmr.msra.gmra.mrb[0].mxu1 %v1963_v19 }
  0x85   : > { %894 = vmatprep.mubr.bf16.mxu0 %v1966_v20  ;;  %958 = vmatprep.mubr.bf16.mxu1 %v1968_v21 }
  0x8c   : > { %895 = vmatmul.mubr.bf16.gmra.mrb[4].mxu0 %v1970_v22  ;;  %959 = vmatmul.mubr.bf16.gmra.mrb[4].mxu1 %v1971_v23 }
  0x8d   : > { %902 = vmatprep.mubr.bf16.mxu0 %v1972_v24  ;;  %966 = vmatprep.mubr.bf16.mxu1 %v1974_v25 }
  0x94   : > { %903 = vmatmul.mubr.bf16.gmra.mrb[8].mxu0 %v1976_v26  ;;  %967 = vmatmul.mubr.bf16.gmra.mrb[8].mxu1 %v1977_v27  ;;  %v506_v26 = vld [vmem:[%s2336_s23 + $0x20] sm:$0xff] }
  0x95   : > { %910 = vmatprep.mubr.bf16.mxu0 %v1978_v28  ;;  %974 = vmatprep.mubr.bf16.mxu1 %v1980_v29  ;;  %v522_v28 = vld [vmem:[%s2336_s23 + $0xa0] sm:$0xff] }
  0x9c   : > { %911 = vmatmul.mubr.bf16.gmra.mrb[12].mxu0 %v1982_v30  ;;  %975 = vmatmul.mubr.bf16.gmra.mrb[12].mxu1 %v1983_v31 }
  0x9d   : > { %918 = vmatprep.mubr.bf16.mxu0 %v1984_v32  ;;  %982 = vmatprep.mubr.bf16.mxu1 %v1986_v33 }
  0xa4   : > { %919 = vmatmul.mubr.bf16.gmra.mrb[16].mxu0 %v1988_v34  ;;  %983 = vmatmul.mubr.bf16.gmra.mrb[16].mxu1 %v1989_v35  ;;  %v507_v34 = vld [vmem:[%s2336_s23 + $0x28] sm:$0xff] }
  0xa5   : > { %926 = vmatprep.mubr.bf16.mxu0 %v1990_v36  ;;  %990 = vmatprep.mubr.bf16.mxu1 %v1992_v37  ;;  %v523_v36 = vld [vmem:[%s2336_s23 + $0xa8] sm:$0xff] }
  0xac   : > { %927 = vmatmul.mubr.bf16.gmra.mrb[20].mxu0 %v1994_v38  ;;  %991 = vmatmul.mubr.bf16.gmra.mrb[20].mxu1 %v1995_v39 }
  0xad   : > { %934 = vmatprep.mubr.bf16.mxu0 %v1996_v40  ;;  %998 = vmatprep.mubr.bf16.mxu1 %v1998_v41 }
  0xb4   : > { %935 = vmatmul.mubr.bf16.gmra.mrb[24].mxu0 %v2000_v42  ;;  %999 = vmatmul.mubr.bf16.gmra.mrb[24].mxu1 %v2001_v43 }
  0xb5   : > { %942 = vmatprep.mubr.bf16.mxu0 %v2002_v44  ;;  %1006 = vmatprep.mubr.bf16.mxu1 %v2004_v45 }
  0xbc   : > { %943 = vmatmul.mubr.bf16.gmra.mrb[28].mxu0 %v2006_v46  ;;  %1007 = vmatmul.mubr.bf16.gmra.mrb[28].mxu1 %v2007_v47  ;;  %v508_v46 = vld [vmem:[%s2336_s23 + $0x30] sm:$0xff] }
 0x157   : > { %v1743_v48 = vpop.f32.mrb[0].mxu0  ;;  %v1791_v49 = vpop.f32.mrb[0].mxu1 }
 0x158   : > { %v1744_v51 = vpop.f32.mrb[1].mxu0  ;;  %v1792_v53 = vpop.f32.mrb[1].mxu1 }
 0x159   : > { %v1745_v54 = vadd.f32 %v1744_v51, %v1743_v48  ;;  %v1793_v55 = vadd.f32 %v1792_v53, %v1791_v49  ;;  %v1746_v56 = vpop.f32.mrb[2].mxu0  ;;  %v1794_v57 = vpop.f32.mrb[2].mxu1  ;;  %v524_v48 = vld [vmem:[%s2336_s23 + $0xb0] sm:$0xff] }
 0x15a   : > { %v1747_v59 = vpop.f32.mrb[3].mxu0  ;;  %v1795_v61 = vpop.f32.mrb[3].mxu1 }
 0x15b   : > { %v1015_v62 = vadd.f32 %v1745_v54, %v502_v50  ;;  %v1031_v63 = vadd.f32 %v1793_v55, %v518_v52  ;;  %v1748_v0 = vadd.f32 %v1747_v59, %v1746_v56  ;;  %v1796_v1 = vadd.f32 %v1795_v61, %v1794_v57  ;;  %v509_v54 = vld [vmem:[%s2336_s23 + $0x38] sm:$0xff] }
 0x15c   : > { %v525_v56 = vld [vmem:[%s2336_s23 + $0xb8] sm:$0xff] }
 0x15d   : > { %1047 = vst [vmem:[%s2336_s23] sm:$0xff] %v1015_v62  ;;  %1063 = vst [vmem:[%s2336_s23 + $0x80] sm:$0xff] %v1031_v63  ;;  %v1016_v2 = vadd.f32 %v1748_v0, %v503_v58  ;;  %v1032_v3 = vadd.f32 %v1796_v1, %v519_v60 }
 0x15f   : > { %1048 = vst [vmem:[%s2336_s23 + $0x8] sm:$0xff] %v1016_v2  ;;  %1064 = vst [vmem:[%s2336_s23 + $0x88] sm:$0xff] %v1032_v3  ;;  %v1749_v4 = vpop.f32.mrb[4].mxu0  ;;  %v1797_v5 = vpop.f32.mrb[4].mxu1  ;;  %v510_v2 = vld [vmem:[%s2336_s23 + $0x40] sm:$0xff] }
 0x160   : > { %v1750_v7 = vpop.f32.mrb[5].mxu0  ;;  %v1798_v9 = vpop.f32.mrb[5].mxu1 }
 0x161   : > { %v1751_v10 = vadd.f32 %v1750_v7, %v1749_v4  ;;  %v1799_v11 = vadd.f32 %v1798_v9, %v1797_v5  ;;  %v1752_v12 = vpop.f32.mrb[6].mxu0  ;;  %v1800_v13 = vpop.f32.mrb[6].mxu1  ;;  %v526_v4 = vld [vmem:[%s2336_s23 + $0xc0] sm:$0xff] }
 0x162   : > { %v1753_v15 = vpop.f32.mrb[7].mxu0  ;;  %v1801_v17 = vpop.f32.mrb[7].mxu1 }
 0x163   : > { %v1017_v18 = vadd.f32 %v1751_v10, %v504_v6  ;;  %v1033_v19 = vadd.f32 %v1799_v11, %v520_v8  ;;  %v1754_v20 = vadd.f32 %v1753_v15, %v1752_v12  ;;  %v1802_v21 = vadd.f32 %v1801_v17, %v1800_v13  ;;  %v511_v10 = vld [vmem:[%s2336_s23 + $0x48] sm:$0xff] }
 0x164   : > { %v527_v12 = vld [vmem:[%s2336_s23 + $0xc8] sm:$0xff] }
 0x165   : > { %1049 = vst [vmem:[%s2336_s23 + $0x10] sm:$0xff] %v1017_v18  ;;  %1065 = vst [vmem:[%s2336_s23 + $0x90] sm:$0xff] %v1033_v19  ;;  %v1018_v22 = vadd.f32 %v1754_v20, %v505_v14  ;;  %v1034_v23 = vadd.f32 %v1802_v21, %v521_v16 }
 0x167   : > { %1050 = vst [vmem:[%s2336_s23 + $0x18] sm:$0xff] %v1018_v22  ;;  %1066 = vst [vmem:[%s2336_s23 + $0x98] sm:$0xff] %v1034_v23  ;;  %v1755_v24 = vpop.f32.mrb[8].mxu0  ;;  %v1803_v25 = vpop.f32.mrb[8].mxu1  ;;  %v512_v22 = vld [vmem:[%s2336_s23 + $0x50] sm:$0xff] }
 0x168   : > { %v1756_v27 = vpop.f32.mrb[9].mxu0  ;;  %v1804_v29 = vpop.f32.mrb[9].mxu1 }
 0x169   : > { %v1757_v30 = vadd.f32 %v1756_v27, %v1755_v24  ;;  %v1805_v31 = vadd.f32 %v1804_v29, %v1803_v25  ;;  %v1758_v32 = vpop.f32.mrb[10].mxu0  ;;  %v1806_v33 = vpop.f32.mrb[10].mxu1  ;;  %v528_v24 = vld [vmem:[%s2336_s23 + $0xd0] sm:$0xff] }
 0x16a   : > { %v1759_v35 = vpop.f32.mrb[11].mxu0  ;;  %v1807_v37 = vpop.f32.mrb[11].mxu1 }
 0x16b   : > { %v1019_v38 = vadd.f32 %v1757_v30, %v506_v26  ;;  %v1035_v39 = vadd.f32 %v1805_v31, %v522_v28  ;;  %v1760_v40 = vadd.f32 %v1759_v35, %v1758_v32  ;;  %v1808_v41 = vadd.f32 %v1807_v37, %v1806_v33  ;;  %v513_v30 = vld [vmem:[%s2336_s23 + $0x58] sm:$0xff] }
 0x16c   : > { %v529_v32 = vld [vmem:[%s2336_s23 + $0xd8] sm:$0xff] }
 0x16d   : > { %1051 = vst [vmem:[%s2336_s23 + $0x20] sm:$0xff] %v1019_v38  ;;  %1067 = vst [vmem:[%s2336_s23 + $0xa0] sm:$0xff] %v1035_v39  ;;  %v1020_v42 = vadd.f32 %v1760_v40, %v507_v34  ;;  %v1036_v43 = vadd.f32 %v1808_v41, %v523_v36 }
 0x16f   : > { %1052 = vst [vmem:[%s2336_s23 + $0x28] sm:$0xff] %v1020_v42  ;;  %1068 = vst [vmem:[%s2336_s23 + $0xa8] sm:$0xff] %v1036_v43  ;;  %v1761_v44 = vpop.f32.mrb[12].mxu0  ;;  %v1809_v45 = vpop.f32.mrb[12].mxu1  ;;  %v514_v42 = vld [vmem:[%s2336_s23 + $0x60] sm:$0xff] }
 0x170   : > { %v1762_v47 = vpop.f32.mrb[13].mxu0  ;;  %v1810_v49 = vpop.f32.mrb[13].mxu1 }
 0x171   : > { %v1763_v50 = vadd.f32 %v1762_v47, %v1761_v44  ;;  %v1811_v51 = vadd.f32 %v1810_v49, %v1809_v45  ;;  %v1764_v52 = vpop.f32.mrb[14].mxu0  ;;  %v1812_v53 = vpop.f32.mrb[14].mxu1  ;;  %v530_v44 = vld [vmem:[%s2336_s23 + $0xe0] sm:$0xff] }
 0x172   : > { %v1765_v55 = vpop.f32.mrb[15].mxu0  ;;  %v1813_v57 = vpop.f32.mrb[15].mxu1 }
 0x173   : > { %v1021_v58 = vadd.f32 %v1763_v50, %v508_v46  ;;  %v1037_v59 = vadd.f32 %v1811_v51, %v524_v48  ;;  %v1766_v60 = vadd.f32 %v1765_v55, %v1764_v52  ;;  %v1814_v61 = vadd.f32 %v1813_v57, %v1812_v53  ;;  %v515_v50 = vld [vmem:[%s2336_s23 + $0x68] sm:$0xff] }
 0x174   : > { %v531_v52 = vld [vmem:[%s2336_s23 + $0xe8] sm:$0xff] }
 0x175   : > { %1053 = vst [vmem:[%s2336_s23 + $0x30] sm:$0xff] %v1021_v58  ;;  %1069 = vst [vmem:[%s2336_s23 + $0xb0] sm:$0xff] %v1037_v59  ;;  %v1022_v62 = vadd.f32 %v1766_v60, %v509_v54  ;;  %v1038_v63 = vadd.f32 %v1814_v61, %v525_v56 }
 0x177   : > { %1054 = vst [vmem:[%s2336_s23 + $0x38] sm:$0xff] %v1022_v62  ;;  %1070 = vst [vmem:[%s2336_s23 + $0xb8] sm:$0xff] %v1038_v63  ;;  %v1767_v0 = vpop.f32.mrb[16].mxu0  ;;  %v1815_v1 = vpop.f32.mrb[16].mxu1  ;;  %v516_v62 = vld [vmem:[%s2336_s23 + $0x70] sm:$0xff] }
 0x178   : > { %v1768_v3 = vpop.f32.mrb[17].mxu0  ;;  %v1816_v5 = vpop.f32.mrb[17].mxu1 }
 0x179   : > { %v1769_v6 = vadd.f32 %v1768_v3, %v1767_v0  ;;  %v1817_v7 = vadd.f32 %v1816_v5, %v1815_v1  ;;  %v1770_v8 = vpop.f32.mrb[18].mxu0  ;;  %v1818_v9 = vpop.f32.mrb[18].mxu1  ;;  %v532_v0 = vld [vmem:[%s2336_s23 + $0xf0] sm:$0xff] }
 0x17a   : > { %v1771_v11 = vpop.f32.mrb[19].mxu0  ;;  %v1819_v13 = vpop.f32.mrb[19].mxu1 }
 0x17b   : > { %v1023_v14 = vadd.f32 %v1769_v6, %v510_v2  ;;  %v1039_v15 = vadd.f32 %v1817_v7, %v526_v4  ;;  %v1772_v16 = vadd.f32 %v1771_v11, %v1770_v8  ;;  %v1820_v17 = vadd.f32 %v1819_v13, %v1818_v9  ;;  %v517_v6 = vld [vmem:[%s2336_s23 + $0x78] sm:$0xff] }
 0x17c   : > { %v533_v8 = vld [vmem:[%s2336_s23 + $0xf8] sm:$0xff] }
 0x17d   : > { %1055 = vst [vmem:[%s2336_s23 + $0x40] sm:$0xff] %v1023_v14  ;;  %1071 = vst [vmem:[%s2336_s23 + $0xc0] sm:$0xff] %v1039_v15  ;;  %v1024_v18 = vadd.f32 %v1772_v16, %v511_v10  ;;  %v1040_v19 = vadd.f32 %v1820_v17, %v527_v12  ;;  %v1083_v16 = vld [vmem:[%s2336_s23] sm:$0xff] (!%p1560_p6)  ;;  %v1084_v17 = vld [vmem:[%s2336_s23 + $0x8] sm:$0xff] (!%p1560_p6) }
 0x17f   : > { %1056 = vst [vmem:[%s2336_s23 + $0x48] sm:$0xff] %v1024_v18  ;;  %1072 = vst [vmem:[%s2336_s23 + $0xc8] sm:$0xff] %v1040_v19  ;;  %v1773_v20 = vpop.f32.mrb[20].mxu0  ;;  %v1821_v21 = vpop.f32.mrb[20].mxu1 }
 0x180   : > { %v1774_v23 = vpop.f32.mrb[21].mxu0  ;;  %v1822_v25 = vpop.f32.mrb[21].mxu1 }
 0x181   : > { %v1775_v26 = vadd.f32 %v1774_v23, %v1773_v20  ;;  %v1823_v27 = vadd.f32 %v1822_v25, %v1821_v21  ;;  %v1776_v28 = vpop.f32.mrb[22].mxu0  ;;  %v1824_v29 = vpop.f32.mrb[22].mxu1  ;;  %v1085_v21 = vld [vmem:[%s2336_s23 + $0x10] sm:$0xff] (!%p1560_p6) }
 0x182   : > { %v1777_v31 = vpop.f32.mrb[23].mxu0  ;;  %v1825_v33 = vpop.f32.mrb[23].mxu1 }
 0x183   : > { %v1025_v34 = vadd.f32 %v1775_v26, %v512_v22  ;;  %v1041_v35 = vadd.f32 %v1823_v27, %v528_v24  ;;  %v1778_v36 = vadd.f32 %v1777_v31, %v1776_v28  ;;  %v1826_v37 = vadd.f32 %v1825_v33, %v1824_v29  ;;  %v1086_v22 = vld [vmem:[%s2336_s23 + $0x18] sm:$0xff] (!%p1560_p6)  ;;  %v1087_v26 = vld [vmem:[%s2336_s23 + $0x20] sm:$0xff] (!%p1560_p6)  ;;  %v1088_v29 = vld [vmem:[%s2336_s23 + $0x28] sm:$0xff] (!%p1560_p6) }
 0x185   : > { %1057 = vst [vmem:[%s2336_s23 + $0x50] sm:$0xff] %v1025_v34  ;;  %1073 = vst [vmem:[%s2336_s23 + $0xd0] sm:$0xff] %v1041_v35  ;;  %v1026_v38 = vadd.f32 %v1778_v36, %v513_v30  ;;  %v1042_v39 = vadd.f32 %v1826_v37, %v529_v32  ;;  %v1089_v35 = vld [vmem:[%s2336_s23 + $0x30] sm:$0xff] (!%p1560_p6)  ;;  %v1090_v36 = vld [vmem:[%s2336_s23 + $0x38] sm:$0xff] (!%p1560_p6) }
 0x187   : > { %1058 = vst [vmem:[%s2336_s23 + $0x58] sm:$0xff] %v1026_v38  ;;  %1074 = vst [vmem:[%s2336_s23 + $0xd8] sm:$0xff] %v1042_v39  ;;  %v1779_v40 = vpop.f32.mrb[24].mxu0  ;;  %v1827_v41 = vpop.f32.mrb[24].mxu1 }
 0x188   : > { %v1780_v43 = vpop.f32.mrb[25].mxu0  ;;  %v1828_v45 = vpop.f32.mrb[25].mxu1 }
 0x189   : > { %v1781_v46 = vadd.f32 %v1780_v43, %v1779_v40  ;;  %v1829_v47 = vadd.f32 %v1828_v45, %v1827_v41  ;;  %v1782_v48 = vpop.f32.mrb[26].mxu0  ;;  %v1830_v49 = vpop.f32.mrb[26].mxu1  ;;  %v1091_v41 = vld [vmem:[%s2336_s23 + $0x40] sm:$0xff] (!%p1560_p6) }
 0x18a   : > { %v1783_v51 = vpop.f32.mrb[27].mxu0  ;;  %v1831_v53 = vpop.f32.mrb[27].mxu1 }
 0x18b   : > { %v1027_v54 = vadd.f32 %v1781_v46, %v514_v42  ;;  %v1043_v55 = vadd.f32 %v1829_v47, %v530_v44  ;;  %v1784_v56 = vadd.f32 %v1783_v51, %v1782_v48  ;;  %v1832_v57 = vadd.f32 %v1831_v53, %v1830_v49  ;;  %v1092_v42 = vld [vmem:[%s2336_s23 + $0x48] sm:$0xff] (!%p1560_p6) }
 0x18c   : > { %v1093_v47 = vld [vmem:[%s2336_s23 + $0x50] sm:$0xff] (!%p1560_p6) }
 0x18d   : > { %1059 = vst [vmem:[%s2336_s23 + $0x60] sm:$0xff] %v1027_v54  ;;  %1075 = vst [vmem:[%s2336_s23 + $0xe0] sm:$0xff] %v1043_v55  ;;  %v1028_v58 = vadd.f32 %v1784_v56, %v515_v50  ;;  %v1044_v59 = vadd.f32 %v1832_v57, %v531_v52 }
 0x18e   : > { %v1094_v50 = vld [vmem:[%s2336_s23 + $0x58] sm:$0xff] (!%p1560_p6) }
 0x18f   : > { %1060 = vst [vmem:[%s2336_s23 + $0x68] sm:$0xff] %v1028_v58  ;;  %1076 = vst [vmem:[%s2336_s23 + $0xe8] sm:$0xff] %v1044_v59  ;;  %v1785_v60 = vpop.f32.mrb[28].mxu0  ;;  %v1833_v61 = vpop.f32.mrb[28].mxu1 }
 0x190   : > { %v1786_v63 = vpop.f32.mrb[29].mxu0  ;;  %v1834_v1 = vpop.f32.mrb[29].mxu1 }
 0x191   : > { %v1787_v2 = vadd.f32 %v1786_v63, %v1785_v60  ;;  %v1835_v3 = vadd.f32 %v1834_v1, %v1833_v61  ;;  %v1788_v4 = vpop.f32.mrb[30].mxu0  ;;  %v1836_v5 = vpop.f32.mrb[30].mxu1  ;;  %1082 = sbr.rel (%p1560_p6) target bundleno = 435 (0x1b3), region = 78 }
 0x192   : > { %v1789_v7 = vpop.f32.mrb[31].mxu0  ;;  %v1837_v9 = vpop.f32.mrb[31].mxu1 }
 0x193   : > { %v1029_v10 = vadd.f32 %v1787_v2, %v516_v62  ;;  %v1045_v11 = vadd.f32 %v1835_v3, %v532_v0  ;;  %v1790_v12 = vadd.f32 %v1789_v7, %v1788_v4  ;;  %v1838_v13 = vadd.f32 %v1837_v9, %v1836_v5  ;;  %v1099_v4 = vld [vmem:[%s2336_s23 + $0x80] sm:$0xff] (!%p1560_p6)  ;;  %v1100_v7 = vld [vmem:[%s2336_s23 + $0x88] sm:$0xff] (!%p1560_p6) }
 0x194   : > { %v1095_v56 = vld [vmem:[%s2336_s23 + $0x60] sm:$0xff] (!%p1560_p6) }
 0x195   : > { %1061 = vst [vmem:[%s2336_s23 + $0x70] sm:$0xff] %v1029_v10  ;;  %1077 = vst [vmem:[%s2336_s23 + $0xf0] sm:$0xff] %v1045_v11  ;;  %v1030_v14 = vadd.f32 %v1790_v12, %v517_v6  ;;  %v1046_v15 = vadd.f32 %v1838_v13, %v533_v8  ;;  %v1101_v13 = vld [vmem:[%s2336_s23 + $0x90] sm:$0xff] (!%p1560_p6) }
 0x196   : > { %v1096_v57 = vld [vmem:[%s2336_s23 + $0x68] sm:$0xff] (!%p1560_p6) }
 0x197   : > { %1062 = vst [vmem:[%s2336_s23 + $0x78] sm:$0xff] %v1030_v14  ;;  %1078 = vst [vmem:[%s2336_s23 + $0xf8] sm:$0xff] %v1046_v15  ;;  %v1102_v14 = vld [vmem:[%s2336_s23 + $0x98] sm:$0xff] (!%p1560_p6) }
 0x19c   : > { %v1097_v62 = vld [vmem:[%s2336_s23 + $0x70] sm:$0xff] }
 0x19e   : > { %v1115_v18 = vld [vmem:[%s2331_s18] sm:$0xff]  ;;  %v1116_v19 = vld [vmem:[%s2331_s18 + $0x8] sm:$0xff]  ;;  %v1117_v24 = vld [vmem:[%s2331_s18 + $0x10] sm:$0xff] }
 0x19f   : > { %v1147_v20 = vsub.f32 %v1083_v16, %v1115_v18  ;;  %v1148_v23 = vsub.f32 %v1084_v17, %v1116_v19  ;;  %v1118_v25 = vld [vmem:[%s2331_s18 + $0x18] sm:$0xff]  ;;  %v1149_v27 = vsub.f32 %v1085_v21, %v1117_v24  ;;  %v1119_v30 = vld [vmem:[%s2331_s18 + $0x20] sm:$0xff]  ;;  %v1120_v31 = vld [vmem:[%s2331_s18 + $0x28] sm:$0xff] }
 0x1a0   : > { %v1150_v28 = vsub.f32 %v1086_v22, %v1118_v25  ;;  %v1151_v33 = vsub.f32 %v1087_v26, %v1119_v30  ;;  %v1152_v34 = vsub.f32 %v1088_v29, %v1120_v31  ;;  %v1121_v37 = vld [vmem:[%s2331_s18 + $0x30] sm:$0xff]  ;;  %v1122_v39 = vld [vmem:[%s2331_s18 + $0x38] sm:$0xff]  ;;  %v1123_v45 = vld [vmem:[%s2331_s18 + $0x40] sm:$0xff] }
 0x1a1   : > { %v1635_v32 = vpack.c.bf16 %v1148_v23, %v1147_v20  ;;  %v1153_v40 = vsub.f32 %v1089_v35, %v1121_v37  ;;  %v1154_v44 = vsub.f32 %v1090_v36, %v1122_v39  ;;  %v1124_v46 = vld [vmem:[%s2331_s18 + $0x48] sm:$0xff]  ;;  %v1155_v48 = vsub.f32 %v1091_v41, %v1123_v45  ;;  %v1125_v51 = vld [vmem:[%s2331_s18 + $0x50] sm:$0xff]  ;;  %v1126_v52 = vld [vmem:[%s2331_s18 + $0x58] sm:$0xff] }
 0x1a2   : > { %v1640_v38 = vpack.c.bf16 %v1150_v28, %v1149_v27  ;;  %v1645_v43 = vpack.c.bf16 %v1152_v34, %v1151_v33  ;;  %v1156_v49 = vsub.f32 %v1092_v42, %v1124_v46  ;;  %v1157_v54 = vsub.f32 %v1093_v47, %v1125_v51  ;;  %v1127_v58 = vld [vmem:[%s2331_s18 + $0x60] sm:$0xff]  ;;  %v1128_v60 = vld [vmem:[%s2331_s18 + $0x68] sm:$0xff]  ;;  %v1098_v63 = vld [vmem:[%s2336_s23 + $0x78] sm:$0xff] }
 0x1a3   : > { %1636 = vst [vmem:[%s2340_s12] sm:$0xff] %v1635_v32   ;;  %v1650_v53 = vpack.c.bf16 %v1154_v44, %v1153_v40  ;;  %v1158_v55 = vsub.f32 %v1094_v50, %v1126_v52  ;;  %v1159_v61 = vsub.f32 %v1095_v56, %v1127_v58  ;;  %v1160_v1 = vsub.f32 %v1096_v57, %v1128_v60  ;;  %v1129_v2 = vld [vmem:[%s2331_s18 + $0x70] sm:$0xff]  ;;  %v1130_v3 = vld [vmem:[%s2331_s18 + $0x78] sm:$0xff]  ;;  %v1131_v8 = vld [vmem:[%s2331_s18 + $0x80] sm:$0xff] }
 0x1a4   : > { %1712 = vst [vmem:[%s2340_s12 + $0x8] sm:$0xff] %v1640_v38   ;;  %1713 = vst [vmem:[%s2340_s12 + $0x10] sm:$0xff] %v1645_v43   ;;  %v1655_v59 = vpack.c.bf16 %v1156_v49, %v1155_v48  ;;  %v1161_v5 = vsub.f32 %v1097_v62, %v1129_v2  ;;  %v1162_v6 = vsub.f32 %v1098_v63, %v1130_v3  ;;  %v1132_v9 = vld [vmem:[%s2331_s18 + $0x88] sm:$0xff]  ;;  %v1133_v15 = vld [vmem:[%s2331_s18 + $0x90] sm:$0xff] }
 0x1a5   : > { %1714 = vst [vmem:[%s2340_s12 + $0x18] sm:$0xff] %v1650_v53   ;;  %v1660_v0 = vpack.c.bf16 %v1158_v55, %v1157_v54  ;;  %v1665_v10 = vpack.c.bf16 %v1160_v1, %v1159_v61  ;;  %v1163_v11 = vsub.f32 %v1099_v4, %v1131_v8  ;;  %v1164_v12 = vsub.f32 %v1100_v7, %v1132_v9  ;;  %v1134_v17 = vld [vmem:[%s2331_s18 + $0x98] sm:$0xff]  ;;  %v1103_v19 = vld [vmem:[%s2336_s23 + $0xa0] sm:$0xff]  ;;  %v1104_v20 = vld [vmem:[%s2336_s23 + $0xa8] sm:$0xff] }
 0x1a6   : > { %1715 = vst [vmem:[%s2340_s12 + $0x20] sm:$0xff] %v1655_v59   ;;  %v1670_v16 = vpack.c.bf16 %v1162_v6, %v1161_v5  ;;  %v1165_v18 = vsub.f32 %v1101_v13, %v1133_v15  ;;  %v1166_v22 = vsub.f32 %v1102_v14, %v1134_v17  ;;  %v1135_v23 = vld [vmem:[%s2331_s18 + $0xa0] sm:$0xff]  ;;  %v1136_v24 = vld [vmem:[%s2331_s18 + $0xa8] sm:$0xff]  ;;  %v1105_v25 = vld [vmem:[%s2336_s23 + $0xb0] sm:$0xff] }
 0x1a7   : > { %1716 = vst [vmem:[%s2340_s12 + $0x28] sm:$0xff] %v1660_v0   ;;  %1717 = vst [vmem:[%s2340_s12 + $0x30] sm:$0xff] %v1665_v10   ;;  %v1675_v21 = vpack.c.bf16 %v1164_v12, %v1163_v11  ;;  %v1167_v26 = vsub.f32 %v1103_v19, %v1135_v23  ;;  %v1168_v27 = vsub.f32 %v1104_v20, %v1136_v24  ;;  %v1106_v28 = vld [vmem:[%s2336_s23 + $0xb8] sm:$0xff]  ;;  %v1137_v29 = vld [vmem:[%s2331_s18 + $0xb0] sm:$0xff] }
 0x1a8   : > { %1718 = vst [vmem:[%s2340_s12 + $0x38] sm:$0xff] %v1670_v16   ;;  %v1138_v30 = vld [vmem:[%s2331_s18 + $0xb8] sm:$0xff]  ;;  %v1680_v31 = vpack.c.bf16 %v1166_v22, %v1165_v18  ;;  %v1169_v32 = vsub.f32 %v1105_v25, %v1137_v29  ;;  %v1107_v34 = vld [vmem:[%s2336_s23 + $0xc0] sm:$0xff]  ;;  %v1108_v35 = vld [vmem:[%s2336_s23 + $0xc8] sm:$0xff] }
 0x1a9   : > { %1719 = vst [vmem:[%s2340_s12 + $0x40] sm:$0xff] %v1675_v21   ;;  %v1170_v33 = vsub.f32 %v1106_v28, %v1138_v30  ;;  %v1139_v36 = vld [vmem:[%s2331_s18 + $0xc0] sm:$0xff]  ;;  %v1685_v37 = vpack.c.bf16 %v1168_v27, %v1167_v26  ;;  %v1140_v38 = vld [vmem:[%s2331_s18 + $0xc8] sm:$0xff]  ;;  %v1109_v40 = vld [vmem:[%s2336_s23 + $0xd0] sm:$0xff] }
 0x1aa   : > { %v1171_v39 = vsub.f32 %v1107_v34, %v1139_v36  ;;  %v1110_v41 = vld [vmem:[%s2336_s23 + $0xd8] sm:$0xff]  ;;  %1720 = vst [vmem:[%s2340_s12 + $0x48] sm:$0xff] %v1680_v31   ;;  %v1172_v43 = vsub.f32 %v1108_v35, %v1140_v38  ;;  %v1141_v44 = vld [vmem:[%s2331_s18 + $0xd0] sm:$0xff]  ;;  %v1111_v46 = vld [vmem:[%s2336_s23 + $0xe0] sm:$0xff] }
 0x1ab   : > { %v1690_v42 = vpack.c.bf16 %v1170_v33, %v1169_v32  ;;  %v1142_v45 = vld [vmem:[%s2331_s18 + $0xd8] sm:$0xff]  ;;  %1721 = vst [vmem:[%s2340_s12 + $0x50] sm:$0xff] %v1685_v37   ;;  %v1173_v47 = vsub.f32 %v1109_v40, %v1141_v44  ;;  %v1112_v49 = vld [vmem:[%s2336_s23 + $0xe8] sm:$0xff]  ;;  %v1143_v50 = vld [vmem:[%s2331_s18 + $0xe0] sm:$0xff] }
 0x1ac   : > { %v1174_v48 = vsub.f32 %v1110_v41, %v1142_v45  ;;  %v1144_v51 = vld [vmem:[%s2331_s18 + $0xe8] sm:$0xff]  ;;  %v1695_v52 = vpack.c.bf16 %v1172_v43, %v1171_v39  ;;  %v1175_v53 = vsub.f32 %v1111_v46, %v1143_v50  ;;  %v1113_v55 = vld [vmem:[%s2336_s23 + $0xf0] sm:$0xff]  ;;  %v1114_v56 = vld [vmem:[%s2336_s23 + $0xf8] sm:$0xff] }
 0x1ad   : > { %1722 = vst [vmem:[%s2340_s12 + $0x58] sm:$0xff] %v1690_v42   ;;  %v1176_v54 = vsub.f32 %v1112_v49, %v1144_v51  ;;  %v1145_v57 = vld [vmem:[%s2331_s18 + $0xf0] sm:$0xff]  ;;  %v1146_v59 = vld [vmem:[%s2331_s18 + $0xf8] sm:$0xff] }
 0x1ae   : > { %v1700_v58 = vpack.c.bf16 %v1174_v48, %v1173_v47  ;;  %v1177_v60 = vsub.f32 %v1113_v55, %v1145_v57  ;;  %1723 = vst [vmem:[%s2340_s12 + $0x60] sm:$0xff] %v1695_v52   ;;  %v1178_v62 = vsub.f32 %v1114_v56, %v1146_v59 }
 0x1af   : > { %v1705_v61 = vpack.c.bf16 %v1176_v54, %v1175_v53 }
 0x1b0   : > { %1724 = vst [vmem:[%s2340_s12 + $0x68] sm:$0xff] %v1700_v58   ;;  %v1710_v63 = vpack.c.bf16 %v1178_v62, %v1177_v60 }
 0x1b1   : > { %1725 = vst [vmem:[%s2340_s12 + $0x70] sm:$0xff] %v1705_v61  }
 0x1b2   : > { %1726 = vst [vmem:[%s2340_s12 + $0x78] sm:$0xff] %v1710_v63  }
 0x1b3 PF: > { %s1631_s0 = sshll.u32 %s2106_s21, 11  ;;  %s1358_s27 = sshll.u32 %s2340_s12, 4  ;;  %s2607_s27 = int_to_ptr.vmem [resolvable:$true] %s1358_s27 }
 0x1b4   : > { %s2604_s23 = scalar_lea.hbm %s2672_s3, %s1631_s0  ;;  %s2689_s28 = sand.u32 1, %s2086_s16  }
 0x1b5   : > { %s2611_s14 = scalar_lea.sflag [#allocation4], %s2689_s28  ;;  %s2008_s25 = scalar_lea.vmem %s2607_s27, 2048 }
 0x1b6   : > { %p2009_p8 = scmp.ne.s32.totalorder %s2607_s27, %s2008_s25  ;;  %s2120_s21 = smov [#allocation3]  }
 0x1b7   : > { %s2012_s26 = sshll.u32 %s2120_s21, 4  ;;  %s2013_s26 = int_to_ptr.vmem [resolvable:$false] %s2012_s26 }
 0x1b8   : > { %p2010_p9 = pnand %p2009_p8, %p2220_p7  ;;  %s2014_s30 = scalar_lea.vmem %s2013_s26, 4096 }
 0x1b9   : > { %p2015_p11 = scmp.lt.s32.totalorder %s2607_s27, %s2013_s26  ;;  %p2016_p13 = scmp.lt.s32.totalorder %s2014_s30, %s2008_s25 }
 0x1ba   : > { %p2011_p10 = pneg %p2010_p9 }
 0x1bb   : > { %p2017_p0 = por %p2016_p13, %p2015_p11 }
 0x1bd   : > { %p2018_p1 = pnand %p2017_p0, %p2011_p10 }
 0x1bf   : > { %2021 = shalt.err (!%p2018_p1)
}
 0x1c0   : > { %s2022_s12 = scalar_lea.hbm %s2604_s23, 2048  ;;  %s2026_s6 = scalar_lea.hbm %s2672_s3, 4096 }
 0x1c1   : > { %p2023_p2 = scmp.ne.s32.totalorder %s2604_s23, %s2022_s12  ;;  %p2027_p5 = scmp.lt.u32.totalorder %s2604_s23, %s2672_s3 }
 0x1c2   : > { %p2028_p6 = scmp.lt.u32.totalorder %s2026_s6, %s2022_s12  ;;  %p2030_p9 = scmp.lt.u32.totalorder %s2022_s12, %s2604_s23 }
 0x1c3   : > { %p2024_p3 = pnand %p2023_p2, %p2220_p7 }
 0x1c4   : > { %p2029_p8 = por %p2028_p6, %p2027_p5 }
 0x1c5   : > { %p2025_p4 = pneg %p2024_p3 }
 0x1c6   : > { %p2031_p10 = por %p2030_p9, %p2029_p8 }
 0x1c8   : > { %p2032_p11 = pnand %p2031_p10, %p2025_p4 }
 0x1ca   : > { %2035 = shalt.err (!%p2032_p11)
}
 0x1cb   : > { %s2121_s18 = smov 64   ;;  %s2122_s13 = smov 4  }
 0x1cc   : > { %1855 = dma.vmem_to_hbm [thread:$0]  (%p2220_p7), %s2607_s27, 2048, %s2604_s23, %s2611_s14, %s2121_s18, %s2121_s18, %s2122_s13  }
 0x1cd PF: > { %p1861_p13 = scmp.ge.s32.totalorder %s2118_s24, 2  ;;  %s1377_s0 = sand.u32 1, %s2082_s15  }
 0x1ce   : > { %s1378_s20 = scalar_lea.sflag [#allocation4], %s1377_s0 }
 0x1cf   : > { %p1858_p0 = pnand %p1861_p13, %p2228_p12 }
 0x1d1   : > { %2077 = dma.done.wait (!%p1858_p0), %s1378_s20, 2048  }
 0x1d2   : > { %2079 = vsyncadd (!%p1858_p0), %s1378_s20, 4294965248  ;;  %s18_s24 = sadd.s32 1, %s2118_s24   ;;  %s2690_s7 = sld [smem:[#allocation10_spill]] }
 0x1d3   : > { %p15_p1 = scmp.ge.s32.totalorder %s18_s24, 6   ;;  %s2691_s20 = sld [smem:[#allocation6_spill]] }
 0x1d4   : > { %s2692_s21 = sld [smem:[#allocation7_spill]]  ;;  %s2693_s22 = sld [smem:[#allocation8_spill]] }
 0x1d5   : > { %s2694_s23 = sld [smem:[#allocation9_spill]]  ;;  %s2695_s15 = smov %s2086_s16 }
 0x1d6   : > { %s2696_s16 = smov %s2090_s17  ;;  %s2697_s17 = smov %s2233_s11 }
 0x1d7   : > { %s2698_s18 = smov %s2098_s19  ;;  %17 = sbr.rel (!%p15_p1) target bundleno = 8 (0x8), region = 136 }
 0x1d8   : > { %s2699_s19 = smov %s2690_s7 }
 0x1de   :  { %1391 = vsyncpa [#allocation4], 1 }
 0x1df   :  { %1393 = vsyncpa [#allocation4 + $0x1], 1 }

// kernel: lightgcn_forward.7
= control target key start
LH: loop header
LB: loop body
LE: loop exit
PB: predicated region body
PF: predicated region fallthrough
CT: control target
= control target key end

     0   :  { %s1518_s9 = smov 0   ;;  %s1520_s10 = smov 0   ;;  %s2356_s0 = inlined_call_operand.vmem [shape: f32[256,128], index: 0, kind: input, shape index: {}]   ;;  %s2357_s1 = inlined_call_operand.vmem [shape: f32[5,256,128], index: 1, kind: input, shape index: {}]   ;;  %s2358_s2 = inlined_call_operand.vmem [shape: f32[5,256], index: 2, kind: output, shape index: {}]  }
   0x1   :  { %s1522_s11 = smov 0  }
   0x2 LB: > { %s1534_s12 = sadd.s32 4294967295, %s1501_s11   ;;  %s1537_s13 = sadd.s32 1, %s1501_s11   ;;  %s1501_s11 = sphi %s1522_s11, %s2383_s11   ;;  %s1497_s10 = sphi %s1520_s10, %s2382_s10   ;;  %s1493_s9 = sphi %s1518_s9, %s2381_s9  }
   0x3   : > { %s42_s14 = ssub.s32 %s1501_s11, %s1537_s13  ;;  %s45_s15 = sadd.s32 1, %s1497_s10 }
   0x4   : > { %p43_p0 = scmp.eq.s32.totalorder %s42_s14, 0  ;;  %p52_p1 = scmp.ne.s32.totalorder %s1497_s10, %s1493_s9 }
   0x5   : > { %p53_p2 = scmp.eq.s32.totalorder %s1501_s11, 0  ;;  %p1443_p4 = scmp.ge.s32.totalorder %s1501_s11, 2 }
   0x6   : > { %s1546_s16 = scalar_select %p43_p0, %s1497_s10, %s45_s15  }
   0x7   : > { %p54_p3 = por %p53_p2, %p52_p1  ;;  %104 = sbr.rel (%p1443_p4) target bundleno = 59 (0x3b), region = 16 }
   0xe   : > { %116 = sbr.rel (!%p54_p3) target bundleno = 59 (0x3b), region = 24  ;;  %s118_s17 = sand.u32 (%p54_p3), 1, %s1497_s10  }
   0xf   : > { %s1452_s18 = sshll.u32 (%p54_p3), %s1501_s11, 7  ;;  %s1453_s19 = smul.u32 (%p54_p3), 640, %s118_s17 }
  0x10   : > { %s1554_s22 = scalar_lea.vmem (%p54_p3), %s2357_s1, %s1452_s18 }
  0x11   : > { %v309_v0 = vld [vmem:[%s1554_s22] sm:$0xff] (%p54_p3)  ;;  %v311_v1 = vld [vmem:[%s1554_s22 + $0x8] sm:$0xff] (%p54_p3)  ;;  %v313_v2 = vld [vmem:[%s1554_s22 + $0x10] sm:$0xff] (%p54_p3)  ;;  %s1562_s23 = scalar_lea.vmem (%p54_p3), [#allocation2], %s1453_s19 }
  0x12   : > { %v315_v3 = vld [vmem:[%s1554_s22 + $0x18] sm:$0xff] (%p54_p3)  ;;  %v317_v4 = vld [vmem:[%s1554_s22 + $0x20] sm:$0xff] (%p54_p3)  ;;  %v319_v5 = vld [vmem:[%s1554_s22 + $0x28] sm:$0xff] (%p54_p3)  ;;  %310 = vst [vmem:[%s1562_s23] sm:$0xff] (%p54_p3), %v309_v0 }
  0x13   : > { %312 = vst [vmem:[%s1562_s23 + $0x8] sm:$0xff] (%p54_p3), %v311_v1  ;;  %314 = vst [vmem:[%s1562_s23 + $0x10] sm:$0xff] (%p54_p3), %v313_v2  ;;  %v321_v6 = vld [vmem:[%s1554_s22 + $0x30] sm:$0xff] (%p54_p3)  ;;  %v323_v7 = vld [vmem:[%s1554_s22 + $0x38] sm:$0xff] (%p54_p3) }
  0x14   : > { %316 = vst [vmem:[%s1562_s23 + $0x18] sm:$0xff] (%p54_p3), %v315_v3  ;;  %318 = vst [vmem:[%s1562_s23 + $0x20] sm:$0xff] (%p54_p3), %v317_v4  ;;  %v325_v8 = vld [vmem:[%s1554_s22 + $0x40] sm:$0xff] (%p54_p3)  ;;  %v327_v9 = vld [vmem:[%s1554_s22 + $0x48] sm:$0xff] (%p54_p3) }
  0x15   : > { %320 = vst [vmem:[%s1562_s23 + $0x28] sm:$0xff] %v319_v5  ;;  %322 = vst [vmem:[%s1562_s23 + $0x30] sm:$0xff] %v321_v6  ;;  %v329_v10 = vld [vmem:[%s1554_s22 + $0x50] sm:$0xff]  ;;  %v331_v11 = vld [vmem:[%s1554_s22 + $0x58] sm:$0xff] }
  0x16   : > { %324 = vst [vmem:[%s1562_s23 + $0x38] sm:$0xff] %v323_v7  ;;  %326 = vst [vmem:[%s1562_s23 + $0x40] sm:$0xff] %v325_v8  ;;  %v333_v12 = vld [vmem:[%s1554_s22 + $0x60] sm:$0xff]  ;;  %v335_v13 = vld [vmem:[%s1554_s22 + $0x68] sm:$0xff] }
  0x17   : > { %328 = vst [vmem:[%s1562_s23 + $0x48] sm:$0xff] %v327_v9  ;;  %330 = vst [vmem:[%s1562_s23 + $0x50] sm:$0xff] %v329_v10  ;;  %v337_v14 = vld [vmem:[%s1554_s22 + $0x70] sm:$0xff]  ;;  %v339_v15 = vld [vmem:[%s1554_s22 + $0x78] sm:$0xff] }
  0x18   : > { %332 = vst [vmem:[%s1562_s23 + $0x58] sm:$0xff] %v331_v11  ;;  %334 = vst [vmem:[%s1562_s23 + $0x60] sm:$0xff] %v333_v12  ;;  %v341_v16 = vld [vmem:[%s1554_s22 + $0x100] sm:$0xff]  ;;  %v343_v17 = vld [vmem:[%s1554_s22 + $0x108] sm:$0xff] }
  0x19   : > { %336 = vst [vmem:[%s1562_s23 + $0x68] sm:$0xff] %v335_v13  ;;  %338 = vst [vmem:[%s1562_s23 + $0x70] sm:$0xff] %v337_v14  ;;  %v345_v18 = vld [vmem:[%s1554_s22 + $0x110] sm:$0xff]  ;;  %v347_v19 = vld [vmem:[%s1554_s22 + $0x118] sm:$0xff] }
  0x1a   : > { %340 = vst [vmem:[%s1562_s23 + $0x78] sm:$0xff] %v339_v15  ;;  %342 = vst [vmem:[%s1562_s23 + $0x80] sm:$0xff] %v341_v16  ;;  %v349_v20 = vld [vmem:[%s1554_s22 + $0x120] sm:$0xff]  ;;  %v351_v21 = vld [vmem:[%s1554_s22 + $0x128] sm:$0xff] }
  0x1b   : > { %344 = vst [vmem:[%s1562_s23 + $0x88] sm:$0xff] %v343_v17  ;;  %346 = vst [vmem:[%s1562_s23 + $0x90] sm:$0xff] %v345_v18  ;;  %v353_v22 = vld [vmem:[%s1554_s22 + $0x130] sm:$0xff]  ;;  %v355_v23 = vld [vmem:[%s1554_s22 + $0x138] sm:$0xff] }
  0x1c   : > { %348 = vst [vmem:[%s1562_s23 + $0x98] sm:$0xff] %v347_v19  ;;  %350 = vst [vmem:[%s1562_s23 + $0xa0] sm:$0xff] %v349_v20  ;;  %v357_v24 = vld [vmem:[%s1554_s22 + $0x140] sm:$0xff]  ;;  %v359_v25 = vld [vmem:[%s1554_s22 + $0x148] sm:$0xff] }
  0x1d   : > { %352 = vst [vmem:[%s1562_s23 + $0xa8] sm:$0xff] %v351_v21  ;;  %354 = vst [vmem:[%s1562_s23 + $0xb0] sm:$0xff] %v353_v22  ;;  %v361_v26 = vld [vmem:[%s1554_s22 + $0x150] sm:$0xff]  ;;  %v363_v27 = vld [vmem:[%s1554_s22 + $0x158] sm:$0xff] }
  0x1e   : > { %356 = vst [vmem:[%s1562_s23 + $0xb8] sm:$0xff] %v355_v23  ;;  %358 = vst [vmem:[%s1562_s23 + $0xc0] sm:$0xff] %v357_v24  ;;  %v365_v28 = vld [vmem:[%s1554_s22 + $0x160] sm:$0xff]  ;;  %v367_v29 = vld [vmem:[%s1554_s22 + $0x168] sm:$0xff] }
  0x1f   : > { %360 = vst [vmem:[%s1562_s23 + $0xc8] sm:$0xff] %v359_v25  ;;  %362 = vst [vmem:[%s1562_s23 + $0xd0] sm:$0xff] %v361_v26  ;;  %v369_v30 = vld [vmem:[%s1554_s22 + $0x170] sm:$0xff]  ;;  %v371_v31 = vld [vmem:[%s1554_s22 + $0x178] sm:$0xff] }
  0x20   : > { %364 = vst [vmem:[%s1562_s23 + $0xd8] sm:$0xff] %v363_v27  ;;  %366 = vst [vmem:[%s1562_s23 + $0xe0] sm:$0xff] %v365_v28  ;;  %v373_v32 = vld [vmem:[%s1554_s22 + $0x200] sm:$0xff]  ;;  %v375_v33 = vld [vmem:[%s1554_s22 + $0x208] sm:$0xff] }
  0x21   : > { %368 = vst [vmem:[%s1562_s23 + $0xe8] sm:$0xff] %v367_v29  ;;  %370 = vst [vmem:[%s1562_s23 + $0xf0] sm:$0xff] %v369_v30  ;;  %v377_v34 = vld [vmem:[%s1554_s22 + $0x210] sm:$0xff]  ;;  %v379_v35 = vld [vmem:[%s1554_s22 + $0x218] sm:$0xff] }
  0x22   : > { %372 = vst [vmem:[%s1562_s23 + $0xf8] sm:$0xff] %v371_v31  ;;  %374 = vst [vmem:[%s1562_s23 + $0x100] sm:$0xff] %v373_v32  ;;  %v381_v36 = vld [vmem:[%s1554_s22 + $0x220] sm:$0xff]  ;;  %v383_v37 = vld [vmem:[%s1554_s22 + $0x228] sm:$0xff] }
  0x23   : > { %376 = vst [vmem:[%s1562_s23 + $0x108] sm:$0xff] %v375_v33  ;;  %378 = vst [vmem:[%s1562_s23 + $0x110] sm:$0xff] %v377_v34  ;;  %v385_v38 = vld [vmem:[%s1554_s22 + $0x230] sm:$0xff]  ;;  %v387_v39 = vld [vmem:[%s1554_s22 + $0x238] sm:$0xff] }
  0x24   : > { %380 = vst [vmem:[%s1562_s23 + $0x118] sm:$0xff] %v379_v35  ;;  %382 = vst [vmem:[%s1562_s23 + $0x120] sm:$0xff] %v381_v36  ;;  %v389_v40 = vld [vmem:[%s1554_s22 + $0x240] sm:$0xff]  ;;  %v391_v41 = vld [vmem:[%s1554_s22 + $0x248] sm:$0xff] }
  0x25   : > { %384 = vst [vmem:[%s1562_s23 + $0x128] sm:$0xff] %v383_v37  ;;  %386 = vst [vmem:[%s1562_s23 + $0x130] sm:$0xff] %v385_v38  ;;  %v393_v42 = vld [vmem:[%s1554_s22 + $0x250] sm:$0xff]  ;;  %v395_v43 = vld [vmem:[%s1554_s22 + $0x258] sm:$0xff] }
  0x26   : > { %388 = vst [vmem:[%s1562_s23 + $0x138] sm:$0xff] %v387_v39  ;;  %390 = vst [vmem:[%s1562_s23 + $0x140] sm:$0xff] %v389_v40  ;;  %v397_v44 = vld [vmem:[%s1554_s22 + $0x260] sm:$0xff]  ;;  %v399_v45 = vld [vmem:[%s1554_s22 + $0x268] sm:$0xff] }
  0x27   : > { %392 = vst [vmem:[%s1562_s23 + $0x148] sm:$0xff] %v391_v41  ;;  %394 = vst [vmem:[%s1562_s23 + $0x150] sm:$0xff] %v393_v42  ;;  %v401_v46 = vld [vmem:[%s1554_s22 + $0x270] sm:$0xff]  ;;  %v403_v47 = vld [vmem:[%s1554_s22 + $0x278] sm:$0xff] }
  0x28   : > { %396 = vst [vmem:[%s1562_s23 + $0x158] sm:$0xff] %v395_v43  ;;  %398 = vst [vmem:[%s1562_s23 + $0x160] sm:$0xff] %v397_v44  ;;  %v405_v48 = vld [vmem:[%s1554_s22 + $0x300] sm:$0xff]  ;;  %v407_v49 = vld [vmem:[%s1554_s22 + $0x308] sm:$0xff] }
  0x29   : > { %400 = vst [vmem:[%s1562_s23 + $0x168] sm:$0xff] %v399_v45  ;;  %402 = vst [vmem:[%s1562_s23 + $0x170] sm:$0xff] %v401_v46  ;;  %v409_v50 = vld [vmem:[%s1554_s22 + $0x310] sm:$0xff]  ;;  %v411_v51 = vld [vmem:[%s1554_s22 + $0x318] sm:$0xff] }
  0x2a   : > { %404 = vst [vmem:[%s1562_s23 + $0x178] sm:$0xff] %v403_v47  ;;  %406 = vst [vmem:[%s1562_s23 + $0x180] sm:$0xff] %v405_v48  ;;  %v413_v52 = vld [vmem:[%s1554_s22 + $0x320] sm:$0xff]  ;;  %v415_v53 = vld [vmem:[%s1554_s22 + $0x328] sm:$0xff] }
  0x2b   : > { %408 = vst [vmem:[%s1562_s23 + $0x188] sm:$0xff] %v407_v49  ;;  %410 = vst [vmem:[%s1562_s23 + $0x190] sm:$0xff] %v409_v50  ;;  %v417_v54 = vld [vmem:[%s1554_s22 + $0x330] sm:$0xff]  ;;  %v419_v55 = vld [vmem:[%s1554_s22 + $0x338] sm:$0xff] }
  0x2c   : > { %412 = vst [vmem:[%s1562_s23 + $0x198] sm:$0xff] %v411_v51  ;;  %414 = vst [vmem:[%s1562_s23 + $0x1a0] sm:$0xff] %v413_v52  ;;  %v421_v56 = vld [vmem:[%s1554_s22 + $0x340] sm:$0xff]  ;;  %v423_v57 = vld [vmem:[%s1554_s22 + $0x348] sm:$0xff] }
  0x2d   : > { %416 = vst [vmem:[%s1562_s23 + $0x1a8] sm:$0xff] %v415_v53  ;;  %418 = vst [vmem:[%s1562_s23 + $0x1b0] sm:$0xff] %v417_v54  ;;  %v425_v58 = vld [vmem:[%s1554_s22 + $0x350] sm:$0xff]  ;;  %v427_v59 = vld [vmem:[%s1554_s22 + $0x358] sm:$0xff] }
  0x2e   : > { %420 = vst [vmem:[%s1562_s23 + $0x1b8] sm:$0xff] %v419_v55  ;;  %422 = vst [vmem:[%s1562_s23 + $0x1c0] sm:$0xff] %v421_v56  ;;  %v429_v60 = vld [vmem:[%s1554_s22 + $0x360] sm:$0xff]  ;;  %v431_v61 = vld [vmem:[%s1554_s22 + $0x368] sm:$0xff] }
  0x2f   : > { %424 = vst [vmem:[%s1562_s23 + $0x1c8] sm:$0xff] %v423_v57  ;;  %426 = vst [vmem:[%s1562_s23 + $0x1d0] sm:$0xff] %v425_v58  ;;  %v433_v62 = vld [vmem:[%s1554_s22 + $0x370] sm:$0xff]  ;;  %v435_v63 = vld [vmem:[%s1554_s22 + $0x378] sm:$0xff] }
  0x30   : > { %428 = vst [vmem:[%s1562_s23 + $0x1d8] sm:$0xff] %v427_v59  ;;  %430 = vst [vmem:[%s1562_s23 + $0x1e0] sm:$0xff] %v429_v60  ;;  %v437_v0 = vld [vmem:[%s1554_s22 + $0x400] sm:$0xff]  ;;  %v439_v1 = vld [vmem:[%s1554_s22 + $0x408] sm:$0xff] }
  0x31   : > { %432 = vst [vmem:[%s1562_s23 + $0x1e8] sm:$0xff] %v431_v61  ;;  %434 = vst [vmem:[%s1562_s23 + $0x1f0] sm:$0xff] %v433_v62  ;;  %v441_v2 = vld [vmem:[%s1554_s22 + $0x410] sm:$0xff]  ;;  %v443_v3 = vld [vmem:[%s1554_s22 + $0x418] sm:$0xff] }
  0x32   : > { %436 = vst [vmem:[%s1562_s23 + $0x1f8] sm:$0xff] %v435_v63  ;;  %438 = vst [vmem:[%s1562_s23 + $0x200] sm:$0xff] %v437_v0  ;;  %v445_v4 = vld [vmem:[%s1554_s22 + $0x420] sm:$0xff]  ;;  %v447_v5 = vld [vmem:[%s1554_s22 + $0x428] sm:$0xff] }
  0x33   : > { %440 = vst [vmem:[%s1562_s23 + $0x208] sm:$0xff] %v439_v1  ;;  %442 = vst [vmem:[%s1562_s23 + $0x210] sm:$0xff] %v441_v2  ;;  %v449_v6 = vld [vmem:[%s1554_s22 + $0x430] sm:$0xff]  ;;  %v451_v7 = vld [vmem:[%s1554_s22 + $0x438] sm:$0xff] }
  0x34   : > { %444 = vst [vmem:[%s1562_s23 + $0x218] sm:$0xff] %v443_v3  ;;  %446 = vst [vmem:[%s1562_s23 + $0x220] sm:$0xff] %v445_v4  ;;  %v453_v8 = vld [vmem:[%s1554_s22 + $0x440] sm:$0xff]  ;;  %v455_v9 = vld [vmem:[%s1554_s22 + $0x448] sm:$0xff] }
  0x35   : > { %448 = vst [vmem:[%s1562_s23 + $0x228] sm:$0xff] %v447_v5  ;;  %450 = vst [vmem:[%s1562_s23 + $0x230] sm:$0xff] %v449_v6  ;;  %v457_v10 = vld [vmem:[%s1554_s22 + $0x450] sm:$0xff]  ;;  %v459_v11 = vld [vmem:[%s1554_s22 + $0x458] sm:$0xff] }
  0x36   : > { %452 = vst [vmem:[%s1562_s23 + $0x238] sm:$0xff] %v451_v7  ;;  %454 = vst [vmem:[%s1562_s23 + $0x240] sm:$0xff] %v453_v8  ;;  %v461_v12 = vld [vmem:[%s1554_s22 + $0x460] sm:$0xff]  ;;  %v463_v13 = vld [vmem:[%s1554_s22 + $0x468] sm:$0xff] }
  0x37   : > { %456 = vst [vmem:[%s1562_s23 + $0x248] sm:$0xff] %v455_v9  ;;  %458 = vst [vmem:[%s1562_s23 + $0x250] sm:$0xff] %v457_v10  ;;  %v465_v14 = vld [vmem:[%s1554_s22 + $0x470] sm:$0xff]  ;;  %v467_v15 = vld [vmem:[%s1554_s22 + $0x478] sm:$0xff] }
  0x38   : > { %460 = vst [vmem:[%s1562_s23 + $0x258] sm:$0xff] %v459_v11  ;;  %462 = vst [vmem:[%s1562_s23 + $0x260] sm:$0xff] %v461_v12 }
  0x39   : > { %464 = vst [vmem:[%s1562_s23 + $0x268] sm:$0xff] %v463_v13  ;;  %466 = vst [vmem:[%s1562_s23 + $0x270] sm:$0xff] %v465_v14 }
  0x3a   : > { %468 = vst [vmem:[%s1562_s23 + $0x278] sm:$0xff] %v467_v15 }
  0x3b PF: > { %p1446_p5 = scmp.ge.s32.totalorder %s1501_s11, 1  ;;  %p473_p6 = scmp.lt.s32.totalorder %s1501_s11, 3 }
  0x3d   : > { %p474_p7 = pnand %p1446_p5, %p473_p6 }
  0x3f   : > { %477 = sbr.rel (%p474_p7) target bundleno = 383 (0x17f), region = 62 }
  0x46   : > { %s480_s24 = sand.u32 1, %s1493_s9   ;;  %s1447_s25 = sshll.u32 %s1534_s12, 4  ;;  %vm943_vm0 = vcmask 130112   ;;  %vm950_vm1 = vcmask 195712   ;;  %vm957_vm2 = vcmask 261312   ;;  %vm964_vm3 = vcmask 326912  }
  0x47   : > { %s1454_s26 = smul.u32 640, %s480_s24  ;;  %p506_p8 = scmp.lt.s32.totalorder %s1447_s25, 31  ;;  %vm971_vm4 = vcmask 392512   ;;  %vm978_vm5 = vcmask 458112   ;;  %vm985_vm6 = vcmask 523712   ;;  %vm992_vm7 = vcmask 589312  }
  0x48   : > { %vm999_vm8 = vcmask 654912   ;;  %vm1006_vm9 = vcmask 720512   ;;  %vm1013_vm10 = vcmask 786112   ;;  %vm1020_vm11 = vcmask 851712   ;;  %p512_p9 = scmp.lt.s32.totalorder %s1534_s12, 1 }
  0x49   : > { %s2385_s25 = smov (!%p506_p8, %s1447_s25), 31  ;;  %s1722_s28 = scalar_lea.vmem [#allocation2], %s1454_s26  ;;  %vm1027_vm12 = vcmask 917312   ;;  %vm1034_vm13 = vcmask 982912   ;;  %vm1041_vm14 = vcmask 1048512   ;;  %vm1359_vm15 = vcmask 1041409  }
  0x4a   : > { %s1448_s27 = sshll.u32 %s2385_s25, 3  ;;  %v518_v16 = vld [vmem:[%s1722_s28 + $0x10] sm:$0xff]  ;;  %v516_v17 = vld [vmem:[%s1722_s28] sm:$0xff]  ;;  %v519_v18 = vld [vmem:[%s1722_s28 + $0x18] sm:$0xff]  ;;  %s2387_s12 = smov (!%p512_p9, %s1534_s12), 1 }
  0x4b   : > { %s1729_s3 = scalar_lea.vmem %s2356_s0, %s1448_s27  ;;  %v517_v19 = vld [vmem:[%s1722_s28 + $0x8] sm:$0xff]  ;;  %v520_v30 = vld [vmem:[%s1722_s28 + $0x20] sm:$0xff]  ;;  %v523_v34 = vld [vmem:[%s1722_s28 + $0x38] sm:$0xff]  ;;  %s1449_s4 = sshll.u32 %s2387_s12, 3 }
  0x4c   : > { %v1734_v20 = vld [vmem:[%s1729_s3 + $0x10] sm:$0xff]  ;;  %v1737_v21 = vld [vmem:[%s1729_s3] sm:$0xff]  ;;  %v1740_v22 = vld [vmem:[%s1729_s3 + $0x18] sm:$0xff]  ;;  %s515_s7 = scalar_lea.vmem %s2358_s2, %s1449_s4 }
  0x4d   : > { %v614_v23 = vmul.f32 %v1734_v20, %v518_v16  ;;  %v612_v24 = vmul.f32 %v1737_v21, %v516_v17  ;;  %v1745_v25 = vld [vmem:[%s1729_s3 + $0x8] sm:$0xff]  ;;  %v615_v26 = vmul.f32 %v1740_v22, %v519_v18  ;;  %v1755_v31 = vld [vmem:[%s1729_s3 + $0x20] sm:$0xff]  ;;  %v1761_v35 = vld [vmem:[%s1729_s3 + $0x38] sm:$0xff] }
  0x4e   : > { %v613_v27 = vmul.f32 %v1745_v25, %v517_v19  ;;  %v521_v28 = vld [vmem:[%s1722_s28 + $0x28] sm:$0xff]  ;;  %v616_v33 = vmul.f32 %v1755_v31, %v520_v30  ;;  %v522_v36 = vld [vmem:[%s1722_s28 + $0x30] sm:$0xff]  ;;  %v619_v40 = vmul.f32 %v1761_v35, %v523_v34  ;;  %v524_v42 = vld [vmem:[%s1722_s28 + $0x40] sm:$0xff] }
  0x4f   : > { %696 = vadd.xlane.f32.xlu1 %v614_v23  ;;  %692 = vadd.xlane.f32.xlu0 %v612_v24  ;;  %v1751_v29 = vld [vmem:[%s1729_s3 + $0x28] sm:$0xff]  ;;  %v1765_v37 = vld [vmem:[%s1729_s3 + $0x30] sm:$0xff]  ;;  %v1775_v43 = vld [vmem:[%s1729_s3 + $0x40] sm:$0xff] }
  0x50   : > { %v617_v32 = vmul.f32 %v1751_v29, %v521_v28  ;;  %v525_v38 = vld [vmem:[%s1722_s28 + $0x48] sm:$0xff]  ;;  %v618_v41 = vmul.f32 %v1765_v37, %v522_v36  ;;  %v527_v44 = vld [vmem:[%s1722_s28 + $0x58] sm:$0xff]  ;;  %v548_v46 = vld [vmem:[%s1722_s28 + $0x100] sm:$0xff]  ;;  %v620_v56 = vmul.f32 %v1775_v43, %v524_v42 }
  0x51   : > { %v1769_v39 = vld [vmem:[%s1729_s3 + $0x48] sm:$0xff]  ;;  %v1779_v45 = vld [vmem:[%s1729_s3 + $0x58] sm:$0xff]  ;;  %v564_v47 = vld [vmem:[%s1722_s28 + $0x180] sm:$0xff]  ;;  %v1789_v51 = vmul.f32 %v1737_v21, %v548_v46 }
  0x52   : > { %v621_v48 = vmul.f32 %v1769_v39, %v525_v38  ;;  %v526_v49 = vld [vmem:[%s1722_s28 + $0x50] sm:$0xff]  ;;  %v1792_v52 = vmul.f32 %v1737_v21, %v564_v47  ;;  %v551_v54 = vld [vmem:[%s1722_s28 + $0x118] sm:$0xff]  ;;  %v565_v55 = vld [vmem:[%s1722_s28 + $0x188] sm:$0xff]  ;;  %v623_v13 = vmul.f32 %v1779_v45, %v527_v44 }
  0x53   : > { %698 = vadd.xlane.f32.xlu1 %v615_v26  ;;  %694 = vadd.xlane.f32.xlu0 %v613_v27  ;;  %v1786_v50 = vld [vmem:[%s1729_s3 + $0x50] sm:$0xff]  ;;  %v1802_v58 = vmul.f32 %v1740_v22, %v551_v54  ;;  %v1805_v59 = vmul.f32 %v1745_v25, %v565_v55  ;;  %v580_v60 = vld [vmem:[%s1722_s28 + $0x200] sm:$0xff]  ;;  %v581_v2 = vld [vmem:[%s1722_s28 + $0x208] sm:$0xff] }
  0x54   : > { %v550_v53 = vld [vmem:[%s1722_s28 + $0x110] sm:$0xff]  ;;  %v552_v62 = vld [vmem:[%s1722_s28 + $0x120] sm:$0xff]  ;;  %v1811_v63 = vmul.f32 %v1737_v21, %v580_v60  ;;  %v567_v4 = vld [vmem:[%s1722_s28 + $0x198] sm:$0xff]  ;;  %v1827_v7 = vmul.f32 %v1745_v25, %v581_v2  ;;  %v622_v26 = vmul.f32 %v1786_v50, %v526_v49 }
  0x55   : > { %v1799_v57 = vmul.f32 %v1734_v20, %v550_v53  ;;  %v566_v61 = vld [vmem:[%s1722_s28 + $0x190] sm:$0xff]  ;;  %v1817_v1 = vmul.f32 %v1755_v31, %v552_v62  ;;  %v529_v5 = vld [vmem:[%s1722_s28 + $0x68] sm:$0xff]  ;;  %v1833_v9 = vmul.f32 %v1740_v22, %v567_v4  ;;  %v568_v10 = vld [vmem:[%s1722_s28 + $0x1a0] sm:$0xff] }
  0x56   : > { %v1814_v0 = vmul.f32 %v1734_v20, %v566_v61  ;;  %v582_v3 = vld [vmem:[%s1722_s28 + $0x210] sm:$0xff]  ;;  %v1824_v6 = vld [vmem:[%s1729_s3 + $0x68] sm:$0xff]  ;;  %v528_v14 = vld [vmem:[%s1722_s28 + $0x60] sm:$0xff]  ;;  %v1844_v16 = vmul.f32 %v1755_v31, %v568_v10 }
  0x57   : > { %702 = vadd.xlane.f32.xlu1 %v617_v32  ;;  %700 = vadd.xlane.f32.xlu0 %v616_v33  ;;  %v1830_v8 = vmul.f32 %v1734_v20, %v582_v3  ;;  %v553_v11 = vld [vmem:[%s1722_s28 + $0x128] sm:$0xff]  ;;  %v554_v12 = vld [vmem:[%s1722_s28 + $0x130] sm:$0xff]  ;;  %v1841_v15 = vld [vmem:[%s1729_s3 + $0x60] sm:$0xff]  ;;  %v625_v55 = vmul.f32 %v1824_v6, %v529_v5 }
  0x58   : > { %v1847_v17 = vmul.f32 %v1751_v29, %v553_v11  ;;  %v1850_v18 = vmul.f32 %v1765_v37, %v554_v12  ;;  %v583_v19 = vld [vmem:[%s1722_s28 + $0x218] sm:$0xff]  ;;  %v584_v23 = vld [vmem:[%s1722_s28 + $0x220] sm:$0xff]  ;;  %v569_v24 = vld [vmem:[%s1722_s28 + $0x1a8] sm:$0xff]  ;;  %v624_v5 = vmul.f32 %v1841_v15, %v528_v14 }
  0x59   : > { %v1857_v27 = vmul.f32 %v1740_v22, %v583_v19  ;;  %v1860_v28 = vmul.f32 %v1755_v31, %v584_v23  ;;  %v1863_v30 = vmul.f32 %v1751_v29, %v569_v24  ;;  %v570_v32 = vld [vmem:[%s1722_s28 + $0x1b0] sm:$0xff]  ;;  %v555_v33 = vld [vmem:[%s1722_s28 + $0x138] sm:$0xff]  ;;  %v556_v34 = vld [vmem:[%s1722_s28 + $0x140] sm:$0xff] }
  0x5a   : > { %v1869_v36 = vmul.f32 %v1765_v37, %v570_v32  ;;  %v1872_v38 = vmul.f32 %v1761_v35, %v555_v33  ;;  %v586_v42 = vld [vmem:[%s1722_s28 + $0x230] sm:$0xff]  ;;  %v571_v44 = vld [vmem:[%s1722_s28 + $0x1b8] sm:$0xff]  ;;  %v572_v49 = vld [vmem:[%s1722_s28 + $0x1c0] sm:$0xff] }
  0x5b   : > { %706 = vadd.xlane.f32.xlu1 %v619_v40  ;;  %704 = vadd.xlane.f32.xlu0 %v618_v41  ;;  %v1875_v40 = vmul.f32 %v1775_v43, %v556_v34  ;;  %v585_v41 = vld [vmem:[%s1722_s28 + $0x228] sm:$0xff]  ;;  %v1884_v47 = vmul.f32 %v1765_v37, %v586_v42  ;;  %v558_v54 = vld [vmem:[%s1722_s28 + $0x150] sm:$0xff]  ;;  %v1895_v60 = vld [vmem:[%s1729_s3 + $0x78] sm:$0xff]  ;;  %v1898_v61 = vmul.f32 %v1775_v43, %v572_v49 }
  0x5c   : > { %v1881_v46 = vmul.f32 %v1751_v29, %v585_v41  ;;  %v557_v53 = vld [vmem:[%s1722_s28 + $0x148] sm:$0xff]  ;;  %v1904_v2 = vmul.f32 %v1786_v50, %v558_v54  ;;  %v587_v3 = vld [vmem:[%s1722_s28 + $0x238] sm:$0xff]  ;;  %v588_v4 = vld [vmem:[%s1722_s28 + $0x240] sm:$0xff] }
  0x5d   : > { %v1901_v62 = vmul.f32 %v1769_v39, %v557_v53  ;;  %v573_v10 = vld [vmem:[%s1722_s28 + $0x1c8] sm:$0xff]  ;;  %v530_v11 = vld [vmem:[%s1722_s28 + $0x70] sm:$0xff]  ;;  %v1915_v19 = vmul.f32 %v1761_v35, %v587_v3  ;;  %v1918_v23 = vmul.f32 %v1775_v43, %v588_v4  ;;  %v559_v33 = vld [vmem:[%s1722_s28 + $0x158] sm:$0xff] }
  0x5e   : > { %v1912_v12 = vld [vmem:[%s1729_s3 + $0x70] sm:$0xff]  ;;  %v1921_v24 = vmul.f32 %v1769_v39, %v573_v10  ;;  %v560_v34 = vld [vmem:[%s1722_s28 + $0x160] sm:$0xff]  ;;  %v1930_v41 = vmul.f32 %v1779_v45, %v559_v33  ;;  %v575_v53 = vld [vmem:[%s1722_s28 + $0x1d8] sm:$0xff] }
  0x5f   : > { %710 = vadd.xlane.f32.xlu1 %v621_v48  ;;  %708 = vadd.xlane.f32.xlu0 %v620_v56  ;;  %v1887_v48 = vmul.f32 %v1761_v35, %v571_v44  ;;  %v531_v56 = vld [vmem:[%s1722_s28 + $0x78] sm:$0xff]  ;;  %v574_v32 = vld [vmem:[%s1722_s28 + $0x1d0] sm:$0xff]  ;;  %v1933_v42 = vmul.f32 %v1841_v15, %v560_v34  ;;  %v589_v44 = vld [vmem:[%s1722_s28 + $0x248] sm:$0xff] }
  0x60   : > { %v1927_v14 = vmul.f32 %v1786_v50, %v574_v32  ;;  %v590_v49 = vld [vmem:[%s1722_s28 + $0x250] sm:$0xff]  ;;  %v1939_v54 = vmul.f32 %v1769_v39, %v589_v44  ;;  %v576_v3 = vld [vmem:[%s1722_s28 + $0x1e0] sm:$0xff]  ;;  %v561_v4 = vld [vmem:[%s1722_s28 + $0x168] sm:$0xff] }
  0x61   : > { %v562_v10 = vld [vmem:[%s1722_s28 + $0x170] sm:$0xff]  ;;  %v1951_v32 = vmul.f32 %v1841_v15, %v576_v3  ;;  %v1954_v33 = vmul.f32 %v1824_v6, %v561_v4  ;;  %v591_v44 = vld [vmem:[%s1722_s28 + $0x258] sm:$0xff] }
  0x62   : > { %v1957_v34 = vmul.f32 %v1912_v12, %v562_v10  ;;  %v578_v10 = vld [vmem:[%s1722_s28 + $0x1f0] sm:$0xff] }
  0x63   : > { %714 = vadd.xlane.f32.xlu1 %v623_v13  ;;  %712 = vadd.xlane.f32.xlu0 %v622_v26  ;;  %v1942_v13 = vmul.f32 %v1786_v50, %v590_v49  ;;  %v1945_v26 = vmul.f32 %v1779_v45, %v575_v53  ;;  %2361 = vst [vmem:[#allocation5_spill] sm:$0xff] %v1951_v32  ;;  %2362 = vst [vmem:[#allocation6_spill] sm:$0xff] %v1954_v33  ;;  %v592_v49 = vld [vmem:[%s1722_s28 + $0x260] sm:$0xff]  ;;  %v577_v53 = vld [vmem:[%s1722_s28 + $0x1e8] sm:$0xff] }
  0x64   : > { %2363 = vst [vmem:[#allocation7_spill] sm:$0xff] %v1957_v34  ;;  %v1967_v3 = vmul.f32 %v1841_v15, %v592_v49  ;;  %v1970_v4 = vmul.f32 %v1824_v6, %v577_v53  ;;  %v563_v34 = vld [vmem:[%s1722_s28 + $0x178] sm:$0xff]  ;;  %v626_v32 = vmul.f32 %v1912_v12, %v530_v11  ;;  %v593_v49 = vld [vmem:[%s1722_s28 + $0x268] sm:$0xff]  ;;  %v532_v53 = vld [vmem:[%s1722_s28 + $0x80] sm:$0xff] }
  0x65   : > { %2359 = vst [vmem:[#allocation3_spill] sm:$0xff] %v1942_v13  ;;  %2360 = vst [vmem:[#allocation4_spill] sm:$0xff] %v1945_v26  ;;  %v627_v26 = vmul.f32 %v1895_v60, %v531_v56  ;;  %v1964_v13 = vmul.f32 %v1779_v45, %v591_v44  ;;  %v579_v33 = vld [vmem:[%s1722_s28 + $0x1f8] sm:$0xff]  ;;  %v1977_v56 = vmul.f32 %v1912_v12, %v578_v10 }
  0x66   : > { %2364 = vst [vmem:[#allocation8_spill] sm:$0xff] %v1967_v3  ;;  %2365 = vst [vmem:[#allocation9_spill] sm:$0xff] %v1970_v4  ;;  %v1980_v44 = vmul.f32 %v1895_v60, %v563_v34  ;;  %v533_v3 = vld [vmem:[%s1722_s28 + $0x88] sm:$0xff]  ;;  %v1986_v4 = vmul.f32 %v1895_v60, %v579_v33  ;;  %v595_v10 = vld [vmem:[%s1722_s28 + $0x278] sm:$0xff]  ;;  %v628_v34 = vmul.f32 %v1737_v21, %v532_v53 }
  0x67   : > { %718 = vadd.xlane.f32.xlu1 %v625_v55  ;;  %716 = vadd.xlane.f32.xlu0 %v624_v5  ;;  %2366 = vst [vmem:[#allocation10_spill] sm:$0xff] %v1977_v56  ;;  %v1989_v55 = vmul.f32 %v1824_v6, %v593_v49  ;;  %v594_v5 = vld [vmem:[%s1722_s28 + $0x270] sm:$0xff]  ;;  %v1997_v56 = vmul.f32 %v1895_v60, %v595_v10  ;;  %v537_v10 = vld [vmem:[%s1722_s28 + $0xa8] sm:$0xff]  ;;  %v540_v53 = vld [vmem:[%s1722_s28 + $0xc0] sm:$0xff] }
  0x68   : > { %2367 = vst [vmem:[#allocation11_spill] sm:$0xff] %v1986_v4  ;;  %v1993_v11 = vmul.f32 %v1912_v12, %v594_v5  ;;  %v629_v33 = vmul.f32 %v1745_v25, %v533_v3  ;;  %v535_v4 = vld [vmem:[%s1722_s28 + $0x98] sm:$0xff]  ;;  %v534_v49 = vld [vmem:[%s1722_s28 + $0x90] sm:$0xff] }
  0x69   : > { %2369 = vst [vmem:[#allocation13_spill] sm:$0xff] %v1997_v56  ;;  %v631_v5 = vmul.f32 %v1740_v22, %v535_v4  ;;  %v536_v56 = vld [vmem:[%s1722_s28 + $0xa0] sm:$0xff]  ;;  %v538_v3 = vld [vmem:[%s1722_s28 + $0xb0] sm:$0xff]  ;;  %v541_v4 = vld [vmem:[%s1722_s28 + $0xc8] sm:$0xff] }
  0x6a   : > { %2368 = vst [vmem:[#allocation12_spill] sm:$0xff] %v1993_v11  ;;  %v630_v11 = vmul.f32 %v1734_v20, %v534_v49  ;;  %v632_v21 = vmul.f32 %v1755_v31, %v536_v56  ;;  %v634_v20 = vmul.f32 %v1765_v37, %v538_v3  ;;  %v636_v31 = vmul.f32 %v1775_v43, %v540_v53  ;;  %v543_v56 = vld [vmem:[%s1722_s28 + $0xd8] sm:$0xff]  ;;  %v545_v37 = vld [vmem:[%s1722_s28 + $0xe8] sm:$0xff] }
  0x6b   : > { %722 = vadd.xlane.f32.xlu1 %v627_v26  ;;  %720 = vadd.xlane.f32.xlu0 %v626_v32  ;;  %v633_v26 = vmul.f32 %v1751_v29, %v537_v10  ;;  %v539_v32 = vld [vmem:[%s1722_s28 + $0xb8] sm:$0xff]  ;;  %v637_v29 = vmul.f32 %v1769_v39, %v541_v4  ;;  %v641_v49 = vmul.f32 %v1824_v6, %v545_v37  ;;  %v546_v10 = vld [vmem:[%s1722_s28 + $0xf0] sm:$0xff]  ;;  %v2374_v6 = vld [vmem:[#allocation7_spill] sm:$0xff] }
  0x6c   : > { %v635_v22 = vmul.f32 %v1761_v35, %v539_v32  ;;  %v547_v39 = vld [vmem:[%s1722_s28 + $0xf8] sm:$0xff] }
  0x6d   : > { %v643_v43 = vmul.f32 %v1895_v60, %v547_v39 }
  0x6f   : > { %726 = vadd.xlane.f32.xlu1 %v629_v33  ;;  %724 = vadd.xlane.f32.xlu0 %v628_v34  ;;  %v639_v33 = vmul.f32 %v1779_v45, %v543_v56  ;;  %v544_v34 = vld [vmem:[%s1722_s28 + $0xe0] sm:$0xff] }
  0x73   : > { %730 = vadd.xlane.f32.xlu1 %v631_v5  ;;  %728 = vadd.xlane.f32.xlu0 %v630_v11  ;;  %v542_v11 = vld [vmem:[%s1722_s28 + $0xd0] sm:$0xff]  ;;  %v640_v5 = vmul.f32 %v1841_v15, %v544_v34  ;;  %v2379_v34 = vld [vmem:[#allocation12_spill] sm:$0xff] }
  0x74   : > { %v638_v35 = vmul.f32 %v1786_v50, %v542_v11  ;;  %v2370_v50 = vld [vmem:[#allocation3_spill] sm:$0xff] }
  0x77   : > { %734 = vadd.xlane.f32.xlu1 %v633_v26  ;;  %732 = vadd.xlane.f32.xlu0 %v632_v21  ;;  %v642_v26 = vmul.f32 %v1912_v12, %v546_v10  ;;  %v549_v21 = vld [vmem:[%s1722_s28 + $0x108] sm:$0xff] }
  0x78   : > { %v645_v45 = vmul.f32 %v1745_v25, %v549_v21  ;;  %v932_v25 = vlaneseq }
  0x7b   : > { %738 = vadd.xlane.f32.xlu1 %v635_v22  ;;  %736 = vadd.xlane.f32.xlu0 %v634_v20  ;;  %v2378_v20 = vld [vmem:[#allocation11_spill] sm:$0xff] }
  0x7f   : > { %742 = vadd.xlane.f32.xlu1 %v637_v29  ;;  %740 = vadd.xlane.f32.xlu0 %v636_v31 }
  0x83   : > { %746 = vadd.xlane.f32.xlu1 %v639_v33  ;;  %744 = vadd.xlane.f32.xlu0 %v638_v35 }
  0x87   : > { %750 = vadd.xlane.f32.xlu1 %v641_v49  ;;  %748 = vadd.xlane.f32.xlu0 %v640_v5  ;;  %v2380_v49 = vld [vmem:[#allocation13_spill] sm:$0xff] }
  0x8b   : > { %754 = vadd.xlane.f32.xlu1 %v643_v43  ;;  %752 = vadd.xlane.f32.xlu0 %v642_v26 }
  0x8f   : > { %758 = vadd.xlane.f32.xlu1 %v645_v45  ;;  %756 = vadd.xlane.f32.xlu0 %v1789_v51  ;;  %v2371_v51 = vld [vmem:[#allocation4_spill] sm:$0xff] }
  0x93   : > { %788 = vadd.xlane.f32.xlu1 %v1792_v52  ;;  %760 = vadd.xlane.f32.xlu0 %v1799_v57  ;;  %v2066_v52 = vand.u32 127, %v932_v25  ;;  %v2372_v57 = vld [vmem:[#allocation5_spill] sm:$0xff] }
  0x95   : > { %v959_v15 = vadd.s32 4294967264, %v2066_v52  ;;  %v1008_v35 = vadd.s32 4294967208, %v2066_v52  ;;  %v1022_v43 = vadd.s32 4294967192, %v2066_v52  ;;  %v1015_v26 = vadd.s32 4294967200, %v2066_v52 }
  0x97   : > { %762 = vadd.xlane.f32.xlu1 %v1802_v58  ;;  %790 = vadd.xlane.f32.xlu0 %v1805_v59  ;;  %v2373_v58 = vld [vmem:[#allocation6_spill] sm:$0xff]  ;;  %v2070_v59 = vshrl.u32 %v932_v25, 7 }
  0x99   : > { %v2144_v25 = vsub.s32 %v1008_v35, %v2070_v59 }
  0x9b   : > { %820 = vadd.xlane.f32.xlu1 %v1811_v63  ;;  %792 = vadd.xlane.f32.xlu0 %v1814_v0  ;;  %v952_v63 = vadd.s32 4294967272, %v2066_v52  ;;  %v938_v0 = vadd.s32 4294967288, %v2066_v52 }
  0x9f   : > { %764 = vadd.xlane.f32.xlu1 %v1817_v1  ;;  %822 = vadd.xlane.f32.xlu0 %v1827_v7  ;;  %v945_v1 = vadd.s32 4294967280, %v2066_v52 }
  0xa3   : > { %824 = vadd.xlane.f32.xlu1 %v1830_v8  ;;  %794 = vadd.xlane.f32.xlu0 %v1833_v9  ;;  %v966_v9 = vadd.s32 4294967256, %v2066_v52 }
  0xa7   : > { %796 = vadd.xlane.f32.xlu1 %v1844_v16  ;;  %766 = vadd.xlane.f32.xlu0 %v1847_v17  ;;  %v2081_v16 = vsub.s32 %v2066_v52, %v2070_v59  ;;  %v2084_v17 = vsub.s32 %v952_v63, %v2070_v59 }
  0xab   : > { %768 = vadd.xlane.f32.xlu1 %v1850_v18  ;;  %826 = vadd.xlane.f32.xlu0 %v1857_v27  ;;  %v2087_v18 = vsub.s32 %v938_v0, %v2070_v59  ;;  %v2090_v27 = vsub.s32 %v945_v1, %v2070_v59  ;;  %v2152_v0 = vsub.s32 %v1022_v43, %v2070_v59 }
  0xac   : > { %v2155_v1 = vsub.s32 %v1015_v26, %v2070_v59 }
  0xaf   : > { %828 = vadd.xlane.f32.xlu1 %v1860_v28  ;;  %798 = vadd.xlane.f32.xlu0 %v1863_v30  ;;  %v2375_v28 = vld [vmem:[#allocation8_spill] sm:$0xff]  ;;  %v2376_v30 = vld [vmem:[#allocation9_spill] sm:$0xff] }
  0xb3   : > { %800 = vadd.xlane.f32.xlu1 %v1869_v36  ;;  %770 = vadd.xlane.f32.xlu0 %v1872_v38 }
  0xb7   : > { %772 = vadd.xlane.f32.xlu1 %v1875_v40  ;;  %830 = vadd.xlane.f32.xlu0 %v1881_v46  ;;  %v2095_v40 = vsub.s32 %v966_v9, %v2070_v59  ;;  %v2098_v46 = vsub.s32 %v959_v15, %v2070_v59  ;;  %v1029_v9 = vadd.s32 4294967184, %v2066_v52 }
  0xbb   : > { %832 = vadd.xlane.f32.xlu1 %v1884_v47  ;;  %802 = vadd.xlane.f32.xlu0 %v1887_v48  ;;  %v980_v47 = vadd.s32 4294967240, %v2066_v52 }
  0xbf   : > { %804 = vadd.xlane.f32.xlu1 %v1898_v61  ;;  %774 = vadd.xlane.f32.xlu0 %v1901_v62  ;;  %v973_v62 = vadd.s32 4294967248, %v2066_v52 }
  0xc3   : > { %776 = vadd.xlane.f32.xlu1 %v1904_v2  ;;  %834 = vadd.xlane.f32.xlu0 %v1915_v19  ;;  %v2377_v19 = vld [vmem:[#allocation10_spill] sm:$0xff] }
  0xc7   : > { %836 = vadd.xlane.f32.xlu1 %v1918_v23  ;;  %806 = vadd.xlane.f32.xlu0 %v1921_v24 }
  0xcb   : > { %808 = vadd.xlane.f32.xlu1 %v1927_v14  ;;  %778 = vadd.xlane.f32.xlu0 %v1930_v41  ;;  %v2111_v41 = vsub.s32 %v980_v47, %v2070_v59 }
  0xcf   : > { %780 = vadd.xlane.f32.xlu1 %v1933_v42  ;;  %838 = vadd.xlane.f32.xlu0 %v1939_v54  ;;  %v994_v42 = vadd.s32 4294967224, %v2066_v52  ;;  %v987_v54 = vadd.s32 4294967232, %v2066_v52 }
  0xd1   : > { %v2126_v31 = vsub.s32 %v994_v42, %v2070_v59  ;;  %v2129_v56 = vsub.s32 %v987_v54, %v2070_v59 }
  0xd3   : > { %840 = vadd.xlane.f32.xlu1 %v2370_v50  ;;  %810 = vadd.xlane.f32.xlu0 %v2371_v51 }
  0xd7   : > { %812 = vadd.xlane.f32.xlu1 %v2372_v57  ;;  %782 = vadd.xlane.f32.xlu0 %v2373_v58 }
  0xdb   : > { %784 = vadd.xlane.f32.xlu1 %v2374_v6  ;;  %842 = vadd.xlane.f32.xlu0 %v1964_v13 }
  0xdc   : > { %v697_v7 = vpop.xlane.xlu1 %696  ;;  %v693_v8 = vpop.xlane.xlu0 %692 }
  0xdd   : > { %v937_v48 = vrot.slane %v693_v8, %v2081_v16  ;;  %v949_v2 = vrot.slane %v697_v7, %v2090_v27  ;;  %v1036_v8 = vadd.s32 4294967176, %v2066_v52 }
  0xdf   : > { %844 = vadd.xlane.f32.xlu1 %v2375_v28  ;;  %814 = vadd.xlane.f32.xlu0 %v2376_v30 }
  0xe0   : > { %v699_v36 = vpop.xlane.xlu1 %698  ;;  %v695_v38 = vpop.xlane.xlu0 %694 }
  0xe1   : > { %v956_v60 = vrot.slane %v699_v36, %v2084_v17  ;;  %v942_v61 = vrot.slane %v695_v38, %v2087_v18 }
  0xe3   : > { %v944_v12 = vsel %vm943_vm0, %v942_v61, %v937_v48  ;;  %816 = vadd.xlane.f32.xlu1 %v2377_v19  ;;  %786 = vadd.xlane.f32.xlu0 %v1980_v44  ;;  %v2119_v44 = vsub.s32 %v973_v62, %v2070_v59  ;;  %v2166_v48 = vsub.s32 %v1036_v8, %v2070_v59 }
  0xe4   : > { %v951_v23 = vsel %vm950_vm1, %v949_v2, %v944_v12  ;;  %v703_v24 = vpop.xlane.xlu1 %702  ;;  %v701_v14 = vpop.xlane.xlu0 %700 }
  0xe5   : > { %v970_v13 = vrot.slane %v703_v24, %v2095_v40  ;;  %v958_v32 = vsel %vm957_vm2, %v956_v60, %v951_v23  ;;  %v963_v3 = vrot.slane %v701_v14, %v2098_v46  ;;  %v2169_v60 = vsub.s32 %v1029_v9, %v2070_v59 }
  0xe7   : > { %v965_v22 = vsel %vm964_vm3, %v963_v3, %v958_v32  ;;  %818 = vadd.xlane.f32.xlu1 %v2378_v20  ;;  %846 = vadd.xlane.f32.xlu0 %v1989_v55  ;;  %v1001_v55 = vadd.s32 4294967216, %v2066_v52 }
  0xe8   : > { %v707_v4 = vpop.xlane.xlu1 %706  ;;  %v972_v53 = vsel %vm971_vm4, %v970_v13, %v965_v22  ;;  %v705_v29 = vpop.xlane.xlu0 %704 }
  0xe9   : > { %v984_v11 = vrot.slane %v707_v4, %v2111_v41  ;;  %v977_v33 = vrot.slane %v705_v29, %v2119_v44  ;;  %v2147_v50 = vsub.s32 %v1001_v55, %v2070_v59 }
  0xeb   : > { %v979_v37 = vsel %vm978_vm5, %v977_v33, %v972_v53  ;;  %848 = vadd.xlane.f32.xlu0 %v2379_v34  ;;  %850 = vadd.xlane.f32.xlu1 %v2380_v49 }
  0xec   : > { %v711_v5 = vpop.xlane.xlu1 %710  ;;  %v986_v39 = vsel %vm985_vm6, %v984_v11, %v979_v37  ;;  %v709_v10 = vpop.xlane.xlu0 %708 }
  0xed   : > { %v998_v21 = vrot.slane %v711_v5, %v2126_v31  ;;  %v991_v45 = vrot.slane %v709_v10, %v2129_v56 }
  0xef   : > { %v993_v51 = vsel %vm992_vm7, %v991_v45, %v986_v39 }
  0xf0   : > { %v715_v57 = vpop.xlane.xlu1 %714  ;;  %v1000_v58 = vsel %vm999_vm8, %v998_v21, %v993_v51  ;;  %v713_v63 = vpop.xlane.xlu0 %712 }
  0xf1   : > { %v1012_v6 = vrot.slane %v715_v57, %v2144_v25  ;;  %v1005_v7 = vrot.slane %v713_v63, %v2147_v50 }
  0xf3   : > { %v1007_v15 = vsel %vm1006_vm9, %v1005_v7, %v1000_v58 }
  0xf4   : > { %v719_v28 = vpop.xlane.xlu1 %718  ;;  %v1014_v30 = vsel %vm1013_vm10, %v1012_v6, %v1007_v15  ;;  %v717_v36 = vpop.xlane.xlu0 %716 }
  0xf5   : > { %v1026_v38 = vrot.slane %v719_v28, %v2152_v0  ;;  %v1019_v47 = vrot.slane %v717_v36, %v2155_v1 }
  0xf7   : > { %v1021_v52 = vsel %vm1020_vm11, %v1019_v47, %v1014_v30 }
  0xf8   : > { %v723_v61 = vpop.xlane.xlu1 %722  ;;  %v1028_v62 = vsel %vm1027_vm12, %v1026_v38, %v1021_v52  ;;  %v721_v2 = vpop.xlane.xlu0 %720 }
  0xf9   : > { %v1040_v12 = vrot.slane %v723_v61, %v2166_v48  ;;  %v1033_v19 = vrot.slane %v721_v2, %v2169_v60 }
  0xfb   : > { %v1035_v23 = vsel %vm1034_vm13, %v1033_v19, %v1028_v62 }
  0xfc   : > { %v1042_v24 = vsel %vm1041_vm14, %v1040_v12, %v1035_v23  ;;  %v727_v14 = vpop.xlane.xlu1 %726  ;;  %v725_v42 = vpop.xlane.xlu0 %724 }
  0xfd   : > { %v1050_v59 = vrot.slane %v727_v14, %v2087_v18  ;;  %v1046_v54 = vrot.slane %v725_v42, %v2081_v16 }
  0xff   : > { %v1051_v13 = vsel %vm943_vm0, %v1050_v59, %v1046_v54 }
 0x100   : > { %v731_v32 = vpop.xlane.xlu1 %730  ;;  %v729_v3 = vpop.xlane.xlu0 %728 }
 0x101   : > { %v1060_v22 = vrot.slane %v731_v32, %v2084_v17  ;;  %v1055_v20 = vrot.slane %v729_v3, %v2090_v27 }
 0x103   : > { %v1056_v4 = vsel %vm950_vm1, %v1055_v20, %v1051_v13 }
 0x104   : > { %v735_v53 = vpop.xlane.xlu1 %734  ;;  %v1061_v29 = vsel %vm957_vm2, %v1060_v22, %v1056_v4  ;;  %v733_v11 = vpop.xlane.xlu0 %732 }
 0x105   : > { %v1070_v33 = vrot.slane %v735_v53, %v2095_v40  ;;  %v1065_v35 = vrot.slane %v733_v11, %v2098_v46 }
 0x107   : > { %v1066_v55 = vsel %vm964_vm3, %v1065_v35, %v1061_v29 }
 0x108   : > { %v739_v37 = vpop.xlane.xlu1 %738  ;;  %v1071_v34 = vsel %vm971_vm4, %v1070_v33, %v1066_v55  ;;  %v737_v49 = vpop.xlane.xlu0 %736 }
 0x109   : > { %v1080_v5 = vrot.slane %v739_v37, %v2111_v41  ;;  %v1075_v39 = vrot.slane %v737_v49, %v2119_v44 }
 0x10b   : > { %v1076_v10 = vsel %vm978_vm5, %v1075_v39, %v1071_v34 }
 0x10c   : > { %v743_v43 = vpop.xlane.xlu1 %742  ;;  %v1081_v26 = vsel %vm985_vm6, %v1080_v5, %v1076_v10  ;;  %v741_v21 = vpop.xlane.xlu0 %740 }
 0x10d   : > { %v1090_v45 = vrot.slane %v743_v43, %v2126_v31  ;;  %v1085_v51 = vrot.slane %v741_v21, %v2129_v56 }
 0x10f   : > { %v1086_v57 = vsel %vm992_vm7, %v1085_v51, %v1081_v26 }
 0x110   : > { %v747_v58 = vpop.xlane.xlu1 %746  ;;  %v1091_v63 = vsel %vm999_vm8, %v1090_v45, %v1086_v57  ;;  %v745_v6 = vpop.xlane.xlu0 %744 }
 0x111   : > { %v1100_v7 = vrot.slane %v747_v58, %v2144_v25  ;;  %v1095_v8 = vrot.slane %v745_v6, %v2147_v50 }
 0x113   : > { %v1096_v9 = vsel %vm1006_vm9, %v1095_v8, %v1091_v63 }
 0x114   : > { %v751_v15 = vpop.xlane.xlu1 %750  ;;  %v1101_v28 = vsel %vm1013_vm10, %v1100_v7, %v1096_v9  ;;  %v749_v30 = vpop.xlane.xlu0 %748 }
 0x115   : > { %v1110_v36 = vrot.slane %v751_v15, %v2152_v0  ;;  %v1105_v38 = vrot.slane %v749_v30, %v2155_v1 }
 0x117   : > { %v1106_v47 = vsel %vm1020_vm11, %v1105_v38, %v1101_v28 }
 0x118   : > { %v755_v52 = vpop.xlane.xlu1 %754  ;;  %v1111_v61 = vsel %vm1027_vm12, %v1110_v36, %v1106_v47  ;;  %v753_v62 = vpop.xlane.xlu0 %752 }
 0x119   : > { %v1120_v2 = vrot.slane %v755_v52, %v2166_v48  ;;  %v1115_v12 = vrot.slane %v753_v62, %v2169_v60 }
 0x11b   : > { %v1116_v19 = vsel %vm1034_vm13, %v1115_v12, %v1111_v61 }
 0x11c   : > { %v1121_v23 = vsel %vm1041_vm14, %v1120_v2, %v1116_v19  ;;  %v759_v14 = vpop.xlane.xlu1 %758  ;;  %v757_v42 = vpop.xlane.xlu0 %756 }
 0x11d   : > { %v1129_v59 = vrot.slane %v759_v14, %v2087_v18  ;;  %v1125_v54 = vrot.slane %v757_v42, %v2081_v16  ;;  %v2210_v13 = vsel %vm1359_vm15, %v1121_v23, %v1042_v24 }
 0x11f   : > { %v1130_v32 = vsel %vm943_vm0, %v1129_v59, %v1125_v54 }
 0x120   : > { %v789_v3 = vpop.xlane.xlu1 %788  ;;  %v761_v22 = vpop.xlane.xlu0 %760 }
 0x121   : > { %v1134_v20 = vrot.slane %v761_v22, %v2090_v27  ;;  %v1204_v11 = vrot.slane %v789_v3, %v2081_v16 }
 0x123   : > { %v1135_v4 = vsel %vm950_vm1, %v1134_v20, %v1130_v32 }
 0x124   : > { %v763_v53 = vpop.xlane.xlu1 %762  ;;  %v791_v29 = vpop.xlane.xlu0 %790 }
 0x125   : > { %v1139_v33 = vrot.slane %v763_v53, %v2084_v17  ;;  %v1208_v35 = vrot.slane %v791_v29, %v2087_v18 }
 0x127   : > { %v1140_v55 = vsel %vm957_vm2, %v1139_v33, %v1135_v4  ;;  %v1209_v24 = vsel %vm943_vm0, %v1208_v35, %v1204_v11 }
 0x128   : > { %v821_v37 = vpop.xlane.xlu1 %820  ;;  %v793_v34 = vpop.xlane.xlu0 %792 }
 0x129   : > { %v1213_v49 = vrot.slane %v793_v34, %v2090_v27  ;;  %v1283_v32 = vrot.slane %v821_v37, %v2081_v16 }
 0x12b   : > { %v1214_v5 = vsel %vm950_vm1, %v1213_v49, %v1209_v24 }
 0x12c   : > { %v765_v39 = vpop.xlane.xlu1 %764  ;;  %v823_v10 = vpop.xlane.xlu0 %822 }
 0x12d   : > { %v1287_v42 = vrot.slane %v823_v10, %v2087_v18  ;;  %v1144_v59 = vrot.slane %v765_v39, %v2098_v46 }
 0x12f   : > { %v1288_v29 = vsel %vm943_vm0, %v1287_v42, %v1283_v32  ;;  %v1145_v33 = vsel %vm964_vm3, %v1144_v59, %v1140_v55  ;;  %vm1361_vm0 = vcmask 1042434  }
 0x130   : > { %v825_v43 = vpop.xlane.xlu1 %824  ;;  %v795_v26 = vpop.xlane.xlu0 %794 }
 0x131   : > { %v1292_v54 = vrot.slane %v825_v43, %v2090_v27  ;;  %v1218_v3 = vrot.slane %v795_v26, %v2084_v17 }
 0x133   : > { %v1293_v27 = vsel %vm950_vm1, %v1292_v54, %v1288_v29  ;;  %v1219_v24 = vsel %vm957_vm2, %v1218_v3, %v1214_v5  ;;  %vm1363_vm1 = vcmask 1043459  }
 0x134   : > { %v797_v21 = vpop.xlane.xlu1 %796  ;;  %v767_v45 = vpop.xlane.xlu0 %766 }
 0x135   : > { %v1223_v4 = vrot.slane %v797_v21, %v2098_v46  ;;  %v1149_v53 = vrot.slane %v767_v45, %v2095_v40 }
 0x137   : > { %v1150_v55 = vsel %vm971_vm4, %v1149_v53, %v1145_v33 }
 0x138   : > { %v769_v51 = vpop.xlane.xlu1 %768  ;;  %v827_v57 = vpop.xlane.xlu0 %826 }
 0x139   : > { %v1154_v11 = vrot.slane %v769_v51, %v2119_v44  ;;  %v1297_v18 = vrot.slane %v827_v57, %v2084_v17  ;;  %v1224_v17 = vsel %vm964_vm3, %v1223_v4, %v1219_v24 }
 0x13b   : > { %v1155_v5 = vsel %vm978_vm5, %v1154_v11, %v1150_v55 }
 0x13c   : > { %v829_v58 = vpop.xlane.xlu1 %828  ;;  %v799_v63 = vpop.xlane.xlu0 %798 }
 0x13d   : > { %v1228_v16 = vrot.slane %v799_v63, %v2095_v40  ;;  %v1302_v37 = vrot.slane %v829_v58, %v2098_v46  ;;  %v1298_v46 = vsel %vm957_vm2, %v1297_v18, %v1293_v27  ;;  %vm1365_vm2 = vcmask 1044484  }
 0x13f   : > { %v1229_v51 = vsel %vm971_vm4, %v1228_v16, %v1224_v17  ;;  %v1303_v63 = vsel %vm964_vm3, %v1302_v37, %v1298_v46 }
 0x140   : > { %v801_v6 = vpop.xlane.xlu1 %800  ;;  %v771_v7 = vpop.xlane.xlu0 %770 }
 0x141   : > { %v1159_v35 = vrot.slane %v771_v7, %v2111_v41  ;;  %v1233_v34 = vrot.slane %v801_v6, %v2119_v44 }
 0x143   : > { %v1160_v57 = vsel %vm985_vm6, %v1159_v35, %v1155_v5  ;;  %v1234_v6 = vsel %vm978_vm5, %v1233_v34, %v1229_v51 }
 0x144   : > { %v773_v8 = vpop.xlane.xlu1 %772  ;;  %v831_v9 = vpop.xlane.xlu0 %830 }
 0x145   : > { %v1164_v49 = vrot.slane %v773_v8, %v2129_v56  ;;  %v1307_v43 = vrot.slane %v831_v9, %v2095_v40 }
 0x147   : > { %v1165_v7 = vsel %vm992_vm7, %v1164_v49, %v1160_v57 }
 0x148   : > { %v2222_v15 = vpop.xlane.xlu1 %832  ;;  %v803_v28 = vpop.xlane.xlu0 %802 }
 0x149   : > { %v1238_v21 = vrot.slane %v803_v28, %v2111_v41  ;;  %v1312_v32 = vrot.slane %v2222_v15, %v2119_v44 }
 0x14c   : > { %v2224_v30 = vpop.xlane.xlu1 %804  ;;  %v775_v36 = vpop.xlane.xlu0 %774 }
 0x14d   : > { %v1169_v26 = vrot.slane %v775_v36, %v2126_v31  ;;  %v1243_v58 = vrot.slane %v2224_v30, %v2129_v56  ;;  %v1308_v36 = vsel %vm971_vm4, %v1307_v43, %v1303_v63 }
 0x14e   : > { %v1313_v33 = vsel %vm978_vm5, %v1312_v32, %v1308_v36 }
 0x150   : > { %v777_v38 = vpop.xlane.xlu1 %776  ;;  %v2226_v47 = vpop.xlane.xlu0 %834 }
 0x151   : > { %v1174_v45 = vrot.slane %v777_v38, %v2147_v50  ;;  %v1170_v38 = vsel %vm999_vm8, %v1169_v26, %v1165_v7  ;;  %v1317_v4 = vrot.slane %v2226_v47, %v2111_v41 }
 0x153   : > { %v1175_v59 = vsel %vm1006_vm9, %v1174_v45, %v1170_v38  ;;  %v1318_v24 = vsel %vm985_vm6, %v1317_v4, %v1313_v33 }
 0x154   : > { %v2228_v52 = vpop.xlane.xlu1 %836  ;;  %v2230_v61 = vpop.xlane.xlu0 %806 }
 0x155   : > { %v1248_v42 = vrot.slane %v2230_v61, %v2126_v31  ;;  %v1322_v53 = vrot.slane %v2228_v52, %v2129_v56 }
 0x158   : > { %v2232_v62 = vpop.xlane.xlu1 %808  ;;  %v779_v2 = vpop.xlane.xlu0 %778 }
 0x159   : > { %v1179_v40 = vrot.slane %v779_v2, %v2144_v25  ;;  %v1239_v2 = vsel %vm985_vm6, %v1238_v21, %v1234_v6 }
 0x15a   : > { %v1244_v3 = vsel %vm992_vm7, %v1243_v58, %v1239_v2 }
 0x15b   : > { %v1180_v61 = vsel %vm1013_vm10, %v1179_v40, %v1175_v59  ;;  %v1249_v15 = vsel %vm999_vm8, %v1248_v42, %v1244_v3 }
 0x15c   : > { %v781_v12 = vpop.xlane.xlu1 %780  ;;  %v2234_v19 = vpop.xlane.xlu0 %838 }
 0x15d   : > { %v1184_v8 = vrot.slane %v781_v12, %v2155_v1  ;;  %v1253_v12 = vrot.slane %v2232_v62, %v2147_v50  ;;  %v1327_v47 = vrot.slane %v2234_v19, %v2126_v31 }
 0x15f   : > { %v1185_v62 = vsel %vm1020_vm11, %v1184_v8, %v1180_v61  ;;  %v1254_v56 = vsel %vm1006_vm9, %v1253_v12, %v1249_v15 }
 0x160   : > { %v2236_v23 = vpop.xlane.xlu1 %840  ;;  %v2238_v14 = vpop.xlane.xlu0 %810 }
 0x161   : > { %v1332_v27 = vrot.slane %v2236_v23, %v2147_v50  ;;  %v1323_v50 = vsel %vm992_vm7, %v1322_v53, %v1318_v24 }
 0x162   : > { %v1328_v55 = vsel %vm999_vm8, %v1327_v47, %v1323_v50 }
 0x164   : > { %v2245_v22 = vpop.xlane.xlu1 %812  ;;  %v783_v20 = vpop.xlane.xlu0 %782 }
 0x165   : > { %v1189_v30 = vrot.slane %v783_v20, %v2152_v0  ;;  %v1258_v20 = vrot.slane %v2238_v14, %v2144_v25  ;;  %v1263_v29 = vrot.slane %v2245_v22, %v2155_v1 }
 0x167   : > { %v1190_v18 = vsel %vm1027_vm12, %v1189_v30, %v1185_v62  ;;  %v1259_v16 = vsel %vm1013_vm10, %v1258_v20, %v1254_v56 }
 0x168   : > { %v785_v39 = vpop.xlane.xlu1 %784  ;;  %v2260_v10 = vpop.xlane.xlu0 %842  ;;  %v1264_v37 = vsel %vm1020_vm11, %v1263_v29, %v1259_v16 }
 0x169   : > { %v1194_v54 = vrot.slane %v785_v39, %v2169_v60  ;;  %v1337_v31 = vrot.slane %v2260_v10, %v2144_v25 }
 0x16b   : > { %v1195_v52 = vsel %vm1034_vm13, %v1194_v54, %v1190_v18 }
 0x16c   : > { %v845_v9 = vpop.xlane.xlu1 %844  ;;  %v815_v28 = vpop.xlane.xlu0 %814 }
 0x16d   : > { %v1268_v14 = vrot.slane %v815_v28, %v2152_v0  ;;  %v1342_v23 = vrot.slane %v845_v9, %v2155_v1 }
 0x16f   : > { %v1269_v39 = vsel %vm1027_vm12, %v1268_v14, %v1264_v37 }
 0x170   : > { %v817_v11 = vpop.xlane.xlu1 %816  ;;  %v787_v44 = vpop.xlane.xlu0 %786 }
 0x171   : > { %v1199_v41 = vrot.slane %v787_v44, %v2166_v48  ;;  %v1273_v22 = vrot.slane %v817_v11, %v2169_v60 }
 0x173   : > { %v1200_v35 = vsel %vm1041_vm14, %v1199_v41, %v1195_v52  ;;  %v1274_v43 = vsel %vm1034_vm13, %v1273_v22, %v1269_v39 }
 0x174   : > { %v1362_v19 = vsel %vm1361_vm0, %v1200_v35, %v2210_v13  ;;  %v819_v34 = vpop.xlane.xlu1 %818  ;;  %v847_v49 = vpop.xlane.xlu0 %846  ;;  %v1333_v13 = vsel %vm1006_vm9, %v1332_v27, %v1328_v55 }
 0x175   : > { %v1278_v17 = vrot.slane %v819_v34, %v2166_v48  ;;  %v1347_v25 = vrot.slane %v847_v49, %v2152_v0  ;;  %v1338_v26 = vsel %vm1013_vm10, %v1337_v31, %v1333_v13 }
 0x176   : > { %v1343_v21 = vsel %vm1020_vm11, %v1342_v23, %v1338_v26 }
 0x177   : > { %v1279_v10 = vsel %vm1041_vm14, %v1278_v17, %v1274_v43  ;;  %v1348_v57 = vsel %vm1027_vm12, %v1347_v25, %v1343_v21 }
 0x178   : > { %v1364_v5 = vsel %vm1363_vm1, %v1279_v10, %v1362_v19  ;;  %v849_v46 = vpop.xlane.xlu0 %848  ;;  %v851_v1 = vpop.xlane.xlu1 %850 }
 0x179   : > { %v1352_v45 = vrot.slane %v849_v46, %v2169_v60  ;;  %v1357_v51 = vrot.slane %v851_v1, %v2166_v48 }
 0x17b   : > { %v1353_v0 = vsel %vm1034_vm13, %v1352_v45, %v1348_v57 }
 0x17c   : > { %v1358_v58 = vsel %vm1041_vm14, %v1357_v51, %v1353_v0 }
 0x17d   : > { %v1366_v40 = vsel %vm1365_vm2, %v1358_v58, %v1364_v5 }
 0x17e   : > { %1368 = vst [vmem:[%s515_s7] sm:$0x1f] %v1366_v40 }
 0x17f PF: > { %p9_p10 = scmp.ge.s32.totalorder %s1537_s13, 4   ;;  %s2381_s9 = smov %s1497_s10 }
 0x180   : > { %s2382_s10 = smov %s1546_s16  ;;  %s2383_s11 = smov %s1537_s13 }
 0x181   :  { %11 = sbr.rel (!%p9_p10) target bundleno = 2 (0x2), region = 104 }

</bundles_post_ra>
